<compile_context>
chip_gen: v7x
topology: tpu7x:2x2x1
jax: 0.10.0
libtpu: 0.0.40
codegen_flags: <defaults>
</compile_context>

<pallas_src>
import functools

import jax
import jax.numpy as jnp
from jax.experimental import pallas as pl
from jax.experimental.pallas import tpu as pltpu


# ----------------------------- Pallas kernel -------------------------------


def _fused_backbone_kernel(x_ref, cw_ref, cb_ref, fw_ref, fb_ref, o_ref,
                           xp_ref, patch_ref, *, h, w, cin):
    """Fused conv3x3 + bias + ReLU + global-avg-pool + FC for B_blk images.

    x_ref    : (b_blk, h, w, cin)        f32  unpadded NHWC image block
    cw_ref   : (9*cin, cmid)             bf16 conv weight as one im2col slab
    cb_ref   : (1, cmid)                 f32  conv bias
    fw_ref   : (cmid, ncp)               f32  FC weight (classes padded to ncp)
    fb_ref   : (1, ncp)                  f32  FC bias (padded)
    o_ref    : (b_blk, 1, ncp)           f32  logits (padded)
    xp_ref   : (b_blk, h+2, w+2, cin)    bf16 VMEM halo staging buffer
    patch_ref: (b_blk*h*w, 9*cin)        bf16 VMEM im2col patch matrix
    """
    b_blk = x_ref.shape[0]
    cmid = cw_ref.shape[-1]
    hw = h * w

    # In-kernel halo: zero the padded staging buffer, then copy the interior.
    # (Zeroed every step so each megacore's private scratch is always valid.)
    xp_ref[...] = jnp.zeros_like(xp_ref)
    xp_ref[:, 1:h + 1, 1:w + 1, :] = x_ref[...].astype(jnp.bfloat16)

    # im2col: stage the 9 shifted views once into the patch matrix so the
    # conv becomes a single K=9*cin MXU matmul (MXU accumulates internally;
    # no per-tap f32 accumulator adds through the VPU).
    for kh in range(3):
        for kw in range(3):
            t = kh * 3 + kw
            patch_ref[:, t * cin:(t + 1) * cin] = (
                xp_ref[:, kh:kh + h, kw:kw + w, :].reshape(b_blk * hw, cin))

    acc = jnp.dot(patch_ref[...], cw_ref[...],
                  preferred_element_type=jnp.float32)          # (b*hw, cmid) f32

    # Epilogue stays in f32 on the accumulator (v5e VPU has no bf16 path).
    acc = jnp.maximum(acc + cb_ref[...], 0.0)                  # bias + ReLU

    # Fused global average pool over the spatial rows of each image.
    pooled = jnp.mean(acc.reshape(b_blk, hw, cmid), axis=1)    # (b_blk, cmid)

    # Fused FC head, kept entirely in f32 (tiny; <0.1% of kernel FLOPs).
    logits = jnp.dot(pooled, fw_ref[...],
                     preferred_element_type=jnp.float32) + fb_ref[...]
    o_ref[:, 0, :] = logits


# ------------------------------- Wrapper ------------------------------------


def _pick_batch_block(n):
    """Images per grid step; keep >= 2 grid steps so v7x's 2nd TC stays busy."""
    if n <= 2:
        return 1
    b = n // 2
    while n % b:
        b -= 1
    return b


def imagenet_forward(params, image_nchw, *, num_classes):
    """Forward pass of the Imagenet wrapper: backbone(image).

    image_nchw: (N, Cin, H, W) float32 (mean-centered / std-scaled).
    returns:    (N, num_classes) float32 logits.
    """
    n, cin, h, w = image_nchw.shape
    k9cin, cmid = params["conv_w"].shape
    ncp = params["fc_w"].shape[-1]
    assert k9cin == 9 * cin

    b_blk = _pick_batch_block(n)
    grid = (n // b_blk,)

    # NCHW -> NHWC (channels on lanes). No wrapper-side pad / bf16 copy: the
    # 1-pixel halo and the bf16 cast happen inside the kernel.
    x = jnp.transpose(image_nchw, (0, 2, 3, 1))

    kernel = functools.partial(_fused_backbone_kernel, h=h, w=w, cin=cin)

    flops = n * (2 * h * w * 9 * cin * cmid + 2 * cmid * ncp)
    bytes_accessed = (n * h * w * cin * 4          # f32 input
                      + 9 * cin * cmid * 2         # bf16 conv weight
                      + cmid * ncp * 4             # f32 fc weight
                      + (cmid + ncp) * 4           # f32 biases
                      + n * ncp * 4)               # f32 logits

    out = pl.pallas_call(
        kernel,
        out_shape=jax.ShapeDtypeStruct((n, 1, ncp), jnp.float32),
        grid_spec=pltpu.PrefetchScalarGridSpec(
            num_scalar_prefetch=0,
            grid=grid,
            in_specs=[
                pl.BlockSpec((b_blk, h, w, cin), lambda b: (b, 0, 0, 0)),
                pl.BlockSpec((9 * cin, cmid), lambda b: (0, 0)),
                pl.BlockSpec((1, cmid), lambda b: (0, 0)),
                pl.BlockSpec((cmid, ncp), lambda b: (0, 0)),
                pl.BlockSpec((1, ncp), lambda b: (0, 0)),
            ],
            out_specs=pl.BlockSpec((b_blk, 1, ncp), lambda b: (b, 0, 0)),
            scratch_shapes=[
                pltpu.VMEM((b_blk, h + 2, w + 2, cin), jnp.bfloat16),
                pltpu.VMEM((b_blk * h * w, 9 * cin), jnp.bfloat16),
            ],
        ),
        compiler_params=pltpu.CompilerParams(
            dimension_semantics=("parallel",),        # batch blocks across TCs
            vmem_limit_bytes=32 * 1024 * 1024,        # safe on v7x's 64 MiB VMEM
        ),
        cost_estimate=pl.CostEstimate(
            flops=flops, transcendentals=0, bytes_accessed=bytes_accessed),
    )(x, params["conv_w"], params["conv_b"], params["fc_w"], params["fc_b"])

    return out[:, 0, :num_classes]


# ------------------------------ Parameters -----------------------------------


def init_params(cin, cmid, num_classes, ncp):
    """Deterministic synthetic parameters (no checkpoint load).

    Weights are stored in kernel-ready layout; conv weight cast to bf16 once.
    """
    k0, k1, k2, k3 = jax.random.split(jax.random.PRNGKey(42), 4)
    # PyTorch layouts.
    conv_w = 0.1 * jax.random.normal(k0, (cmid, cin, 3, 3), jnp.float32)
    conv_b = 0.01 * jax.random.normal(k1, (cmid,), jnp.float32)
    fc_w = 0.1 * jax.random.normal(k2, (num_classes, cmid), jnp.float32)
    fc_b = 0.01 * jax.random.normal(k3, (num_classes,), jnp.float32)

    # (Cout, Cin, kh, kw) -> (kh, kw, Cin, Cout) -> single (9*Cin, Cout)
    # im2col slab so the conv is one K=9*Cin matmul.
    conv_w_slab = (jnp.transpose(conv_w, (2, 3, 1, 0))
                   .reshape(9 * cin, cmid).astype(jnp.bfloat16))
    # FC stays f32 (negligible FLOPs); class dim padded to a lane-dense 128.
    fc_w_pad = jnp.zeros((cmid, ncp), jnp.float32).at[:, :num_classes].set(fc_w.T)
    fc_b_pad = jnp.zeros((1, ncp), jnp.float32).at[0, :num_classes].set(fc_b)

    return dict(conv_w=conv_w_slab,
                conv_b=conv_b.reshape(1, cmid),
                fc_w=fc_w_pad,
                fc_b=fc_b_pad)


# --------------------------------- Main --------------------------------------


if __name__ == "__main__":
    N, CIN, H, W = 2, 4, 16, 16
    CMID = 128            # lane-dense mid channels (exactly fills v5e MXU)
    NUM_CLASSES = 16
    NCP = 128             # padded class dim (multiple of 128 lanes)

    key = jax.random.PRNGKey(0)
    image = jax.random.normal(key, (N, CIN, H, W), jnp.float32)

    params = init_params(CIN, CMID, NUM_CLASSES, NCP)

    fwd = jax.jit(functools.partial(imagenet_forward, num_classes=NUM_CLASSES))
    logits = fwd(params, image)
    jax.block_until_ready(logits)

    # Pure-JAX reference on identically-quantized operands (bf16 input/conv
    # weight, f32 math everywhere else, f32 FC).
    xq = jnp.transpose(image, (0, 2, 3, 1)).astype(jnp.bfloat16).astype(jnp.float32)
    xpad = jnp.pad(xq, ((0, 0), (1, 1), (1, 1), (0, 0)))
    cw = params["conv_w"].astype(jnp.float32).reshape(9, CIN, CMID)
    ref = jnp.zeros((N, H, W, CMID), jnp.float32)
    for kh in range(3):
        for kw in range(3):
            ref = ref + jnp.einsum("nhwc,cm->nhwm",
                                   xpad[:, kh:kh + H, kw:kw + W, :],
                                   cw[kh * 3 + kw])
    ref = jnp.maximum(ref + params["conv_b"][0], 0.0)
    pooled = ref.mean(axis=(1, 2))
    ref_logits = (pooled @ params["fc_w"] + params["fc_b"])[:, :NUM_CLASSES]

    assert logits.shape == (N, NUM_CLASSES)
    assert jnp.allclose(logits, ref_logits, atol=2e-2, rtol=2e-2), (
        float(jnp.max(jnp.abs(logits - ref_logits))))

    print("KERNEL_OK")
</pallas_src>

<mosaic_0001>
module attributes {stable_mosaic.version = 11 : i64} {
  func.func @_fused_backbone_kernel(%arg0: i32, %arg1: memref<1x16x16x4xf32, #tpu.memory_space<vmem>>, %arg2: memref<36x128xbf16, #tpu.memory_space<vmem>>, %arg3: memref<1x128xf32, #tpu.memory_space<vmem>>, %arg4: memref<128x128xf32, #tpu.memory_space<vmem>>, %arg5: memref<1x128xf32, #tpu.memory_space<vmem>>, %arg6: memref<1x1x128xf32, #tpu.memory_space<vmem>>, %arg7: memref<1x18x18x4xbf16, #tpu.memory_space<vmem>>, %arg8: memref<256x36xbf16, #tpu.memory_space<vmem>>) attributes {dimension_semantics = [#tpu.dimension_semantics<parallel>], iteration_bounds = array<i64: 2>, scalar_prefetch = 0 : i64, scratch_operands = 2 : i64, tpu.core_type = #tpu.core_type<tc>, window_params = [{transform_indices = @transform_0, window_bounds = array<i64: 1, 16, 16, 4>}, {pipeline_mode = #tpu.pipeline_mode<synchronous>, transform_indices = @transform_1, window_bounds = array<i64: 36, 128>}, {pipeline_mode = #tpu.pipeline_mode<synchronous>, transform_indices = @transform_2, window_bounds = array<i64: 1, 128>}, {pipeline_mode = #tpu.pipeline_mode<synchronous>, transform_indices = @transform_3, window_bounds = array<i64: 128, 128>}, {pipeline_mode = #tpu.pipeline_mode<synchronous>, transform_indices = @transform_4, window_bounds = array<i64: 1, 128>}, {transform_indices = @transform_5, window_bounds = array<i64: 1, 1, 128>}]} {
    %cst = arith.constant 0.000000e+00 : bf16
    %0 = vector.broadcast %cst : bf16 to vector<1x18x18x4xbf16>
    %c0 = arith.constant 0 : index
    %c0_0 = arith.constant 0 : index
    %c0_1 = arith.constant 0 : index
    %c0_2 = arith.constant 0 : index
    %1 = vector.load %arg7[%c0, %c0_0, %c0_1, %c0_2] : memref<1x18x18x4xbf16, #tpu.memory_space<vmem>>, vector<1x18x18x4xbf16>
    tpu.vector_store %arg7[%c0, %c0_0, %c0_1, %c0_2], %0 {strides = array<i32>} : memref<1x18x18x4xbf16, #tpu.memory_space<vmem>>, vector<1x18x18x4xbf16>,
    %c0_3 = arith.constant 0 : index
    %c0_4 = arith.constant 0 : index
    %c0_5 = arith.constant 0 : index
    %c0_6 = arith.constant 0 : index
    %2 = vector.load %arg1[%c0_3, %c0_4, %c0_5, %c0_6] : memref<1x16x16x4xf32, #tpu.memory_space<vmem>>, vector<1x16x16x4xf32>
    %3 = arith.truncf %2 : vector<1x16x16x4xf32> to vector<1x16x16x4xbf16>
    %c0_7 = arith.constant 0 : index
    %c1 = arith.constant 1 : index
    %c1_8 = arith.constant 1 : index
    %c0_9 = arith.constant 0 : index
    %4 = vector.load %arg7[%c0_7, %c1, %c1_8, %c0_9] : memref<1x18x18x4xbf16, #tpu.memory_space<vmem>>, vector<1x16x16x4xbf16>
    tpu.vector_store %arg7[%c0_7, %c1, %c1_8, %c0_9], %3 {strides = array<i32>} : memref<1x18x18x4xbf16, #tpu.memory_space<vmem>>, vector<1x16x16x4xbf16>,
    %c0_10 = arith.constant 0 : index
    %c0_11 = arith.constant 0 : index
    %c0_12 = arith.constant 0 : index
    %c0_13 = arith.constant 0 : index
    %5 = vector.load %arg7[%c0_10, %c0_11, %c0_12, %c0_13] : memref<1x18x18x4xbf16, #tpu.memory_space<vmem>>, vector<1x16x16x4xbf16>
    %6 = vector.shape_cast %5 : vector<1x16x16x4xbf16> to vector<256x4xbf16>
    %c0_14 = arith.constant 0 : index
    %c0_15 = arith.constant 0 : index
    %7 = vector.load %arg8[%c0_14, %c0_15] : memref<256x36xbf16, #tpu.memory_space<vmem>>, vector<256x4xbf16>
    tpu.vector_store %arg8[%c0_14, %c0_15], %6 {strides = array<i32>} : memref<256x36xbf16, #tpu.memory_space<vmem>>, vector<256x4xbf16>,
    %c0_16 = arith.constant 0 : index
    %c0_17 = arith.constant 0 : index
    %c1_18 = arith.constant 1 : index
    %c0_19 = arith.constant 0 : index
    %8 = vector.load %arg7[%c0_16, %c0_17, %c1_18, %c0_19] : memref<1x18x18x4xbf16, #tpu.memory_space<vmem>>, vector<1x16x16x4xbf16>
    %9 = vector.shape_cast %8 : vector<1x16x16x4xbf16> to vector<256x4xbf16>
    %c0_20 = arith.constant 0 : index
    %c4 = arith.constant 4 : index
    %10 = vector.load %arg8[%c0_20, %c4] : memref<256x36xbf16, #tpu.memory_space<vmem>>, vector<256x4xbf16>
    tpu.vector_store %arg8[%c0_20, %c4], %9 {strides = array<i32>} : memref<256x36xbf16, #tpu.memory_space<vmem>>, vector<256x4xbf16>,
    %c0_21 = arith.constant 0 : index
    %c0_22 = arith.constant 0 : index
    %c2 = arith.constant 2 : index
    %c0_23 = arith.constant 0 : index
    %11 = vector.load %arg7[%c0_21, %c0_22, %c2, %c0_23] : memref<1x18x18x4xbf16, #tpu.memory_space<vmem>>, vector<1x16x16x4xbf16>
    %12 = vector.shape_cast %11 : vector<1x16x16x4xbf16> to vector<256x4xbf16>
    %c0_24 = arith.constant 0 : index
    %c8 = arith.constant 8 : index
    %13 = vector.load %arg8[%c0_24, %c8] : memref<256x36xbf16, #tpu.memory_space<vmem>>, vector<256x4xbf16>
    tpu.vector_store %arg8[%c0_24, %c8], %12 {strides = array<i32>} : memref<256x36xbf16, #tpu.memory_space<vmem>>, vector<256x4xbf16>,
    %c0_25 = arith.constant 0 : index
    %c1_26 = arith.constant 1 : index
    %c0_27 = arith.constant 0 : index
    %c0_28 = arith.constant 0 : index
    %14 = vector.load %arg7[%c0_25, %c1_26, %c0_27, %c0_28] : memref<1x18x18x4xbf16, #tpu.memory_space<vmem>>, vector<1x16x16x4xbf16>
    %15 = vector.shape_cast %14 : vector<1x16x16x4xbf16> to vector<256x4xbf16>
    %c0_29 = arith.constant 0 : index
    %c12 = arith.constant 12 : index
    %16 = vector.load %arg8[%c0_29, %c12] : memref<256x36xbf16, #tpu.memory_space<vmem>>, vector<256x4xbf16>
    tpu.vector_store %arg8[%c0_29, %c12], %15 {strides = array<i32>} : memref<256x36xbf16, #tpu.memory_space<vmem>>, vector<256x4xbf16>,
    %c0_30 = arith.constant 0 : index
    %c1_31 = arith.constant 1 : index
    %c1_32 = arith.constant 1 : index
    %c0_33 = arith.constant 0 : index
    %17 = vector.load %arg7[%c0_30, %c1_31, %c1_32, %c0_33] : memref<1x18x18x4xbf16, #tpu.memory_space<vmem>>, vector<1x16x16x4xbf16>
    %18 = vector.shape_cast %17 : vector<1x16x16x4xbf16> to vector<256x4xbf16>
    %c0_34 = arith.constant 0 : index
    %c16 = arith.constant 16 : index
    %19 = vector.load %arg8[%c0_34, %c16] : memref<256x36xbf16, #tpu.memory_space<vmem>>, vector<256x4xbf16>
    tpu.vector_store %arg8[%c0_34, %c16], %18 {strides = array<i32>} : memref<256x36xbf16, #tpu.memory_space<vmem>>, vector<256x4xbf16>,
    %c0_35 = arith.constant 0 : index
    %c1_36 = arith.constant 1 : index
    %c2_37 = arith.constant 2 : index
    %c0_38 = arith.constant 0 : index
    %20 = vector.load %arg7[%c0_35, %c1_36, %c2_37, %c0_38] : memref<1x18x18x4xbf16, #tpu.memory_space<vmem>>, vector<1x16x16x4xbf16>
    %21 = vector.shape_cast %20 : vector<1x16x16x4xbf16> to vector<256x4xbf16>
    %c0_39 = arith.constant 0 : index
    %c20 = arith.constant 20 : index
    %22 = vector.load %arg8[%c0_39, %c20] : memref<256x36xbf16, #tpu.memory_space<vmem>>, vector<256x4xbf16>
    tpu.vector_store %arg8[%c0_39, %c20], %21 {strides = array<i32>} : memref<256x36xbf16, #tpu.memory_space<vmem>>, vector<256x4xbf16>,
    %c0_40 = arith.constant 0 : index
    %c2_41 = arith.constant 2 : index
    %c0_42 = arith.constant 0 : index
    %c0_43 = arith.constant 0 : index
    %23 = vector.load %arg7[%c0_40, %c2_41, %c0_42, %c0_43] : memref<1x18x18x4xbf16, #tpu.memory_space<vmem>>, vector<1x16x16x4xbf16>
    %24 = vector.shape_cast %23 : vector<1x16x16x4xbf16> to vector<256x4xbf16>
    %c0_44 = arith.constant 0 : index
    %c24 = arith.constant 24 : index
    %25 = vector.load %arg8[%c0_44, %c24] : memref<256x36xbf16, #tpu.memory_space<vmem>>, vector<256x4xbf16>
    tpu.vector_store %arg8[%c0_44, %c24], %24 {strides = array<i32>} : memref<256x36xbf16, #tpu.memory_space<vmem>>, vector<256x4xbf16>,
    %c0_45 = arith.constant 0 : index
    %c2_46 = arith.constant 2 : index
    %c1_47 = arith.constant 1 : index
    %c0_48 = arith.constant 0 : index
    %26 = vector.load %arg7[%c0_45, %c2_46, %c1_47, %c0_48] : memref<1x18x18x4xbf16, #tpu.memory_space<vmem>>, vector<1x16x16x4xbf16>
    %27 = vector.shape_cast %26 : vector<1x16x16x4xbf16> to vector<256x4xbf16>
    %c0_49 = arith.constant 0 : index
    %c28 = arith.constant 28 : index
    %28 = vector.load %arg8[%c0_49, %c28] : memref<256x36xbf16, #tpu.memory_space<vmem>>, vector<256x4xbf16>
    tpu.vector_store %arg8[%c0_49, %c28], %27 {strides = array<i32>} : memref<256x36xbf16, #tpu.memory_space<vmem>>, vector<256x4xbf16>,
    %c0_50 = arith.constant 0 : index
    %c2_51 = arith.constant 2 : index
    %c2_52 = arith.constant 2 : index
    %c0_53 = arith.constant 0 : index
    %29 = vector.load %arg7[%c0_50, %c2_51, %c2_52, %c0_53] : memref<1x18x18x4xbf16, #tpu.memory_space<vmem>>, vector<1x16x16x4xbf16>
    %30 = vector.shape_cast %29 : vector<1x16x16x4xbf16> to vector<256x4xbf16>
    %c0_54 = arith.constant 0 : index
    %c32 = arith.constant 32 : index
    %31 = vector.load %arg8[%c0_54, %c32] : memref<256x36xbf16, #tpu.memory_space<vmem>>, vector<256x4xbf16>
    tpu.vector_store %arg8[%c0_54, %c32], %30 {strides = array<i32>} : memref<256x36xbf16, #tpu.memory_space<vmem>>, vector<256x4xbf16>,
    %c0_55 = arith.constant 0 : index
    %c0_56 = arith.constant 0 : index
    %32 = vector.load %arg8[%c0_55, %c0_56] : memref<256x36xbf16, #tpu.memory_space<vmem>>, vector<256x36xbf16>
    %c0_57 = arith.constant 0 : index
    %c0_58 = arith.constant 0 : index
    %33 = vector.load %arg2[%c0_57, %c0_58] : memref<36x128xbf16, #tpu.memory_space<vmem>>, vector<36x128xbf16>
    %cst_59 = arith.constant dense<0.000000e+00> : vector<256x128xf32>
    %34 = tpu.matmul %32, %33, %cst_59 {dimension_numbers = #tpu.dot_dimension_numbers<[1], [0], [0], [1], [0, 0, 1, 1], [], []>} : vector<256x36xbf16>, vector<36x128xbf16>, vector<256x128xf32> -> vector<256x128xf32>
    %c0_60 = arith.constant 0 : index
    %c0_61 = arith.constant 0 : index
    %35 = vector.load %arg3[%c0_60, %c0_61] : memref<1x128xf32, #tpu.memory_space<vmem>>, vector<1x128xf32>
    %36 = vector.broadcast %35 : vector<1x128xf32> to vector<256x128xf32>
    %37 = arith.addf %34, %36 : vector<256x128xf32>
    %cst_62 = arith.constant 0.000000e+00 : f32
    %38 = vector.broadcast %cst_62 : f32 to vector<256x128xf32>
    %39 = arith.maximumf %37, %38 : vector<256x128xf32>
    %40 = vector.shape_cast %39 : vector<256x128xf32> to vector<1x256x128xf32>
    %cst_63 = arith.constant dense<0.000000e+00> : vector<1x128xf32>
    %41 = vector.multi_reduction <add>, %40, %cst_63 [1] : vector<1x256x128xf32> to vector<1x128xf32>
    %cst_64 = arith.constant 2.560000e+02 : f32
    %42 = vector.broadcast %cst_64 : f32 to vector<1x128xf32>
    %43 = arith.divf %41, %42 : vector<1x128xf32>
    %c0_65 = arith.constant 0 : index
    %c0_66 = arith.constant 0 : index
    %44 = vector.load %arg4[%c0_65, %c0_66] : memref<128x128xf32, #tpu.memory_space<vmem>>, vector<128x128xf32>
    %cst_67 = arith.constant dense<0.000000e+00> : vector<1x128xf32>
    %45 = tpu.matmul %43, %44, %cst_67 {dimension_numbers = #tpu.dot_dimension_numbers<[1], [0], [0], [1], [0, 0, 1, 1], [], []>} : vector<1x128xf32>, vector<128x128xf32>, vector<1x128xf32> -> vector<1x128xf32>
    %c0_68 = arith.constant 0 : index
    %c0_69 = arith.constant 0 : index
    %46 = vector.load %arg5[%c0_68, %c0_69] : memref<1x128xf32, #tpu.memory_space<vmem>>, vector<1x128xf32>
    %47 = arith.addf %45, %46 : vector<1x128xf32>
    %c0_70 = arith.constant 0 : index
    %c0_71 = arith.constant 0 : index
    %c0_72 = arith.constant 0 : index
    %48 = vector.load %arg6[%c0_70, %c0_71, %c0_72] : memref<1x1x128xf32, #tpu.memory_space<vmem>>, vector<1x1x128xf32>
    %49 = vector.shape_cast %48 : vector<1x1x128xf32> to vector<1x128xf32>
    %50 = vector.shape_cast %47 : vector<1x128xf32> to vector<1x1x128xf32>
    tpu.vector_store %arg6[%c0_70, %c0_71, %c0_72], %50 {strides = array<i32>} : memref<1x1x128xf32, #tpu.memory_space<vmem>>, vector<1x1x128xf32>,
    return
  }
  func.func @transform_0(%arg0: i32) -> (i32, i32, i32, i32) {
    %c0_i32 = arith.constant 0 : i32
    %c0_i32_0 = arith.constant 0 : i32
    %c0_i32_1 = arith.constant 0 : i32
    %c0_i32_2 = arith.constant 0 : i32
    return %arg0, %c0_i32, %c0_i32_0, %c0_i32_1 : i32, i32, i32, i32
  }
  func.func @transform_1(%arg0: i32) -> (i32, i32) {
    %c0_i32 = arith.constant 0 : i32
    %c0_i32_0 = arith.constant 0 : i32
    %c0_i32_1 = arith.constant 0 : i32
    return %c0_i32, %c0_i32_0 : i32, i32
  }
  func.func @transform_2(%arg0: i32) -> (i32, i32) {
    %c0_i32 = arith.constant 0 : i32
    %c0_i32_0 = arith.constant 0 : i32
    %c0_i32_1 = arith.constant 0 : i32
    return %c0_i32, %c0_i32_0 : i32, i32
  }
  func.func @transform_3(%arg0: i32) -> (i32, i32) {
    %c0_i32 = arith.constant 0 : i32
    %c0_i32_0 = arith.constant 0 : i32
    %c0_i32_1 = arith.constant 0 : i32
    return %c0_i32, %c0_i32_0 : i32, i32
  }
  func.func @transform_4(%arg0: i32) -> (i32, i32) {
    %c0_i32 = arith.constant 0 : i32
    %c0_i32_0 = arith.constant 0 : i32
    %c0_i32_1 = arith.constant 0 : i32
    return %c0_i32, %c0_i32_0 : i32, i32
  }
  func.func @transform_5(%arg0: i32) -> (i32, i32, i32) {
    %c0_i32 = arith.constant 0 : i32
    %c0_i32_0 = arith.constant 0 : i32
    %c0_i32_1 = arith.constant 0 : i32
    return %arg0, %c0_i32, %c0_i32_0 : i32, i32, i32
  }
}

</mosaic_0001>

<bundles_post_ra>
// kernel: imagenet_forward.1
= control target key start
LH: loop header
LB: loop body
LE: loop exit
PB: predicated region body
PF: predicated region fallthrough
CT: control target
= control target key end

     0   :  { %10 = vsyncpa [#allocation5], 0  ;;  %s6364_s0 = inlined_call_operand.vmem [shape: f32[2,16,16,4], index: 0, kind: input, shape index: {}]   ;;  %s6365_s1 = inlined_call_operand.vmem [shape: bf16[36,128], index: 1, kind: input, shape index: {}]   ;;  %s6366_s2 = inlined_call_operand.vmem [shape: f32[1,128], index: 2, kind: input, shape index: {}]   ;;  %s6367_s3 = inlined_call_operand.vmem [shape: f32[128,128], index: 3, kind: input, shape index: {}]   ;;  %s6368_s4 = inlined_call_operand.vmem [shape: f32[1,128], index: 4, kind: input, shape index: {}]   ;;  %s6369_s5 = inlined_call_operand.hbm [shape: f32[2,1,128], index: 5, kind: output, shape index: {}]  }
   0x1   :  { %12 = vsyncpa [#allocation5 + $0x1], 0  ;;  %s5072_s18 = smov 0   ;;  %s5074_s19 = smov 0  }
   0x2   :  { %s5076_s20 = smov 0   ;;  %s5078_s21 = smov 0  }
   0x3 LB: > { %s5093_s22 = sadd.s32 4294967295, %s5027_s21   ;;  %s4436_s23 = sadd.s32 4294967294, %s5027_s21   ;;  %s5027_s21 = sphi %s5078_s21, %s6385_s21   ;;  %s5023_s20 = sphi %s5076_s20, %s6384_s20   ;;  %s5019_s19 = sphi %s5074_s19, %s6383_s19   ;;  %s5015_s18 = sphi %s5072_s18, %s6382_s18  }
   0x4   : > { %s5097_s24 = sadd.s32 1, %s5027_s21   ;;  %s135_s25 = sadd.s32 1, %s5023_s20 }
   0x5   : > { %s132_s26 = ssub.s32 %s5027_s21, %s5097_s24  ;;  %p145_p0 = scmp.ne.s32.totalorder %s5023_s20, %s5019_s19 }
   0x6   : > { %p133_p1 = scmp.eq.s32.totalorder %s132_s26, 0  ;;  %p146_p2 = scmp.eq.s32.totalorder %s5093_s22, 1 }
   0x7   : > { %p151_p3 = scmp.ne.s32.totalorder %s5019_s19, %s5015_s18  ;;  %p152_p4 = scmp.eq.s32.totalorder %s4436_s23, 1 }
   0x8   : > { %s5108_s27 = scalar_select %p133_p1, %s5023_s20, %s135_s25  }
   0x9   : > { %p5110_p5 = por %p146_p2, %p145_p0  ;;  %p5114_p6 = por %p152_p4, %p151_p3 }
   0xa   : > { %p4439_p7 = scmp.ge.s32.totalorder %s5027_s21, 1  ;;  %p190_p8 = scmp.lt.s32.totalorder %s5027_s21, 3 }
   0xc   : > { %p191_p9 = pnand %p4439_p7, %p190_p8 }
   0xd   : > { %vm223_vm0 = vcmask (!%p191_p9), 27648   ;;  %vm226_vm1 = vcmask (!%p191_p9), 24576   ;;  %v5029_v0 = vmov (!%p191_p9), 0   ;;  %p217_p10 = scmp.lt.s32.totalorder (!%p191_p9), %s5093_s22, 1  ;;  %vm1041_vm2 = vsmask.f32 (!%p191_p9), 3328 }
   0xe   : > { %194 = sbr.rel (%p191_p9) target bundleno = 1000 (0x3e8), region = 40  ;;  %224 = vst.msk [vmem:[#allocation2] sm:$0xf] (!%p191_p9), %vm223_vm0, %v5029_v0  ;;  %225 = vst.msk [vmem:[#allocation2 + $0x4] sm:$0xf] (!%p191_p9), %vm223_vm0, %v5029_v0  ;;  %vm1637_vm4 = vcmask (!%p191_p9), 1042432  }
   0xf   : > { %227 = vst.msk [vmem:[#allocation2 + $0x8] sm:$0x1] (!%p191_p9), %vm226_vm1, %v5029_v0  ;;  %230 = vst.msk [vmem:[#allocation2 + $0x14] sm:$0x1] (!%p191_p9), %vm226_vm1, %v5029_v0  ;;  %vm1042_vm3 = vsmask.f32 (!%p191_p9), 7440 }
  0x10   : > { %228 = vst.msk [vmem:[#allocation2 + $0xc] sm:$0xf] (!%p191_p9), %vm223_vm0, %v5029_v0  ;;  %229 = vst.msk [vmem:[#allocation2 + $0x10] sm:$0xf] (!%p191_p9), %vm223_vm0, %v5029_v0  ;;  %vm407_vm5 = vsmask.f32 (!%p191_p9), 256 }
  0x11   : > { %231 = vst.msk [vmem:[#allocation2 + $0x18] sm:$0xf] (!%p191_p9), %vm223_vm0, %v5029_v0  ;;  %232 = vst.msk [vmem:[#allocation2 + $0x1c] sm:$0xf] (!%p191_p9), %vm223_vm0, %v5029_v0  ;;  %vm408_vm6 = vsmask.f32 (!%p191_p9), 4368 }
  0x12   : > { %233 = vst.msk [vmem:[#allocation2 + $0x20] sm:$0x1] (!%p191_p9), %vm226_vm1, %v5029_v0  ;;  %236 = vst.msk [vmem:[#allocation2 + $0x2c] sm:$0x1] (!%p191_p9), %vm226_vm1, %v5029_v0  ;;  %vm1638_vm7 = vcmask (!%p191_p9), 1046532   ;;  %s5030_s10 = smov (!%p191_p9), 8  }
  0x13   : > { %234 = vst.msk [vmem:[#allocation2 + $0x24] sm:$0xf] (!%p191_p9), %vm223_vm0, %v5029_v0  ;;  %235 = vst.msk [vmem:[#allocation2 + $0x28] sm:$0xf] (!%p191_p9), %vm223_vm0, %v5029_v0  ;;  %vm732_vm8 = vsmask.f32 (!%p191_p9), 7938 }
  0x14   : > { %237 = vst.msk [vmem:[#allocation2 + $0x30] sm:$0xf] (!%p191_p9), %vm223_vm0, %v5029_v0  ;;  %238 = vst.msk [vmem:[#allocation2 + $0x34] sm:$0xf] (!%p191_p9), %vm223_vm0, %v5029_v0  ;;  %s5031_s11 = smov (!%p191_p9), 4   ;;  %s5032_s12 = smov (!%p191_p9), 12  }
  0x15   : > { %239 = vst.msk [vmem:[#allocation2 + $0x38] sm:$0x1] %vm226_vm1, %v5029_v0  ;;  %242 = vst.msk [vmem:[#allocation2 + $0x44] sm:$0x1] %vm226_vm1, %v5029_v0  ;;  %s218_s30 = scalar_select %p217_p10, %s5093_s22, 1  ;;  %vm976_vm14 = vcmask 31744  }
  0x16   : > { %240 = vst.msk [vmem:[#allocation2 + $0x3c] sm:$0xf] %vm223_vm0, %v5029_v0  ;;  %241 = vst.msk [vmem:[#allocation2 + $0x40] sm:$0xf] %vm223_vm0, %v5029_v0  ;;  %v993_v4 = vld [vmem:[#allocation2] sm:$0xf] }
  0x17   : > { %243 = vst.msk [vmem:[#allocation2 + $0x48] sm:$0xf] %vm223_vm0, %v5029_v0  ;;  %244 = vst.msk [vmem:[#allocation2 + $0x4c] sm:$0xf] %vm223_vm0, %v5029_v0  ;;  %s4689_s6 = sshll.u32 %s218_s30, 8  ;;  %v1045_v9 = vshrl.u32 %v993_v4, 16 }
  0x18   : > { %245 = vst.msk [vmem:[#allocation2 + $0x50] sm:$0x1] %vm226_vm1, %v5029_v0  ;;  %248 = vst.msk [vmem:[#allocation2 + $0x5c] sm:$0x1] %vm226_vm1, %v5029_v0  ;;  %s5179_s9 = scalar_lea.vmem %s6364_s0, %s4689_s6  ;;  %v994_v5 = vld [vmem:[#allocation2 + $0x4] sm:$0xf] }
  0x19   : > { %246 = vst.msk [vmem:[#allocation2 + $0x54] sm:$0xf] %vm223_vm0, %v5029_v0  ;;  %247 = vst.msk [vmem:[#allocation2 + $0x58] sm:$0xf] %vm223_vm0, %v5029_v0  ;;  %v279_v1 = vld [vmem:[%s5179_s9] sm:$0xff]  ;;  %v280_v2 = vld [vmem:[%s5179_s9 + $0x8] sm:$0xff] }
  0x1a   : > { %249 = vst.msk [vmem:[#allocation2 + $0x60] sm:$0xf] %vm223_vm0, %v5029_v0  ;;  %250 = vst.msk [vmem:[#allocation2 + $0x64] sm:$0xf] %vm223_vm0, %v5029_v0  ;;  %v281_v3 = vld [vmem:[%s5179_s9 + $0x10] sm:$0xff]  ;;  %v4690_v7 = vpack.c.bf16 %v279_v1, %v279_v1  ;;  %v4691_v8 = vpack.c.bf16 %v280_v2, %v280_v2  ;;  %v1048_v10 = vshll.u32 %v993_v4, 16 }
  0x1b   : > { %251 = vst.msk [vmem:[#allocation2 + $0x68] sm:$0x1] %vm226_vm1, %v5029_v0  ;;  %254 = vst.msk [vmem:[#allocation2 + $0x74] sm:$0x1] %vm226_vm1, %v5029_v0  ;;  %v995_v6 = vld [vmem:[#allocation2 + $0x8] sm:$0x1]  ;;  %v4692_v18 = vpack.c.bf16 %v281_v3, %v281_v3 }
  0x1c   : > { %252 = vst.msk [vmem:[#allocation2 + $0x6c] sm:$0xf] %vm223_vm0, %v5029_v0  ;;  %253 = vst.msk [vmem:[#allocation2 + $0x70] sm:$0xf] %vm223_vm0, %v5029_v0  ;;  %v1054_v11 = vshll.u32 %v994_v5, 16  ;;  %v1058_v12 = vshrl.u32 %v994_v5, 16 }
  0x1d   : > { %255 = vst.msk [vmem:[#allocation2 + $0x78] sm:$0xf] %vm223_vm0, %v5029_v0  ;;  %256 = vst.msk [vmem:[#allocation2 + $0x7c] sm:$0xf] %vm223_vm0, %v5029_v0  ;;  %v1541_v13 = vld [vmem:[#allocation2] sm:$0xe] }
  0x1e   : > { %257 = vst.msk [vmem:[#allocation2 + $0x80] sm:$0x1] %vm226_vm1, %v5029_v0  ;;  %260 = vst.msk [vmem:[#allocation2 + $0x8c] sm:$0x1] %vm226_vm1, %v5029_v0  ;;  %v1064_v14 = vshll.u32 %v995_v6, 16  ;;  %v4506_v17 = vrot.slane %v1541_v13, 9 }
  0x1f   : > { %258 = vst.msk [vmem:[#allocation2 + $0x84] sm:$0xf] %vm223_vm0, %v5029_v0  ;;  %259 = vst.msk [vmem:[#allocation2 + $0x88] sm:$0xf] %vm223_vm0, %v5029_v0  ;;  %v1542_v15 = vld [vmem:[#allocation2 + $0x4] sm:$0xf] }
  0x20   : > { %261 = vst.msk [vmem:[#allocation2 + $0x90] sm:$0xf] %vm223_vm0, %v5029_v0  ;;  %262 = vst.msk [vmem:[#allocation2 + $0x94] sm:$0xf] %vm223_vm0, %v5029_v0  ;;  %v1543_v16 = vld [vmem:[#allocation2 + $0x8] sm:$0x1] }
  0x21   : > { %263 = vst.msk [vmem:[#allocation2 + $0x98] sm:$0x1] %vm226_vm1, %v5029_v0  ;;  %266 = vst.msk [vmem:[#allocation2 + $0xa4] sm:$0x1] %vm226_vm1, %v5029_v0  ;;  %v1047_v19 = vrot.slane %v1045_v9, 4  ;;  %v1050_v20 = vrot.slane %v1048_v10, 5 }
  0x22   : > { %264 = vst.msk [vmem:[#allocation2 + $0x9c] sm:$0xf] %vm223_vm0, %v5029_v0  ;;  %265 = vst.msk [vmem:[#allocation2 + $0xa0] sm:$0xf] %vm223_vm0, %v5029_v0  ;;  %v1056_v21 = vrot.slane %v1054_v11, 5  ;;  %v1060_v22 = vrot.slane %v1058_v12, 4 }
  0x23   : > { %267 = vst.msk [vmem:[#allocation2 + $0xa8] sm:$0xf] %vm223_vm0, %v5029_v0  ;;  %268 = vst.msk [vmem:[#allocation2 + $0xac] sm:$0xf] %vm223_vm0, %v5029_v0  ;;  %v1066_v24 = vrot.slane %v1064_v14, 5  ;;  %v1642_v25 = vrot.slane %v1542_v15, 5  ;;  %v1051_v30 = vor.u32 %v1050_v20, %v1047_v19 }
  0x24   : > { %269 = vst.msk [vmem:[#allocation2 + $0xb0] sm:$0x1] %vm226_vm1, %v5029_v0  ;;  %272 = vst.msk [vmem:[#allocation2 + $0xbc] sm:$0x1] %vm226_vm1, %v5029_v0  ;;  %v1645_v26 = vrot.slane %v1543_v16, 5  ;;  %v411_v27 = vshrl.u32 %v4690_v7, 16  ;;  %v1061_v31 = vor.u32 %v1060_v22, %v1056_v21 }
  0x25   : > { %270 = vst.msk [vmem:[#allocation2 + $0xb4] sm:$0xf] %vm223_vm0, %v5029_v0  ;;  %271 = vst.msk [vmem:[#allocation2 + $0xb8] sm:$0xf] %vm223_vm0, %v5029_v0  ;;  %v282_v28 = vld [vmem:[%s5179_s9 + $0x18] sm:$0xff]  ;;  %v414_v32 = vshll.u32 %v4690_v7, 16 }
  0x26   : > { %273 = vst.msk [vmem:[#allocation2 + $0xc0] sm:$0xf] %vm223_vm0, %v5029_v0  ;;  %274 = vst.msk [vmem:[#allocation2 + $0xc4] sm:$0xf] %vm223_vm0, %v5029_v0  ;;  %v419_v33 = vshrl.u32 %v4691_v8, 16  ;;  %v1644_v35 = vrot.slane %v1642_v25, 4  ;;  %v4693_v44 = vpack.c.bf16 %v282_v28, %v282_v28 }
  0x27   : > { %275 = vst.msk [vmem:[#allocation2 + $0xc8] sm:$0x1] %vm226_vm1, %v5029_v0  ;;  %278 = vst.msk [vmem:[#allocation2 + $0xd4] sm:$0x1] %vm226_vm1, %v5029_v0  ;;  %v413_v37 = vrot.slane %v411_v27, 7  ;;  %v422_v38 = vshll.u32 %v4691_v8, 16 }
  0x28   : > { %276 = vst.msk [vmem:[#allocation2 + $0xcc] sm:$0xf] %vm223_vm0, %v5029_v0  ;;  %277 = vst.msk [vmem:[#allocation2 + $0xd0] sm:$0xf] %vm223_vm0, %v5029_v0  ;;  %v1052_v39 = vrot.slane %v1051_v30, 4  ;;  %v1062_v40 = vrot.slane %v1061_v31, 4 }
  0x29   : > { %vm5186_vm9 = vmor %vm1637_vm4, %vm1638_vm7  ;;  %v421_v41 = vrot.slane %v419_v33, 7  ;;  %v734_v43 = vld [vmem:[#allocation2 + $0xc] sm:$0xf]  ;;  %v416_v46 = vor.u32 %v414_v32, %v413_v37  ;;  %v417_v47 = vrot.slane %v413_v37, 4  ;;  %v428_v49 = vshrl.u32 %v4692_v18, 16  ;;  %v283_v54 = vld [vmem:[%s5179_s9 + $0x20] sm:$0xff] }
  0x2a   : > { %vm5193_vm10 = vmor %vm1041_vm2, %vm1042_vm3  ;;  %v1643_v34 = vsel %vm5186_vm9, %v4506_v17, %v1642_v25  ;;  %v1646_v45 = vsel %vm5186_vm9, %v1644_v35, %v1645_v26  ;;  %v284_v55 = vld [vmem:[%s5179_s9 + $0x28] sm:$0xff]  ;;  %v740_v56 = vld [vmem:[#allocation2 + $0x14] sm:$0x1]  ;;  %v431_v0 = vshll.u32 %v4692_v18, 16  ;;  %v436_v1 = vshrl.u32 %v4693_v44, 16  ;;  %s5033_s13 = smov 24  }
  0x2b   : > { %vm5201_vm11 = vmor %vm407_vm5, %vm408_vm6  ;;  %v1057_v50 = vsel %vm5193_vm10, %v1052_v39, %v1056_v21  ;;  %v1067_v51 = vsel %vm5193_vm10, %v1062_v40, %v1066_v24  ;;  %v4522_v52 = vcombine.low %v1643_v34, %v1646_v45  ;;  %v424_v53 = vor.u32 %v422_v38, %v421_v41  ;;  %v285_v61 = vld [vmem:[%s5179_s9 + $0x30] sm:$0xff]  ;;  %v286_v62 = vld [vmem:[%s5179_s9 + $0x38] sm:$0xff]  ;;  %s5034_s14 = smov 20   ;;  %s5035_s15 = smov 32  }
  0x2c   : > { %vm5207_vm12 = vmand %vm223_vm0, %vm732_vm8  ;;  %v4490_v57 = vcombine.low %v1057_v50, %v1067_v51  ;;  %v426_v58 = vrot.slane %v421_v41, 4  ;;  %v430_v60 = vrot.slane %v428_v49, 7  ;;  %v439_v2 = vshll.u32 %v4693_v44, 16  ;;  %v743_v4 = vld [vmem:[#allocation2 + $0x18] sm:$0xf]  ;;  %s5036_s16 = smov 16  }
  0x2d   : > { %vm5215_vm13 = vmand %vm226_vm1, %vm407_vm5  ;;  %v735_v59 = vsel %vm5207_vm12, %v416_v46, %v734_v43  ;;  %1800 = vrot.lane.b32.xlu1 %v4522_v52, %s5030_s10  ;;  %v425_v63 = vsel %vm5201_vm11, %v417_v47, %v424_v53  ;;  %v4694_v5 = vpack.c.bf16 %v283_v54, %v283_v54  ;;  %v4695_v6 = vpack.c.bf16 %v284_v55, %v284_v55  ;;  %v747_v16 = vld [vmem:[#allocation2 + $0x20] sm:$0x1]  ;;  %v750_v20 = vld [vmem:[#allocation2 + $0x24] sm:$0xf]  ;;  %s5037_s17 = smov 28  }
  0x2e   : > { %736 = vst [vmem:[#allocation2 + $0xc] sm:$0xf] %v735_v59  ;;  %1476 = vrot.lane.b32.xlu0 %v4490_v57, %s5031_s11  ;;  %737 = vst.msk [vmem:[#allocation2 + $0x10] sm:$0xf] %vm223_vm0, %v425_v63  ;;  %v434_v3 = vrot.slane %v430_v60, 4  ;;  %v741_v7 = vsel %vm5215_vm13, %v426_v58, %v740_v56  ;;  %v433_v8 = vor.u32 %v431_v0, %v430_v60  ;;  %v438_v9 = vrot.slane %v436_v1, 7 }
  0x2f   : > { %742 = vst [vmem:[#allocation2 + $0x14] sm:$0x1] %v741_v7  ;;  %v4696_v10 = vpack.c.bf16 %v285_v61, %v285_v61  ;;  %v5236_v11 = vpack.c.bf16 %v286_v62, %v286_v62  ;;  %v445_v12 = vshrl.u32 %v4694_v5, 16  ;;  %v448_v13 = vshll.u32 %v4694_v5, 16  ;;  %v754_v21 = vld [vmem:[#allocation2 + $0x2c] sm:$0x1] }
  0x30   : > { %v453_v14 = vshrl.u32 %v4695_v6, 16  ;;  %v456_v15 = vshll.u32 %v4695_v6, 16  ;;  %v441_v17 = vor.u32 %v439_v2, %v438_v9  ;;  %v443_v18 = vrot.slane %v438_v9, 4  ;;  %v757_v32 = vld [vmem:[#allocation2 + $0x30] sm:$0xf]  ;;  %v287_v60 = vld [vmem:[%s5179_s9 + $0x40] sm:$0xff] }
  0x31   : > { %v744_v19 = vsel %vm5207_vm12, %v433_v8, %v743_v4  ;;  %v462_v22 = vshrl.u32 %v4696_v10, 16  ;;  %v447_v24 = vrot.slane %v445_v12, 7  ;;  %v465_v26 = vshll.u32 %v4696_v10, 16  ;;  %v288_v2 = vld [vmem:[%s5179_s9 + $0x48] sm:$0xff]  ;;  %v6111_v36 = vld [vmem:[#allocation2 + $0xd0] sm:$0xf] }
  0x32   : > { %745 = vst [vmem:[#allocation2 + $0x18] sm:$0xf] %v744_v19  ;;  %v455_v25 = vrot.slane %v453_v14, 7  ;;  %v442_v27 = vsel %vm5201_vm11, %v434_v3, %v441_v17  ;;  %v748_v28 = vsel %vm5215_vm13, %v443_v18, %v747_v16  ;;  %v470_v31 = vshrl.u32 %v5236_v11, 16 }
  0x33   : > { %v5244_v30 = vrot.slane %v462_v22, 7  ;;  %746 = vst.msk [vmem:[#allocation2 + $0x1c] sm:$0xf] %vm223_vm0, %v442_v27  ;;  %v450_v33 = vor.u32 %v448_v13, %v447_v24  ;;  %v451_v34 = vrot.slane %v447_v24, 4  ;;  %749 = vst [vmem:[#allocation2 + $0x20] sm:$0x1] %v748_v28  ;;  %v5267_v16 = vpack.c.bf16 %v287_v60, %v287_v60 }
  0x34   : > { %v458_v35 = vor.u32 %v456_v15, %v455_v25  ;;  %v460_v37 = vrot.slane %v455_v25, 4  ;;  %v473_v43 = vshll.u32 %v5236_v11, 16  ;;  %vm1524_vm15 = vcmask 64544  }
  0x35   : > { %v2587_v38 = vld [vmem:[#allocation2 + $0xc] sm:$0xe]  ;;  %v2588_v40 = vld [vmem:[#allocation2 + $0x10] sm:$0xf]  ;;  %v467_v41 = vor.u32 %v465_v26, %v5244_v30  ;;  %v751_v45 = vsel %vm5207_vm12, %v450_v33, %v750_v20  ;;  %vm1848_vm1 = vcmask 97344   ;;  %vm2025_vm2 = vcmask 130144  }
  0x36   : > { %v4914_v39 = vld [vmem:[#allocation2 + $0xc] sm:$0xff]   ;;  %v459_v44 = vsel %vm5201_vm11, %v451_v34, %v458_v35  ;;  %v2589_v46 = vld [vmem:[#allocation2 + $0x14] sm:$0x1]  ;;  %v2685_v47 = vrot.slane %v2588_v40, 5  ;;  %v755_v50 = vsel %vm5215_vm13, %v460_v37, %v754_v21  ;;  %752 = vst [vmem:[#allocation2 + $0x24] sm:$0xf] %v751_v45 }
  0x37   : > { %v1544_v49 = vld [vmem:[#allocation2 + $0xc] sm:$0xe]  ;;  %1977 = vrot.lane.b32.xlu0 %v4914_v39, %s5032_s12  ;;  %753 = vst.msk [vmem:[#allocation2 + $0x28] sm:$0xf] %vm223_vm0, %v459_v44  ;;  %v4570_v51 = vrot.slane %v2587_v38, 9  ;;  %v2688_v52 = vrot.slane %v2589_v46, 5  ;;  %v758_v55 = vsel %vm5207_vm12, %v467_v41, %v757_v32  ;;  %v5276_v32 = vpack.c.bf16 %v288_v2, %v288_v2 }
  0x38   : > { %v1545_v53 = vld [vmem:[#allocation2 + $0x10] sm:$0xf]  ;;  %v1546_v54 = vld [vmem:[#allocation2 + $0x14] sm:$0x1]  ;;  %756 = vst [vmem:[#allocation2 + $0x2c] sm:$0x1] %v755_v50 }
  0x39   : > { %v2687_v56 = vrot.slane %v2685_v47, 4  ;;  %v4507_v57 = vrot.slane %v1544_v49, 9  ;;  %v1649_v58 = vrot.slane %v1545_v53, 5  ;;  %v1652_v59 = vrot.slane %v1546_v54, 5  ;;  %759 = vst [vmem:[#allocation2 + $0x30] sm:$0xf] %v758_v55 }
  0x3a   : > { %v3631_v61 = vld [vmem:[#allocation2 + $0x18] sm:$0xe]  ;;  %v2686_v4 = vsel %vm5186_vm9, %v4570_v51, %v2685_v47  ;;  %v3632_v8 = vld [vmem:[#allocation2 + $0x1c] sm:$0xf]  ;;  %v3633_v9 = vld [vmem:[#allocation2 + $0x20] sm:$0x1] }
  0x3b   : > { %v1651_v62 = vrot.slane %v1649_v58, 4  ;;  %v4634_v63 = vrot.slane %v3631_v61, 9  ;;  %v2590_v0 = vld [vmem:[#allocation2 + $0x18] sm:$0xe]  ;;  %v2689_v5 = vsel %vm5186_vm9, %v2687_v56, %v2688_v52  ;;  %v3729_v12 = vrot.slane %v3632_v8, 5 }
  0x3c   : > { %v2045_v1 = vld [vmem:[#allocation2 + $0x18] sm:$0xf]  ;;  %v4571_v6 = vrot.slane %v2590_v0, 9  ;;  %v3732_v13 = vrot.slane %v3633_v9, 5  ;;  %v2591_v14 = vld [vmem:[#allocation2 + $0x1c] sm:$0xf]  ;;  %v4586_v18 = vcombine.low %v2686_v4, %v2689_v5  ;;  %v1650_v19 = vsel %vm5186_vm9, %v4507_v57, %v1649_v58 }
  0x3d   : > { %v4915_v3 = vld [vmem:[#allocation2 + $0x18] sm:$0xff]   ;;  %v2115_v10 = vshrl.u32 %v2045_v1, 16  ;;  %v2592_v15 = vld [vmem:[#allocation2 + $0x20] sm:$0x1]  ;;  %v1653_v20 = vsel %vm5186_vm9, %v1651_v62, %v1652_v59  ;;  %v2692_v21 = vrot.slane %v2591_v14, 5  ;;  %v3730_v22 = vsel %vm5186_vm9, %v4634_v63, %v3729_v12 }
  0x3e   : > { %v4916_v7 = vld [vmem:[#allocation2 + $0x18] sm:$0xff]   ;;  %1979 = vrot.lane.b32.xlu1 %v4915_v3, %s5032_s12  ;;  %v4917_v17 = vld [vmem:[#allocation2 + $0x24] sm:$0xff]   ;;  %v3731_v24 = vrot.slane %v3729_v12, 4  ;;  %v2695_v25 = vrot.slane %v2592_v15, 5  ;;  %v996_v28 = vld [vmem:[#allocation2 + $0xc] sm:$0xf]  ;;  %v4523_v39 = vcombine.low %v1650_v19, %v1653_v20 }
  0x3f   : > { %3021 = vrot.lane.b32.xlu0 %v4916_v7, %s5033_s13  ;;  %v3634_v26 = vld [vmem:[#allocation2 + $0x24] sm:$0xe]  ;;  %v3635_v27 = vld [vmem:[#allocation2 + $0x28] sm:$0xf]  ;;  %v2693_v33 = vsel %vm5186_vm9, %v4571_v6, %v2692_v21  ;;  %v2694_v34 = vrot.slane %v2692_v21, 4  ;;  %v2117_v46 = vrot.slane %v2115_v10, 4 }
  0x40   : > { %v3636_v35 = vld [vmem:[#allocation2 + $0x2c] sm:$0x1]  ;;  %v4635_v37 = vrot.slane %v3634_v26, 9  ;;  %v3736_v38 = vrot.slane %v3635_v27, 5  ;;  %v3733_v40 = vsel %vm5186_vm9, %v3731_v24, %v3732_v13  ;;  %v2046_v44 = vld [vmem:[#allocation2 + $0x1c] sm:$0xf] }
  0x41   : > { %v3739_v41 = vrot.slane %v3636_v35, 5  ;;  %v2047_v45 = vld [vmem:[#allocation2 + $0x20] sm:$0x1]  ;;  %v4650_v47 = vcombine.low %v3730_v22, %v3733_v40  ;;  %v2696_v49 = vsel %vm5186_vm9, %v2694_v34, %v2695_v25  ;;  %v2118_v53 = vshll.u32 %v2045_v1, 16  ;;  %v997_v56 = vld [vmem:[#allocation2 + $0x10] sm:$0xf] }
  0x42   : > { %3023 = vrot.lane.b32.xlu1 %v4917_v17, %s5033_s13  ;;  %v3737_v50 = vsel %vm5186_vm9, %v4635_v37, %v3736_v38  ;;  %v3738_v51 = vrot.slane %v3736_v38, 4  ;;  %v4587_v52 = vcombine.low %v2693_v33, %v2696_v49  ;;  %v2124_v54 = vshll.u32 %v2046_v44, 16  ;;  %v998_v59 = vld [vmem:[#allocation2 + $0x14] sm:$0x1]  ;;  %v3089_v3 = vld [vmem:[#allocation2 + $0x24] sm:$0xf] }
  0x43   : > { %2843 = vrot.lane.b32.xlu0 %v4586_v18, %s5034_s14  ;;  %v2128_v55 = vshrl.u32 %v2046_v44, 16  ;;  %v2134_v58 = vshll.u32 %v2047_v45, 16  ;;  %v1069_v60 = vshrl.u32 %v996_v28, 16  ;;  %v1072_v61 = vshll.u32 %v996_v28, 16  ;;  %v3090_v12 = vld [vmem:[#allocation2 + $0x28] sm:$0xf] }
  0x44   : > { %v3740_v57 = vsel %vm5186_vm9, %v3738_v51, %v3739_v41  ;;  %v2120_v63 = vrot.slane %v2118_v53, 5  ;;  %v2126_v0 = vrot.slane %v2124_v54, 5  ;;  %v1078_v6 = vshll.u32 %v997_v56, 16  ;;  %v3091_v22 = vld [vmem:[#allocation2 + $0x2c] sm:$0x1]  ;;  %v4918_v11 = vld [vmem:[#allocation2 + $0x24] sm:$0xff]  }
  0x45   : > { %v4651_v62 = vcombine.low %v3737_v50, %v3740_v57  ;;  %v2130_v2 = vrot.slane %v2128_v55, 4  ;;  %v2136_v1 = vrot.slane %v2134_v58, 5  ;;  %v1071_v4 = vrot.slane %v1069_v60, 4  ;;  %v2042_v28 = vld [vmem:[#allocation2 + $0xc] sm:$0xf] }
  0x46   : > { %1802 = vrot.lane.b32.xlu1 %v4523_v39, %s5030_s10  ;;  %v1074_v5 = vrot.slane %v1072_v61, 5  ;;  %v2121_v7 = vor.u32 %v2120_v63, %v2117_v46  ;;  %v1082_v9 = vshrl.u32 %v997_v56, 16  ;;  %v1088_v10 = vshll.u32 %v998_v59, 16  ;;  %v2043_v38 = vld [vmem:[#allocation2 + $0x10] sm:$0xf] }
  0x47   : > { %3887 = vrot.lane.b32.xlu0 %v4650_v47, %s5035_s15  ;;  %v2131_v8 = vor.u32 %v2130_v2, %v2126_v0  ;;  %v1080_v14 = vrot.slane %v1078_v6, 5  ;;  %v3159_v15 = vshrl.u32 %v3089_v3, 16  ;;  %v3162_v17 = vshll.u32 %v3089_v3, 16  ;;  %v2044_v49 = vld [vmem:[#allocation2 + $0x14] sm:$0x1] }
  0x48   : > { %v1075_v13 = vor.u32 %v1074_v5, %v1071_v4  ;;  %v2122_v18 = vrot.slane %v2121_v7, 4  ;;  %v1084_v20 = vrot.slane %v1082_v9, 4  ;;  %v1090_v21 = vrot.slane %v1088_v10, 5  ;;  %v999_v55 = vld [vmem:[#allocation2 + $0x18] sm:$0xf] }
  0x49   : > { %v2132_v19 = vrot.slane %v2131_v8, 4  ;;  %v3161_v25 = vrot.slane %v3159_v15, 4  ;;  %v3164_v26 = vrot.slane %v3162_v17, 5  ;;  %v3168_v27 = vshll.u32 %v3090_v12, 16  ;;  %v1000_v60 = vld [vmem:[#allocation2 + $0x1c] sm:$0xf] }
  0x4a   : > { %2845 = vrot.lane.b32.xlu1 %v4587_v52, %s5034_s14  ;;  %v1076_v24 = vrot.slane %v1075_v13, 4  ;;  %v2127_v33 = vsel %vm5193_vm10, %v2122_v18, %v2126_v0  ;;  %v1085_v35 = vor.u32 %v1084_v20, %v1080_v14  ;;  %v3172_v37 = vshrl.u32 %v3090_v12, 16  ;;  %v1001_v2 = vld [vmem:[#allocation2 + $0x20] sm:$0x1]  ;;  %v3086_v6 = vld [vmem:[#allocation2 + $0x18] sm:$0xf] }
  0x4b   : > { %3889 = vrot.lane.b32.xlu0 %v4651_v62, %s5035_s15  ;;  %v2137_v34 = vsel %vm5193_vm10, %v2132_v19, %v2136_v1  ;;  %v3165_v41 = vor.u32 %v3164_v26, %v3161_v25  ;;  %v3170_v44 = vrot.slane %v3168_v27, 5  ;;  %v3178_v47 = vshll.u32 %v3091_v22, 16  ;;  %v3087_v12 = vld [vmem:[#allocation2 + $0x1c] sm:$0xf] }
  0x4c   : > { %v4555_v39 = vcombine.low %v2127_v33, %v2137_v34  ;;  %v1081_v40 = vsel %vm5193_vm10, %v1076_v24, %v1080_v14  ;;  %v1086_v45 = vrot.slane %v1085_v35, 4  ;;  %v3174_v46 = vrot.slane %v3172_v37, 4  ;;  %v3088_v33 = vld [vmem:[#allocation2 + $0x20] sm:$0x1]  ;;  %v1002_v37 = vld [vmem:[#allocation2 + $0x24] sm:$0xf] }
  0x4d   : > { %v2091_v50 = vshrl.u32 %v2042_v28, 16  ;;  %v3166_v51 = vrot.slane %v3165_v41, 4  ;;  %v2094_v52 = vshll.u32 %v2042_v28, 16  ;;  %v2100_v53 = vshll.u32 %v2043_v38, 16 }
  0x4e   : > { %2524 = vrot.lane.b32.xlu1 %v4555_v39, %s5036_s16  ;;  %v2104_v54 = vshrl.u32 %v2043_v38, 16  ;;  %v1091_v56 = vsel %vm5193_vm10, %v1086_v45, %v1090_v21  ;;  %v3175_v57 = vor.u32 %v3174_v46, %v3170_v44  ;;  %v3180_v58 = vrot.slane %v3178_v47, 5 }
  0x4f   : > { %v2093_v59 = vrot.slane %v2091_v50, 4  ;;  %v4491_v61 = vcombine.low %v1081_v40, %v1091_v56  ;;  %v3171_v62 = vsel %vm5193_vm10, %v3166_v51, %v3170_v44  ;;  %v2096_v63 = vrot.slane %v2094_v52, 5  ;;  %v1003_v44 = vld [vmem:[#allocation2 + $0x28] sm:$0xf]  ;;  %v1004_v50 = vld [vmem:[#allocation2 + $0x2c] sm:$0x1] }
  0x50   : > { %v2102_v0 = vrot.slane %v2100_v53, 5  ;;  %v3176_v3 = vrot.slane %v3175_v57, 4  ;;  %v2106_v1 = vrot.slane %v2104_v54, 4  ;;  %v2110_v4 = vshll.u32 %v2044_v49, 16 }
  0x51   : > { %v1093_v5 = vshrl.u32 %v999_v55, 16  ;;  %1478 = vrot.lane.b32.xlu0 %v4491_v61, %s5031_s11  ;;  %v2097_v7 = vor.u32 %v2096_v63, %v2093_v59  ;;  %v1096_v8 = vshll.u32 %v999_v55, 16  ;;  %v1102_v9 = vshll.u32 %v1000_v60, 16  ;;  %v1547_v55 = vld [vmem:[#allocation2 + $0x18] sm:$0xe] }
  0x52   : > { %v1106_v10 = vshrl.u32 %v1000_v60, 16  ;;  %v3181_v13 = vsel %vm5193_vm10, %v3176_v3, %v3180_v58  ;;  %v2107_v14 = vor.u32 %v2106_v1, %v2102_v0  ;;  %v2112_v15 = vrot.slane %v2110_v4, 5  ;;  %v1548_v60 = vld [vmem:[#allocation2 + $0x1c] sm:$0xf] }
  0x53   : > { %v1095_v17 = vrot.slane %v1093_v5, 4  ;;  %v4619_v18 = vcombine.low %v3171_v62, %v3181_v13  ;;  %v2098_v19 = vrot.slane %v2097_v7, 4  ;;  %v1098_v20 = vrot.slane %v1096_v8, 5 }
  0x54   : > { %v1104_v21 = vrot.slane %v1102_v9, 5  ;;  %v2108_v22 = vrot.slane %v2107_v14, 4  ;;  %v1108_v24 = vrot.slane %v1106_v10, 4  ;;  %v1112_v25 = vshll.u32 %v1001_v2, 16  ;;  %v1549_v2 = vld [vmem:[#allocation2 + $0x20] sm:$0x1] }
  0x55   : > { %v3135_v26 = vshrl.u32 %v3086_v6, 16  ;;  %3568 = vrot.lane.b32.xlu1 %v4619_v18, %s5037_s17  ;;  %v2103_v27 = vsel %vm5193_vm10, %v2098_v19, %v2102_v0  ;;  %v1099_v28 = vor.u32 %v1098_v20, %v1095_v17  ;;  %v3138_v34 = vshll.u32 %v3086_v6, 16  ;;  %v1550_v6 = vld [vmem:[#allocation2 + $0x24] sm:$0xe]  ;;  %v1552_v18 = vld [vmem:[#allocation2 + $0x2c] sm:$0x1] }
  0x56   : > { %v3144_v35 = vshll.u32 %v3087_v12, 16  ;;  %v2113_v38 = vsel %vm5193_vm10, %v2108_v22, %v2112_v15  ;;  %v1109_v39 = vor.u32 %v1108_v24, %v1104_v21  ;;  %v1114_v40 = vrot.slane %v1112_v25, 5 }
  0x57   : > { %v3137_v41 = vrot.slane %v3135_v26, 4  ;;  %v4554_v45 = vcombine.low %v2103_v27, %v2113_v38  ;;  %v1100_v46 = vrot.slane %v1099_v28, 4  ;;  %v3140_v47 = vrot.slane %v3138_v34, 5  ;;  %v2048_v28 = vld [vmem:[#allocation2 + $0x24] sm:$0xf] }
  0x58   : > { %v3146_v49 = vrot.slane %v3144_v35, 5  ;;  %v1110_v51 = vrot.slane %v1109_v39, 4  ;;  %v3148_v52 = vshrl.u32 %v3087_v12, 16  ;;  %v3154_v53 = vshll.u32 %v3088_v33, 16  ;;  %v1551_v12 = vld [vmem:[#allocation2 + $0x28] sm:$0xf] }
  0x59   : > { %v1117_v54 = vshrl.u32 %v1002_v37, 16  ;;  %2522 = vrot.lane.b32.xlu0 %v4554_v45, %s5036_s16  ;;  %v1105_v56 = vsel %vm5193_vm10, %v1100_v46, %v1104_v21  ;;  %v3141_v57 = vor.u32 %v3140_v47, %v3137_v41  ;;  %v1120_v58 = vshll.u32 %v1002_v37, 16  ;;  %v2049_v38 = vld [vmem:[#allocation2 + $0x28] sm:$0xf]  ;;  %v2050_v45 = vld [vmem:[#allocation2 + $0x2c] sm:$0x1] }
  0x5a   : > { %v1126_v59 = vshll.u32 %v1003_v44, 16  ;;  %v1115_v61 = vsel %vm5193_vm10, %v1110_v51, %v1114_v40  ;;  %v3150_v62 = vrot.slane %v3148_v52, 4  ;;  %v3156_v63 = vrot.slane %v3154_v53, 5  ;;  %v761_v51 = vld [vmem:[#allocation2 + $0x38] sm:$0x1] }
  0x5b   : > { %v1119_v0 = vrot.slane %v1117_v54, 4  ;;  %v4492_v3 = vcombine.low %v1105_v56, %v1115_v61  ;;  %v3142_v1 = vrot.slane %v3141_v57, 4  ;;  %v1122_v4 = vrot.slane %v1120_v58, 5 }
  0x5c   : > { %v1128_v5 = vrot.slane %v1126_v59, 5  ;;  %v3151_v7 = vor.u32 %v3150_v62, %v3146_v49  ;;  %v1130_v8 = vshrl.u32 %v1003_v44, 16  ;;  %v1136_v9 = vshll.u32 %v1004_v50, 16  ;;  %v2051_v59 = vld [vmem:[#allocation2 + $0x30] sm:$0xf] }
  0x5d   : > { %v4508_v10 = vrot.slane %v1547_v55, 9  ;;  %1480 = vrot.lane.b32.xlu1 %v4492_v3, %s5031_s11  ;;  %v3147_v13 = vsel %vm5193_vm10, %v3142_v1, %v3146_v49  ;;  %v1123_v14 = vor.u32 %v1122_v4, %v1119_v0  ;;  %v1656_v15 = vrot.slane %v1548_v60, 5  ;;  %v2594_v0 = vld [vmem:[#allocation2 + $0x28] sm:$0xf] }
  0x5e   : > { %v1659_v17 = vrot.slane %v1549_v2, 5  ;;  %v3152_v19 = vrot.slane %v3151_v7, 4  ;;  %v1132_v20 = vrot.slane %v1130_v8, 4  ;;  %v1138_v21 = vrot.slane %v1136_v9, 5 }
  0x5f   : > { %v4509_v22 = vrot.slane %v1550_v6, 9  ;;  %v1124_v24 = vrot.slane %v1123_v14, 4  ;;  %v1657_v25 = vsel %vm5186_vm9, %v4508_v10, %v1656_v15  ;;  %v1658_v26 = vrot.slane %v1656_v15, 4 }
  0x60   : > { %v1663_v27 = vrot.slane %v1551_v12, 5  ;;  %v3157_v33 = vsel %vm5193_vm10, %v3152_v19, %v3156_v63  ;;  %v1133_v34 = vor.u32 %v1132_v20, %v1128_v5  ;;  %v1666_v35 = vrot.slane %v1552_v18, 5  ;;  %v2593_v63 = vld [vmem:[#allocation2 + $0x24] sm:$0xe] }
  0x61   : > { %v468_v37 = vrot.slane %v5244_v30, 4  ;;  %v4618_v39 = vcombine.low %v3147_v13, %v3157_v33  ;;  %v1129_v40 = vsel %vm5193_vm10, %v1124_v24, %v1128_v5  ;;  %v1660_v41 = vsel %vm5186_vm9, %v1658_v26, %v1659_v17  ;;  %v2595_v5 = vld [vmem:[#allocation2 + $0x2c] sm:$0x1] }
  0x62   : > { %v1664_v44 = vsel %vm5186_vm9, %v4509_v22, %v1663_v27  ;;  %v1134_v46 = vrot.slane %v1133_v34, 4  ;;  %v4524_v47 = vcombine.low %v1657_v25, %v1660_v41  ;;  %v1665_v49 = vrot.slane %v1663_v27, 4  ;;  %v290_v41 = vld [vmem:[%s5179_s9 + $0x58] sm:$0xff] }
  0x63   : > { %v472_v50 = vrot.slane %v470_v31, 7  ;;  %3566 = vrot.lane.b32.xlu0 %v4618_v39, %s5037_s17  ;;  %v2139_v30 = vshrl.u32 %v2048_v28, 16  ;;  %v2142_v52 = vshll.u32 %v2048_v28, 16  ;;  %v2148_v53 = vshll.u32 %v2049_v38, 16 }
  0x64   : > { %v2152_v54 = vshrl.u32 %v2049_v38, 16  ;;  %v1139_v55 = vsel %vm5193_vm10, %v1134_v46, %v1138_v21  ;;  %v1667_v56 = vsel %vm5186_vm9, %v1665_v49, %v1666_v35  ;;  %v2158_v4 = vshll.u32 %v2050_v45, 16  ;;  %v2596_v21 = vld [vmem:[#allocation2 + $0x30] sm:$0xe] }
  0x65   : > { %v475_v57 = vor.u32 %v473_v43, %v472_v50  ;;  %v477_v58 = vrot.slane %v472_v50, 4  ;;  %v4493_v60 = vcombine.low %v1129_v40, %v1139_v55  ;;  %v4525_v31 = vcombine.low %v1664_v44, %v1667_v56  ;;  %v289_v40 = vld [vmem:[%s5179_s9 + $0x50] sm:$0xff] }
  0x66   : > { %v2141_v61 = vrot.slane %v2139_v30, 4  ;;  %v2144_v62 = vrot.slane %v2142_v52, 5  ;;  %v2150_v3 = vrot.slane %v2148_v53, 5  ;;  %v2154_v1 = vrot.slane %v2152_v54, 4 }
  0x67   : > { %v476_v2 = vsel %vm5201_vm11, %v468_v37, %v475_v57  ;;  %1482 = vrot.lane.b32.xlu1 %v4493_v60, %s5031_s11  ;;  %1804 = vrot.lane.b32.xlu0 %v4524_v47, %s5030_s10  ;;  %v762_v6 = vsel %vm5215_vm13, %v477_v58, %v761_v51  ;;  %v2163_v7 = vshrl.u32 %v2051_v59, 16  ;;  %v2166_v8 = vshll.u32 %v2051_v59, 16 }
  0x68   : > { %760 = vst.msk [vmem:[#allocation2 + $0x34] sm:$0xf] %vm223_vm0, %v476_v2  ;;  %v2145_v43 = vor.u32 %v2144_v62, %v2141_v61  ;;  %v2155_v9 = vor.u32 %v2154_v1, %v2150_v3  ;;  %v2160_v10 = vrot.slane %v2158_v4, 5  ;;  %763 = vst [vmem:[#allocation2 + $0x38] sm:$0x1] %v762_v6  ;;  %v4572_v12 = vrot.slane %v2593_v63, 9 }
  0x69   : > { %v2699_v13 = vrot.slane %v2594_v0, 5  ;;  %v2165_v15 = vrot.slane %v2163_v7, 4  ;;  %v2168_v17 = vrot.slane %v2166_v8, 5  ;;  %v2702_v18 = vrot.slane %v2595_v5, 5  ;;  %v768_v61 = vld [vmem:[#allocation2 + $0x44] sm:$0x1] }
  0x6a   : > { %v2146_v14 = vrot.slane %v2145_v43, 4  ;;  %v2156_v19 = vrot.slane %v2155_v9, 4  ;;  %v479_v25 = vshrl.u32 %v5267_v16, 16  ;;  %v482_v26 = vshll.u32 %v5267_v16, 16  ;;  %v764_v16 = vld [vmem:[#allocation2 + $0x3c] sm:$0xf] }
  0x6b   : > { %v2701_v20 = vrot.slane %v2699_v13, 4  ;;  %1806 = vrot.lane.b32.xlu1 %v4525_v31, %s5030_s10  ;;  %1981 = vrot.lane.b32.xlu0 %v4918_v11, %s5032_s12  ;;  %v2700_v24 = vsel %vm5186_vm9, %v4572_v12, %v2699_v13  ;;  %v487_v33 = vshrl.u32 %v5276_v32, 16  ;;  %v490_v34 = vshll.u32 %v5276_v32, 16  ;;  %v3092_v31 = vld [vmem:[#allocation2 + $0x30] sm:$0xf] }
  0x6c   : > { %v2151_v22 = vsel %vm5193_vm10, %v2146_v14, %v2150_v3  ;;  %v2161_v27 = vsel %vm5193_vm10, %v2156_v19, %v2160_v10  ;;  %v2169_v37 = vor.u32 %v2168_v17, %v2165_v15  ;;  %v4573_v38 = vrot.slane %v2596_v21, 9  ;;  %v3637_v7 = vld [vmem:[#allocation2 + $0x30] sm:$0xe] }
  0x6d   : > { %v2703_v28 = vsel %vm5186_vm9, %v2701_v20, %v2702_v18  ;;  %v4556_v35 = vcombine.low %v2151_v22, %v2161_v27  ;;  %v481_v39 = vrot.slane %v479_v25, 7  ;;  %v489_v46 = vrot.slane %v487_v33, 7  ;;  %v1005_v25 = vld [vmem:[#allocation2 + $0x30] sm:$0xf] }
  0x6e   : > { %v4588_v51 = vcombine.low %v2700_v24, %v2703_v28  ;;  %v5366_v56 = vpack.c.bf16 %v289_v40, %v289_v40  ;;  %v2170_v57 = vrot.slane %v2169_v37, 4  ;;  %v5368_v3 = vpack.c.bf16 %v290_v41, %v290_v41  ;;  %v291_v40 = vld [vmem:[%s5179_s9 + $0x60] sm:$0xff] }
  0x6f   : > { %v4919_v44 = vld [vmem:[#allocation2 + $0x30] sm:$0xff]   ;;  %2526 = vrot.lane.b32.xlu0 %v4556_v35, %s5036_s16  ;;  %v2053_v47 = vld [vmem:[#allocation2 + $0x38] sm:$0x1]  ;;  %v484_v52 = vor.u32 %v482_v26, %v481_v39  ;;  %v492_v55 = vor.u32 %v490_v34, %v489_v46  ;;  %v485_v60 = vrot.slane %v481_v39, 4  ;;  %v494_v0 = vrot.slane %v489_v46, 4 }
  0x70   : > { %v2052_v45 = vld [vmem:[#allocation2 + $0x34] sm:$0xf]  ;;  %1983 = vrot.lane.b32.xlu1 %v4919_v44, %s5032_s12  ;;  %v2182_v32 = vshll.u32 %v2053_v47, 16  ;;  %v2598_v53 = vld [vmem:[#allocation2 + $0x38] sm:$0x1]  ;;  %v3183_v9 = vshrl.u32 %v3092_v31, 16 }
  0x71   : > { %v2172_v49 = vshll.u32 %v2052_v45, 16  ;;  %v2176_v50 = vshrl.u32 %v2052_v45, 16  ;;  %v2597_v30 = vld [vmem:[#allocation2 + $0x34] sm:$0xf]  ;;  %v2709_v63 = vrot.slane %v2598_v53, 5  ;;  %v493_v11 = vsel %vm5201_vm11, %v485_v60, %v492_v55 }
  0x72   : > { %v2706_v54 = vrot.slane %v2597_v30, 5  ;;  %v2184_v62 = vrot.slane %v2182_v32, 5  ;;  %v3093_v2 = vld [vmem:[#allocation2 + $0x34] sm:$0xf]  ;;  %v765_v43 = vsel %vm5207_vm12, %v484_v52, %v764_v16  ;;  %v3094_v6 = vld [vmem:[#allocation2 + $0x38] sm:$0x1]  ;;  %v769_v24 = vsel %vm5215_vm13, %v494_v0, %v768_v61 }
  0x73   : > { %v2174_v58 = vrot.slane %v2172_v49, 5  ;;  %v2178_v59 = vrot.slane %v2176_v50, 4  ;;  %2847 = vrot.lane.b32.xlu0 %v4588_v51, %s5034_s14  ;;  %v4920_v5 = vld [vmem:[#allocation2 + $0x30] sm:$0xff]   ;;  %766 = vst [vmem:[#allocation2 + $0x3c] sm:$0xf] %v765_v43  ;;  %v3186_v10 = vshll.u32 %v3092_v31, 16  ;;  %v5391_v32 = vpack.c.bf16 %v291_v40, %v291_v40 }
  0x74   : > { %v2708_v4 = vrot.slane %v2706_v54, 4  ;;  %v2707_v8 = vsel %vm5186_vm9, %v4573_v38, %v2706_v54  ;;  %767 = vst.msk [vmem:[#allocation2 + $0x40] sm:$0xf] %vm223_vm0, %v493_v11  ;;  %v3192_v12 = vshll.u32 %v3093_v2, 16  ;;  %v3638_v13 = vld [vmem:[#allocation2 + $0x34] sm:$0xf] }
  0x75   : > { %v2179_v1 = vor.u32 %v2178_v59, %v2174_v58  ;;  %v2175_v14 = vsel %vm5193_vm10, %v2170_v57, %v2174_v58  ;;  %v3196_v17 = vshrl.u32 %v3093_v2, 16  ;;  %v3202_v18 = vshll.u32 %v3094_v6, 16  ;;  %v3639_v19 = vld [vmem:[#allocation2 + $0x38] sm:$0x1]  ;;  %770 = vst [vmem:[#allocation2 + $0x44] sm:$0x1] %v769_v24 }
  0x76   : > { %v3185_v20 = vrot.slane %v3183_v9, 4  ;;  %v3188_v21 = vrot.slane %v3186_v10, 5  ;;  %v3194_v22 = vrot.slane %v3192_v12, 5  ;;  %v2710_v27 = vsel %vm5186_vm9, %v2708_v4, %v2709_v63  ;;  %v1006_v34 = vld [vmem:[#allocation2 + $0x34] sm:$0xf] }
  0x77   : > { %v2180_v15 = vrot.slane %v2179_v1, 4  ;;  %3025 = vrot.lane.b32.xlu0 %v4920_v5, %s5033_s13  ;;  %v3198_v28 = vrot.slane %v3196_v17, 4  ;;  %v4636_v33 = vrot.slane %v3637_v7, 9  ;;  %v3743_v38 = vrot.slane %v3638_v13, 5  ;;  %v1007_v58 = vld [vmem:[#allocation2 + $0x38] sm:$0x1] }
  0x78   : > { %v3189_v37 = vor.u32 %v3188_v21, %v3185_v20  ;;  %v3746_v39 = vrot.slane %v3639_v19, 5  ;;  %v3204_v44 = vrot.slane %v3202_v18, 5  ;;  %v1141_v45 = vshrl.u32 %v1005_v25, 16 }
  0x79   : > { %v2185_v26 = vsel %vm5193_vm10, %v2180_v15, %v2184_v62  ;;  %v3199_v41 = vor.u32 %v3198_v28, %v3194_v22  ;;  %v1144_v46 = vshll.u32 %v1005_v25, 16  ;;  %v4589_v16 = vcombine.low %v2707_v8, %v2710_v27 }
  0x7a   : > { %v4557_v35 = vcombine.low %v2175_v14, %v2185_v26  ;;  %v3190_v47 = vrot.slane %v3189_v37, 4  ;;  %v3745_v49 = vrot.slane %v3743_v38, 4  ;;  %v1150_v50 = vshll.u32 %v1006_v34, 16  ;;  %v3095_v54 = vld [vmem:[#allocation2 + $0x3c] sm:$0xf] }
  0x7b   : > { %v3200_v51 = vrot.slane %v3199_v41, 4  ;;  %v3744_v30 = vsel %vm5186_vm9, %v4636_v33, %v3743_v38  ;;  %v1154_v52 = vshrl.u32 %v1006_v34, 16  ;;  %v3096_v55 = vld [vmem:[#allocation2 + $0x40] sm:$0xf]  ;;  %v1143_v59 = vrot.slane %v1141_v45, 4 }
  0x7c   : > { %2528 = vrot.lane.b32.xlu1 %v4557_v35, %s5036_s16  ;;  %v3195_v53 = vsel %vm5193_vm10, %v3190_v47, %v3194_v22  ;;  %v3747_v57 = vsel %vm5186_vm9, %v3745_v49, %v3746_v39  ;;  %v1146_v60 = vrot.slane %v1144_v46, 5  ;;  %v3207_v61 = vshrl.u32 %v3095_v54, 16  ;;  %v3640_v0 = vld [vmem:[#allocation2 + $0x3c] sm:$0xe]  ;;  %v3097_v4 = vld [vmem:[#allocation2 + $0x44] sm:$0x1] }
  0x7d   : > { %v3205_v31 = vsel %vm5193_vm10, %v3200_v51, %v3204_v44  ;;  %v3210_v62 = vshll.u32 %v3095_v54, 16  ;;  %v3216_v63 = vshll.u32 %v3096_v55, 16  ;;  %v4921_v2 = vld [vmem:[#allocation2 + $0x3c] sm:$0xff]   ;;  %v3220_v5 = vshrl.u32 %v3096_v55, 16  ;;  %v3642_v12 = vld [vmem:[#allocation2 + $0x44] sm:$0x1] }
  0x7e   : > { %v4620_v1 = vcombine.low %v3195_v53, %v3205_v31  ;;  %v4652_v11 = vcombine.low %v3744_v30, %v3747_v57  ;;  %v1147_v43 = vor.u32 %v1146_v60, %v1143_v59  ;;  %v3641_v6 = vld [vmem:[#allocation2 + $0x40] sm:$0xf]  ;;  %v3209_v7 = vrot.slane %v3207_v61, 4  ;;  %v1008_v18 = vld [vmem:[#allocation2 + $0x3c] sm:$0xf] }
  0x7f   : > { %v3212_v8 = vrot.slane %v3210_v62, 5  ;;  %v3218_v9 = vrot.slane %v3216_v63, 5  ;;  %v3226_v10 = vshll.u32 %v3097_v4, 16  ;;  %v3222_v13 = vrot.slane %v3220_v5, 4  ;;  %v1009_v28 = vld [vmem:[#allocation2 + $0x40] sm:$0xf] }
  0x80   : > { %2849 = vrot.lane.b32.xlu1 %v4589_v16, %s5034_s14  ;;  %3570 = vrot.lane.b32.xlu0 %v4620_v1, %s5037_s17  ;;  %v1148_v14 = vrot.slane %v1147_v43, 4  ;;  %v1152_v15 = vrot.slane %v1150_v50, 5  ;;  %v1156_v17 = vrot.slane %v1154_v52, 4  ;;  %v1160_v21 = vshll.u32 %v1007_v58, 16  ;;  %v1553_v38 = vld [vmem:[#allocation2 + $0x30] sm:$0xe] }
  0x81   : > { %v3213_v19 = vor.u32 %v3212_v8, %v3209_v7  ;;  %v3228_v20 = vrot.slane %v3226_v10, 5  ;;  %v4637_v22 = vrot.slane %v3640_v0, 9  ;;  %v3223_v24 = vor.u32 %v3222_v13, %v3218_v9  ;;  %v1010_v45 = vld [vmem:[#allocation2 + $0x44] sm:$0x1]  ;;  %v1554_v46 = vld [vmem:[#allocation2 + $0x34] sm:$0xf] }
  0x82   : > { %v1153_v25 = vsel %vm5193_vm10, %v1148_v14, %v1152_v15  ;;  %v1157_v26 = vor.u32 %v1156_v17, %v1152_v15  ;;  %v3750_v27 = vrot.slane %v3641_v6, 5  ;;  %v1162_v34 = vrot.slane %v1160_v21, 5  ;;  %v1555_v16 = vld [vmem:[#allocation2 + $0x38] sm:$0x1]  ;;  %v4935_v30 = vld [vmem:[%s6365_s1] sm:$0xff]   ;;  %v4938_v6 = vld [vmem:[%s6365_s1 + $0x8] sm:$0xff]  }
  0x83   : > { %v3214_v33 = vrot.slane %v3213_v19, 4  ;;  %v3753_v35 = vrot.slane %v3642_v12, 5  ;;  %v1165_v37 = vshrl.u32 %v1008_v18, 16  ;;  %v3224_v39 = vrot.slane %v3223_v24, 4  ;;  %v1556_v57 = vld [vmem:[#allocation2 + $0x3c] sm:$0xe]  ;;  %4758 = vmatprep.subr.bf16.mxu0 %v4935_v30  ;;  %4855 = vmatprep.subr.bf16.mxu1 %v4935_v30 }
  0x84   : > { %3027 = vrot.lane.b32.xlu1 %v4921_v2, %s5033_s13  ;;  %3891 = vrot.lane.b32.xlu0 %v4652_v11, %s5035_s15  ;;  %v1158_v40 = vrot.slane %v1157_v26, 4  ;;  %v3751_v41 = vsel %vm5186_vm9, %v4637_v22, %v3750_v27  ;;  %v3752_v44 = vrot.slane %v3750_v27, 4  ;;  %v1168_v50 = vshll.u32 %v1008_v18, 16  ;;  %v1557_v61 = vld [vmem:[#allocation2 + $0x40] sm:$0xf]  ;;  %v292_v24 = vld [vmem:[%s5179_s9 + $0x68] sm:$0xff] }
  0x85   : > { %v3219_v47 = vsel %vm5193_vm10, %v3214_v33, %v3218_v9  ;;  %v1167_v49 = vrot.slane %v1165_v37, 4  ;;  %v1174_v51 = vshll.u32 %v1009_v28, 16  ;;  %v3229_v52 = vsel %vm5193_vm10, %v3224_v39, %v3228_v20  ;;  %v1558_v62 = vld [vmem:[#allocation2 + $0x44] sm:$0x1]  ;;  %4759 = vmatpush3.bf16.msra.mxu0 %v4935_v30  ;;  %4858 = vmatpush3.bf16.msra.mxu1 %v4935_v30  ;;  %v2054_v17 = vld [vmem:[#allocation2 + $0x3c] sm:$0xf] }
  0x86   : > { %v1163_v53 = vsel %vm5193_vm10, %v1158_v40, %v1162_v34  ;;  %v3754_v54 = vsel %vm5186_vm9, %v3752_v44, %v3753_v35  ;;  %v1178_v55 = vshrl.u32 %v1009_v28, 16  ;;  %v4621_v58 = vcombine.low %v3219_v47, %v3229_v52  ;;  %4760 = vmatprep.subr.bf16.mxu0 %v4938_v6  ;;  %4856 = vmatprep.subr.bf16.mxu1 %v4938_v6  ;;  %v2055_v22 = vld [vmem:[#allocation2 + $0x40] sm:$0xf]  ;;  %v771_v37 = vld [vmem:[#allocation2 + $0x48] sm:$0xf] }
  0x87   : > { %v4494_v59 = vcombine.low %v1153_v25, %v1163_v53  ;;  %v4653_v60 = vcombine.low %v3751_v41, %v3754_v54  ;;  %v1170_v31 = vrot.slane %v1168_v50, 5  ;;  %v1176_v63 = vrot.slane %v1174_v51, 5  ;;  %v4922_v40 = vld [vmem:[#allocation2 + $0x3c] sm:$0xff]   ;;  %v775_v54 = vld [vmem:[#allocation2 + $0x50] sm:$0x1] }
  0x88   : > { %v1180_v0 = vrot.slane %v1178_v55, 4  ;;  %v1184_v2 = vshll.u32 %v1010_v45, 16  ;;  %v4510_v1 = vrot.slane %v1553_v38, 9  ;;  %3572 = vrot.lane.b32.xlu1 %v4621_v58, %s5037_s17  ;;  %v1670_v5 = vrot.slane %v1554_v46, 5  ;;  %v2056_v38 = vld [vmem:[#allocation2 + $0x44] sm:$0x1] }
  0x89   : > { %3893 = vrot.lane.b32.xlu0 %v4653_v60, %s5035_s15  ;;  %v1171_v4 = vor.u32 %v1170_v31, %v1167_v49  ;;  %v1673_v11 = vrot.slane %v1555_v16, 5  ;;  %v4511_v43 = vrot.slane %v1556_v57, 9  ;;  %v1677_v9 = vrot.slane %v1557_v61, 5  ;;  %4761 = vmatpush3.bf16.msra.mxu0 %v4938_v6  ;;  %v2599_v45 = vld [vmem:[#allocation2 + $0x3c] sm:$0xe] }
  0x8a   : > { %v1181_v7 = vor.u32 %v1180_v0, %v1176_v63  ;;  %v1186_v8 = vrot.slane %v1184_v2, 5  ;;  %v1680_v10 = vrot.slane %v1558_v62, 5  ;;  %v1671_v13 = vsel %vm5186_vm9, %v4510_v1, %v1670_v5  ;;  %4859 = vmatpush3.bf16.msra.mxu1 %v4938_v6  ;;  %v2600_v51 = vld [vmem:[#allocation2 + $0x40] sm:$0xf]  ;;  %v2601_v60 = vld [vmem:[#allocation2 + $0x44] sm:$0x1] }
  0x8b   : > { %v1172_v12 = vrot.slane %v1171_v4, 4  ;;  %v1672_v14 = vrot.slane %v1670_v5, 4  ;;  %v496_v15 = vshrl.u32 %v5366_v56, 16  ;;  %v1678_v19 = vsel %vm5186_vm9, %v4511_v43, %v1677_v9 }
  0x8c   : > { %v1182_v18 = vrot.slane %v1181_v7, 4  ;;  %v1679_v20 = vrot.slane %v1677_v9, 4  ;;  %v499_v21 = vshll.u32 %v5366_v56, 16  ;;  %1484 = vrot.lane.b32.xlu1 %v4494_v59, %s5031_s11  ;;  %v504_v28 = vshrl.u32 %v5368_v3, 16 }
  0x8d   : > { %v1177_v25 = vsel %vm5193_vm10, %v1172_v12, %v1176_v63  ;;  %v1674_v26 = vsel %vm5186_vm9, %v1672_v14, %v1673_v11  ;;  %v498_v27 = vrot.slane %v496_v15, 7  ;;  %v507_v35 = vshll.u32 %v5368_v3, 16 }
  0x8e   : > { %v1187_v33 = vsel %vm5193_vm10, %v1182_v18, %v1186_v8  ;;  %v4526_v34 = vcombine.low %v1671_v13, %v1674_v26  ;;  %v1681_v56 = vsel %vm5186_vm9, %v1679_v20, %v1680_v10  ;;  %v4703_v46 = vpack.c.bf16 %v292_v24, %v292_v24  ;;  %v293_v18 = vld [vmem:[%s5179_s9 + $0x70] sm:$0xff] }
  0x8f   : > { %v4495_v39 = vcombine.low %v1177_v25, %v1187_v33  ;;  %v501_v41 = vor.u32 %v499_v21, %v498_v27  ;;  %v502_v44 = vrot.slane %v498_v27, 4  ;;  %v506_v16 = vrot.slane %v504_v28, 7  ;;  %v782_v25 = vld [vmem:[#allocation2 + $0x5c] sm:$0x1] }
  0x90   : > { %1808 = vrot.lane.b32.xlu0 %v4526_v34, %s5030_s10  ;;  %v2187_v47 = vshrl.u32 %v2054_v17, 16  ;;  %v2190_v49 = vshll.u32 %v2054_v17, 16  ;;  %v2196_v50 = vshll.u32 %v2055_v22, 16  ;;  %v4527_v30 = vcombine.low %v1678_v19, %v1681_v56  ;;  %v778_v17 = vld [vmem:[#allocation2 + $0x54] sm:$0xf] }
  0x91   : > { %1486 = vrot.lane.b32.xlu1 %v4495_v39, %s5031_s11  ;;  %v772_v3 = vsel %vm5207_vm12, %v501_v41, %v771_v37  ;;  %v2200_v52 = vshrl.u32 %v2055_v22, 16  ;;  %v2206_v53 = vshll.u32 %v2056_v38, 16  ;;  %v509_v55 = vor.u32 %v507_v35, %v506_v16  ;;  %v294_v39 = vld [vmem:[%s5179_s9 + $0x78] sm:$0xff] }
  0x92   : > { %v511_v57 = vrot.slane %v506_v16, 4  ;;  %773 = vst [vmem:[#allocation2 + $0x48] sm:$0xf] %v772_v3  ;;  %v2189_v58 = vrot.slane %v2187_v47, 4  ;;  %v2192_v59 = vrot.slane %v2190_v49, 5  ;;  %v2198_v31 = vrot.slane %v2196_v50, 5 }
  0x93   : > { %v2202_v61 = vrot.slane %v2200_v52, 4  ;;  %v4574_v62 = vrot.slane %v2599_v45, 9  ;;  %v2713_v63 = vrot.slane %v2600_v51, 5  ;;  %v510_v0 = vsel %vm5201_vm11, %v502_v44, %v509_v55  ;;  %v296_v3 = vld [vmem:[%s5179_s9 + $0x88] sm:$0xff] }
  0x94   : > { %1985 = vrot.lane.b32.xlu0 %v4922_v40, %s5032_s12  ;;  %v2193_v2 = vor.u32 %v2192_v59, %v2189_v58  ;;  %v2208_v1 = vrot.slane %v2206_v53, 5  ;;  %v776_v4 = vsel %vm5215_vm13, %v511_v57, %v775_v54  ;;  %774 = vst.msk [vmem:[#allocation2 + $0x4c] sm:$0xf] %vm223_vm0, %v510_v0  ;;  %v2716_v43 = vrot.slane %v2601_v60, 5  ;;  %v295_v40 = vld [vmem:[%s5179_s9 + $0x80] sm:$0xff] }
  0x95   : > { %1810 = vrot.lane.b32.xlu1 %v4527_v30, %s5030_s10  ;;  %v2203_v5 = vor.u32 %v2202_v61, %v2198_v31  ;;  %777 = vst [vmem:[#allocation2 + $0x50] sm:$0x1] %v776_v4  ;;  %v2715_v11 = vrot.slane %v2713_v63, 4  ;;  %v513_v6 = vshrl.u32 %v5391_v32, 16  ;;  %v516_v8 = vshll.u32 %v5391_v32, 16 }
  0x96   : > { %v2194_v7 = vrot.slane %v2193_v2, 4  ;;  %v521_v9 = vshrl.u32 %v4703_v46, 16  ;;  %v524_v13 = vshll.u32 %v4703_v46, 16  ;;  %v2714_v21 = vsel %vm5186_vm9, %v4574_v62, %v2713_v63 }
  0x97   : > { %v2204_v10 = vrot.slane %v2203_v5, 4  ;;  %v515_v12 = vrot.slane %v513_v6, 7  ;;  %v2717_v32 = vsel %vm5186_vm9, %v2715_v11, %v2716_v43  ;;  %v5468_v16 = vpack.c.bf16 %v293_v18, %v293_v18 }
  0x98   : > { %v2199_v14 = vsel %vm5193_vm10, %v2194_v7, %v2198_v31  ;;  %v523_v15 = vrot.slane %v521_v9, 7  ;;  %v4590_v46 = vcombine.low %v2714_v21, %v2717_v32  ;;  %v5477_v58 = vpack.c.bf16 %v294_v39, %v294_v39 }
  0x99   : > { %v2209_v19 = vsel %vm5193_vm10, %v2204_v10, %v2208_v1  ;;  %v2057_v20 = vld [vmem:[#allocation2 + $0x48] sm:$0xf]  ;;  %v518_v24 = vor.u32 %v516_v8, %v515_v12  ;;  %v519_v34 = vrot.slane %v515_v12, 4  ;;  %v5480_v4 = vpack.c.bf16 %v295_v40, %v295_v40 }
  0x9a   : > { %v2602_v22 = vld [vmem:[#allocation2 + $0x48] sm:$0xe]  ;;  %v4558_v26 = vcombine.low %v2199_v14, %v2209_v19  ;;  %v2211_v27 = vshrl.u32 %v2057_v20, 16  ;;  %v2214_v28 = vshll.u32 %v2057_v20, 16  ;;  %v526_v56 = vor.u32 %v524_v13, %v523_v15 }
  0x9b   : > { %v4575_v33 = vrot.slane %v2602_v22, 9  ;;  %v528_v35 = vrot.slane %v523_v15, 4  ;;  %v779_v37 = vsel %vm5207_vm12, %v518_v24, %v778_v17  ;;  %v3098_v38 = vld [vmem:[#allocation2 + $0x48] sm:$0xf]  ;;  %v2058_v44 = vld [vmem:[#allocation2 + $0x4c] sm:$0xf]  ;;  %v5482_v5 = vpack.c.bf16 %v296_v3, %v296_v3 }
  0x9c   : > { %v4923_v41 = vld [vmem:[#allocation2 + $0x48] sm:$0xff]   ;;  %2530 = vrot.lane.b32.xlu0 %v4558_v26, %s5036_s16  ;;  %v2213_v45 = vrot.slane %v2211_v27, 4  ;;  %780 = vst [vmem:[#allocation2 + $0x54] sm:$0xf] %v779_v37  ;;  %v2059_v47 = vld [vmem:[#allocation2 + $0x50] sm:$0x1]  ;;  %v527_v30 = vsel %vm5201_vm11, %v519_v34, %v526_v56 }
  0x9d   : > { %v2216_v49 = vrot.slane %v2214_v28, 5  ;;  %v2220_v50 = vshll.u32 %v2058_v44, 16  ;;  %v2224_v51 = vshrl.u32 %v2058_v44, 16  ;;  %1987 = vrot.lane.b32.xlu1 %v4923_v41, %s5032_s12  ;;  %v2230_v52 = vshll.u32 %v2059_v47, 16  ;;  %v2603_v53 = vld [vmem:[#allocation2 + $0x4c] sm:$0xf] }
  0x9e   : > { %v2604_v54 = vld [vmem:[#allocation2 + $0x50] sm:$0x1]  ;;  %781 = vst.msk [vmem:[#allocation2 + $0x58] sm:$0xf] %vm223_vm0, %v527_v30  ;;  %v3231_v55 = vshrl.u32 %v3098_v38, 16  ;;  %v783_v57 = vsel %vm5215_vm13, %v528_v35, %v782_v25  ;;  %v2720_v61 = vrot.slane %v2603_v53, 5 }
  0x9f   : > { %v2217_v59 = vor.u32 %v2216_v49, %v2213_v45  ;;  %v2222_v60 = vrot.slane %v2220_v50, 5  ;;  %v2226_v31 = vrot.slane %v2224_v51, 4  ;;  %v4924_v62 = vld [vmem:[#allocation2 + $0x48] sm:$0xff]   ;;  %784 = vst [vmem:[#allocation2 + $0x5c] sm:$0x1] %v783_v57  ;;  %v2232_v63 = vrot.slane %v2230_v52, 5  ;;  %v5498_v3 = vpop.permute.xlu1 %1800 }
  0xa0   : > { %2851 = vrot.lane.b32.xlu0 %v4590_v46, %s5034_s14  ;;  %v2723_v0 = vrot.slane %v2604_v54, 5  ;;  %v3099_v2 = vld [vmem:[#allocation2 + $0x4c] sm:$0xf]  ;;  %v3100_v1 = vld [vmem:[#allocation2 + $0x50] sm:$0x1]  ;;  %v2721_v6 = vsel %vm5186_vm9, %v4575_v33, %v2720_v61  ;;  %v2722_v7 = vrot.slane %v2720_v61, 4  ;;  %v5490_v19 = vpop.permute.xlu0 %1476 }
  0xa1   : > { %v2218_v11 = vrot.slane %v2217_v59, 4  ;;  %v2227_v43 = vor.u32 %v2226_v31, %v2222_v60  ;;  %v3233_v8 = vrot.slane %v3231_v55, 4  ;;  %v3234_v9 = vshll.u32 %v3098_v38, 16  ;;  %v3643_v22 = vld [vmem:[#allocation2 + $0x48] sm:$0xe] }
  0xa2   : > { %v3240_v10 = vshll.u32 %v3099_v2, 16  ;;  %v3244_v12 = vshrl.u32 %v3099_v2, 16  ;;  %v2724_v15 = vsel %vm5186_vm9, %v2722_v7, %v2723_v0  ;;  %v3250_v17 = vshll.u32 %v3100_v1, 16  ;;  %v3644_v39 = vld [vmem:[#allocation2 + $0x4c] sm:$0xf] }
  0xa3   : > { %v2223_v13 = vsel %vm5193_vm10, %v2218_v11, %v2222_v60  ;;  %v2228_v14 = vrot.slane %v2227_v43, 4  ;;  %v3101_v18 = vld [vmem:[#allocation2 + $0x54] sm:$0xf]  ;;  %v3236_v20 = vrot.slane %v3234_v9, 5  ;;  %v530_v24 = vshrl.u32 %v5468_v16, 16 }
  0xa4   : > { %3029 = vrot.lane.b32.xlu0 %v4924_v62, %s5033_s13  ;;  %v3242_v21 = vrot.slane %v3240_v10, 5  ;;  %v3246_v32 = vrot.slane %v3244_v12, 4  ;;  %v4591_v26 = vcombine.low %v2721_v6, %v2724_v15  ;;  %v3252_v27 = vrot.slane %v3250_v17, 5  ;;  %v3645_v46 = vld [vmem:[#allocation2 + $0x50] sm:$0x1] }
  0xa5   : > { %v2233_v25 = vsel %vm5193_vm10, %v2228_v14, %v2232_v63  ;;  %v3102_v28 = vld [vmem:[#allocation2 + $0x58] sm:$0xf]  ;;  %v533_v33 = vshll.u32 %v5468_v16, 16  ;;  %v3237_v56 = vor.u32 %v3236_v20, %v3233_v8  ;;  %v3255_v38 = vshrl.u32 %v3101_v18, 16  ;;  %v1011_v30 = vld [vmem:[#allocation2 + $0x48] sm:$0xf] }
  0xa6   : > { %v4559_v34 = vcombine.low %v2223_v13, %v2233_v25  ;;  %v3247_v35 = vor.u32 %v3246_v32, %v3242_v21  ;;  %v3103_v37 = vld [vmem:[#allocation2 + $0x5c] sm:$0x1]  ;;  %v3258_v40 = vshll.u32 %v3101_v18, 16  ;;  %v3264_v41 = vshll.u32 %v3102_v28, 16  ;;  %v1012_v57 = vld [vmem:[#allocation2 + $0x4c] sm:$0xf] }
  0xa7   : > { %v3268_v44 = vshrl.u32 %v3102_v28, 16  ;;  %v3274_v45 = vshll.u32 %v3103_v37, 16  ;;  %v3238_v47 = vrot.slane %v3237_v56, 4  ;;  %v3257_v50 = vrot.slane %v3255_v38, 4  ;;  %v1013_v1 = vld [vmem:[#allocation2 + $0x50] sm:$0x1] }
  0xa8   : > { %2532 = vrot.lane.b32.xlu1 %v4559_v34, %s5036_s16  ;;  %v3248_v49 = vrot.slane %v3247_v35, 4  ;;  %v4638_v51 = vrot.slane %v3643_v22, 9  ;;  %v3260_v52 = vrot.slane %v3258_v40, 5  ;;  %v3266_v53 = vrot.slane %v3264_v41, 5  ;;  %v3646_v43 = vld [vmem:[#allocation2 + $0x54] sm:$0xe] }
  0xa9   : > { %v3270_v54 = vrot.slane %v3268_v44, 4  ;;  %v3276_v55 = vrot.slane %v3274_v45, 5  ;;  %v5500_v59 = vpop.permute.xlu0 %1977  ;;  %v3243_v60 = vsel %vm5193_vm10, %v3238_v47, %v3242_v21  ;;  %v3757_v61 = vrot.slane %v3644_v39, 5  ;;  %v4925_v6 = vld [vmem:[#allocation2 + $0x54] sm:$0xff]   ;;  %v3648_v18 = vld [vmem:[#allocation2 + $0x5c] sm:$0x1] }
  0xaa   : > { %v3253_v31 = vsel %vm5193_vm10, %v3248_v49, %v3252_v27  ;;  %v3760_v62 = vrot.slane %v3645_v46, 5  ;;  %v3261_v0 = vor.u32 %v3260_v52, %v3257_v50  ;;  %v1189_v11 = vshrl.u32 %v1011_v30, 16  ;;  %v3647_v12 = vld [vmem:[#allocation2 + $0x58] sm:$0xf]  ;;  %v1014_v25 = vld [vmem:[#allocation2 + $0x54] sm:$0xf] }
  0xab   : > { %v4622_v63 = vcombine.low %v3243_v60, %v3253_v31  ;;  %v3271_v2 = vor.u32 %v3270_v54, %v3266_v53  ;;  %v3758_v7 = vsel %vm5186_vm9, %v4638_v51, %v3757_v61  ;;  %v3759_v8 = vrot.slane %v3757_v61, 4  ;;  %v1015_v35 = vld [vmem:[#allocation2 + $0x58] sm:$0xf]  ;;  %v1016_v44 = vld [vmem:[#allocation2 + $0x5c] sm:$0x1] }
  0xac   : > { %2853 = vrot.lane.b32.xlu1 %v4591_v26, %s5034_s14  ;;  %v1192_v9 = vshll.u32 %v1011_v30, 16  ;;  %v1198_v10 = vshll.u32 %v1012_v57, 16  ;;  %v3262_v13 = vrot.slane %v3261_v0, 4  ;;  %v1191_v15 = vrot.slane %v1189_v11, 4  ;;  %v1559_v50 = vld [vmem:[#allocation2 + $0x48] sm:$0xe] }
  0xad   : > { %3574 = vrot.lane.b32.xlu0 %v4622_v63, %s5037_s17  ;;  %v3272_v14 = vrot.slane %v3271_v2, 4  ;;  %v1202_v17 = vshrl.u32 %v1012_v57, 16  ;;  %v3761_v20 = vsel %vm5186_vm9, %v3759_v8, %v3760_v62  ;;  %v1208_v22 = vshll.u32 %v1013_v1, 16  ;;  %v1560_v54 = vld [vmem:[#allocation2 + $0x4c] sm:$0xf] }
  0xae   : > { %v1194_v21 = vrot.slane %v1192_v9, 5  ;;  %v1200_v32 = vrot.slane %v1198_v10, 5  ;;  %v3267_v27 = vsel %vm5193_vm10, %v3262_v13, %v3266_v53  ;;  %v4654_v34 = vcombine.low %v3758_v7, %v3761_v20  ;;  %v1561_v62 = vld [vmem:[#allocation2 + $0x50] sm:$0x1]  ;;  %v1563_v10 = vld [vmem:[#allocation2 + $0x58] sm:$0xf] }
  0xaf   : > { %v3277_v28 = vsel %vm5193_vm10, %v3272_v14, %v3276_v55  ;;  %v1204_v56 = vrot.slane %v1202_v17, 4  ;;  %v1210_v40 = vrot.slane %v1208_v22, 5  ;;  %v4639_v41 = vrot.slane %v3646_v43, 9  ;;  %v1562_v43 = vld [vmem:[#allocation2 + $0x54] sm:$0xe] }
  0xb0   : > { %v5512_v26 = vpop.permute.xlu1 %1979  ;;  %3031 = vrot.lane.b32.xlu1 %v4925_v6, %s5033_s13  ;;  %v4623_v38 = vcombine.low %v3267_v27, %v3277_v28  ;;  %v1195_v39 = vor.u32 %v1194_v21, %v1191_v15  ;;  %v3764_v46 = vrot.slane %v3647_v12, 5  ;;  %v3767_v47 = vrot.slane %v3648_v18, 5  ;;  %v1564_v12 = vld [vmem:[#allocation2 + $0x5c] sm:$0x1] }
  0xb1   : > { %v5518_v37 = vpop.permute.xlu0 %3021  ;;  %3895 = vrot.lane.b32.xlu0 %v4654_v34, %s5035_s15  ;;  %v1205_v45 = vor.u32 %v1204_v56, %v1200_v32  ;;  %v1213_v49 = vshrl.u32 %v1014_v25, 16  ;;  %v1216_v30 = vshll.u32 %v1014_v25, 16  ;;  %v1222_v52 = vshll.u32 %v1015_v35, 16 }
  0xb2   : > { %v1196_v51 = vrot.slane %v1195_v39, 4  ;;  %v1226_v53 = vshrl.u32 %v1015_v35, 16  ;;  %v3765_v60 = vsel %vm5186_vm9, %v4639_v41, %v3764_v46  ;;  %v3766_v31 = vrot.slane %v3764_v46, 4  ;;  %v785_v35 = vld [vmem:[#allocation2 + $0x60] sm:$0xf] }
  0xb3   : > { %v1206_v57 = vrot.slane %v1205_v45, 4  ;;  %v1215_v61 = vrot.slane %v1213_v49, 4  ;;  %v1218_v2 = vrot.slane %v1216_v30, 5  ;;  %v1224_v1 = vrot.slane %v1222_v52, 5  ;;  %v2061_v45 = vld [vmem:[#allocation2 + $0x58] sm:$0xf] }
  0xb4   : > { %v5522_v55 = vpop.permute.xlu1 %3023  ;;  %3576 = vrot.lane.b32.xlu1 %v4623_v38, %s5037_s17  ;;  %v1201_v0 = vsel %vm5193_vm10, %v1196_v51, %v1200_v32  ;;  %v1228_v11 = vrot.slane %v1226_v53, 4  ;;  %v3768_v7 = vsel %vm5186_vm9, %v3766_v31, %v3767_v47  ;;  %v1232_v8 = vshll.u32 %v1016_v44, 16  ;;  %v2060_v38 = vld [vmem:[#allocation2 + $0x54] sm:$0xf]  ;;  %v789_v53 = vld [vmem:[#allocation2 + $0x68] sm:$0x1] }
  0xb5   : > { %v5526_v63 = vpop.permute.xlu0 %2843  ;;  %v1211_v6 = vsel %vm5193_vm10, %v1206_v57, %v1210_v40  ;;  %v4512_v9 = vrot.slane %v1559_v50, 9  ;;  %v4655_v14 = vcombine.low %v3765_v60, %v3768_v7  ;;  %v1219_v15 = vor.u32 %v1218_v2, %v1215_v61  ;;  %v2062_v61 = vld [vmem:[#allocation2 + $0x5c] sm:$0x1]  ;;  %v4933_v7 = vld [vmem:[#allocation2 + $0xc] sm:$0xff]  }
  0xb6   : > { %v4496_v13 = vcombine.low %v1201_v0, %v1211_v6  ;;  %v1229_v17 = vor.u32 %v1228_v11, %v1224_v1  ;;  %v1234_v18 = vrot.slane %v1232_v8, 5  ;;  %v1684_v20 = vrot.slane %v1560_v54, 5  ;;  %v4928_v11 = vld [vmem:[#allocation2] sm:$0xff]   ;;  %v4934_v8 = vld [vmem:[#allocation2 + $0x18] sm:$0xff]   ;;  %978 = vst.msk [vmem:[#allocation3 + $0x8] sm:$0xff] %vm976_vm14, %v4933_v7 }
  0xb7   : > { %v1687_v21 = vrot.slane %v1561_v62, 5  ;;  %v4513_v32 = vrot.slane %v1562_v43, 9  ;;  %3897 = vrot.lane.b32.xlu0 %v4655_v14, %s5035_s15  ;;  %v1220_v27 = vrot.slane %v1219_v15, 4  ;;  %v1691_v34 = vrot.slane %v1563_v10, 5  ;;  %v2605_v62 = vld [vmem:[#allocation2 + $0x54] sm:$0xe] }
  0xb8   : > { %v5535_v22 = vpop.permute.xlu1 %1802  ;;  %1488 = vrot.lane.b32.xlu1 %v4496_v13, %s5031_s11  ;;  %v1230_v28 = vrot.slane %v1229_v17, 4  ;;  %v1694_v56 = vrot.slane %v1564_v12, 5  ;;  %v1685_v39 = vsel %vm5186_vm9, %v4512_v9, %v1684_v20  ;;  %v1686_v40 = vrot.slane %v1684_v20, 4  ;;  %v4936_v9 = vld [vmem:[#allocation2 + $0x24] sm:$0xff]   ;;  %v2607_v15 = vld [vmem:[#allocation2 + $0x5c] sm:$0x1] }
  0xb9   : > { %v5537_v25 = vpop.permute.xlu0 %3887  ;;  %v532_v41 = vrot.slane %v530_v24, 7  ;;  %v538_v44 = vshrl.u32 %v5477_v58, 16  ;;  %v1225_v46 = vsel %vm5193_vm10, %v1220_v27, %v1224_v1  ;;  %v1692_v49 = vsel %vm5186_vm9, %v4513_v32, %v1691_v34  ;;  %v4943_v32 = vld [vmem:[#allocation2 + $0x30] sm:$0xff]   ;;  %v4944_v27 = vld [vmem:[#allocation2 + $0x3c] sm:$0xff]   ;;  %977 = vst.msk [vmem:[#allocation3] sm:$0xff] %vm976_vm14, %v4928_v11  ;;  %979 = vst.msk [vmem:[#allocation3 + $0x10] sm:$0xff] %vm976_vm14, %v4934_v8 }
  0xba   : > { %v1235_v47 = vsel %vm5193_vm10, %v1230_v28, %v1234_v18  ;;  %v1693_v50 = vrot.slane %v1691_v34, 4  ;;  %v1688_v30 = vsel %vm5186_vm9, %v1686_v40, %v1687_v21  ;;  %v541_v31 = vshll.u32 %v5477_v58, 16  ;;  %v4926_v58 = vld [vmem:[#allocation2 + $0x54] sm:$0xff]   ;;  %980 = vst.msk [vmem:[#allocation3 + $0x18] sm:$0xff] %vm976_vm14, %v4936_v9  ;;  %981 = vst.msk [vmem:[#allocation3 + $0x20] sm:$0xff] %vm976_vm14, %v4943_v32 }
  0xbb   : > { %v4497_v51 = vcombine.low %v1225_v46, %v1235_v47  ;;  %v535_v24 = vor.u32 %v533_v33, %v532_v41  ;;  %v536_v52 = vrot.slane %v532_v41, 4  ;;  %v4528_v54 = vcombine.low %v1685_v39, %v1688_v30  ;;  %v2606_v33 = vld [vmem:[#allocation2 + $0x58] sm:$0xf]  ;;  %982 = vst.msk [vmem:[#allocation3 + $0x28] sm:$0xff] %vm976_vm14, %v4944_v27 }
  0xbc   : > { %v1695_v57 = vsel %vm5186_vm9, %v1693_v50, %v1694_v56  ;;  %v540_v60 = vrot.slane %v538_v44, 7  ;;  %v2235_v1 = vshrl.u32 %v2060_v38, 16  ;;  %v2238_v16 = vshll.u32 %v2060_v38, 16  ;;  %v5562_v43 = vpop.permute.xlu1 %2845  ;;  %1525 = vst.msk [vmem:[#allocation3] sm:$0xff] %vm1524_vm15, %v5490_v19 }
  0xbd   : > { %1490 = vrot.lane.b32.xlu1 %v4497_v51, %s5031_s11  ;;  %v4529_v0 = vcombine.low %v1692_v49, %v1695_v57  ;;  %v786_v2 = vsel %vm5207_vm12, %v535_v24, %v785_v35  ;;  %v5564_v6 = vpop.permute.xlu0 %3889  ;;  %1812 = vrot.lane.b32.xlu0 %v4528_v54, %s5030_s10  ;;  %v2244_v13 = vshll.u32 %v2061_v45, 16  ;;  %v2248_v14 = vshrl.u32 %v2061_v45, 16  ;;  %1849 = vst.msk [vmem:[#allocation3] sm:$0xff] %vm1848_vm1, %v5498_v3 }
  0xbe   : > { %v543_v10 = vor.u32 %v541_v31, %v540_v60  ;;  %v545_v12 = vrot.slane %v540_v60, 4  ;;  %787 = vst [vmem:[#allocation2 + $0x60] sm:$0xf] %v786_v2  ;;  %v2237_v17 = vrot.slane %v2235_v1, 4  ;;  %v2240_v18 = vrot.slane %v2238_v16, 5  ;;  %2026 = vst.msk [vmem:[#allocation3] sm:$0xff] %vm2025_vm2, %v5500_v59 }
  0xbf   : > { %v2254_v20 = vshll.u32 %v2062_v61, 16  ;;  %v4576_v21 = vrot.slane %v2605_v62, 9  ;;  %v2246_v34 = vrot.slane %v2244_v13, 5  ;;  %v2250_v56 = vrot.slane %v2248_v14, 4 }
  0xc0   : > { %v544_v28 = vsel %vm5201_vm11, %v536_v52, %v543_v10  ;;  %v790_v35 = vsel %vm5215_vm13, %v545_v12, %v789_v53  ;;  %v2241_v38 = vor.u32 %v2240_v18, %v2237_v17  ;;  %v2727_v40 = vrot.slane %v2606_v33, 5  ;;  %v5576_v49 = vpop.permute.xlu1 %2524  ;;  %v297_v52 = vld [vmem:[%s5179_s9 + $0x90] sm:$0xff]  ;;  %v298_v33 = vld [vmem:[%s5179_s9 + $0x98] sm:$0xff]  ;;  %v792_v12 = vld [vmem:[#allocation2 + $0x6c] sm:$0xf] }
  0xc1   : > { %1814 = vrot.lane.b32.xlu1 %v4529_v0, %s5030_s10  ;;  %788 = vst.msk [vmem:[#allocation2 + $0x64] sm:$0xf] %vm223_vm0, %v544_v28  ;;  %v2256_v39 = vrot.slane %v2254_v20, 5  ;;  %791 = vst [vmem:[#allocation2 + $0x68] sm:$0x1] %v790_v35  ;;  %v2730_v41 = vrot.slane %v2607_v15, 5  ;;  %1989 = vrot.lane.b32.xlu0 %v4926_v58, %s5032_s12  ;;  %v2251_v44 = vor.u32 %v2250_v56, %v2246_v34 }
  0xc2   : > { %v2242_v45 = vrot.slane %v2241_v38, 4  ;;  %v2729_v46 = vrot.slane %v2727_v40, 4  ;;  %v547_v47 = vshrl.u32 %v5480_v4, 16  ;;  %v2728_v30 = vsel %vm5186_vm9, %v4576_v21, %v2727_v40 }
  0xc3   : > { %v1479_v50 = vpop.permute.xlu0 %1478  ;;  %v2252_v51 = vrot.slane %v2251_v44, 4  ;;  %v555_v24 = vshrl.u32 %v5482_v5, 16  ;;  %v550_v60 = vshll.u32 %v5480_v4, 16  ;;  %v558_v19 = vshll.u32 %v5482_v5, 16 }
  0xc4   : > { %1526 = vst.msk [vmem:[#allocation3 + $0x8] sm:$0xff] %vm1524_vm15, %v1479_v50  ;;  %v2247_v53 = vsel %vm5193_vm10, %v2242_v45, %v2246_v34  ;;  %v2731_v57 = vsel %vm5186_vm9, %v2729_v46, %v2730_v41  ;;  %v549_v1 = vrot.slane %v547_v47, 7  ;;  %v5605_v8 = vpack.c.bf16 %v297_v52, %v297_v52  ;;  %v796_v41 = vld [vmem:[#allocation2 + $0x74] sm:$0x1] }
  0xc5   : > { %v2063_v54 = vld [vmem:[#allocation2 + $0x60] sm:$0xf]  ;;  %1850 = vst.msk [vmem:[#allocation3 + $0x8] sm:$0xff] %vm1848_vm1, %v5535_v22  ;;  %v2257_v31 = vsel %vm5193_vm10, %v2252_v51, %v2256_v39  ;;  %v5602_v16 = vrot.slane %v555_v24, 7  ;;  %v4592_v4 = vcombine.low %v2728_v30, %v2731_v57  ;;  %v5614_v44 = vpack.c.bf16 %v298_v33, %v298_v33 }
  0xc6   : > { %v2259_v61 = vshrl.u32 %v2063_v54, 16  ;;  %v2262_v62 = vshll.u32 %v2063_v54, 16  ;;  %v2608_v0 = vld [vmem:[#allocation2 + $0x60] sm:$0xe]  ;;  %v4560_v2 = vcombine.low %v2247_v53, %v2257_v31  ;;  %v552_v20 = vor.u32 %v550_v60, %v549_v1  ;;  %2027 = vst.msk [vmem:[#allocation3 + $0x8] sm:$0xff] %vm2025_vm2, %v5512_v26 }
  0xc7   : > { %v4577_v10 = vrot.slane %v2608_v0, 9  ;;  %v3104_v13 = vld [vmem:[#allocation2 + $0x60] sm:$0xf]  ;;  %v5608_v14 = vpop.permute.xlu1 %3568  ;;  %v553_v21 = vrot.slane %v549_v1, 4  ;;  %v560_v32 = vor.u32 %v558_v19, %v5602_v16  ;;  %v562_v51 = vrot.slane %v5602_v16, 4 }
  0xc8   : > { %v4927_v11 = vld [vmem:[#allocation2 + $0x60] sm:$0xff]   ;;  %v2261_v7 = vrot.slane %v2259_v61, 4  ;;  %2534 = vrot.lane.b32.xlu0 %v4560_v2, %s5036_s16  ;;  %v2065_v5 = vld [vmem:[#allocation2 + $0x68] sm:$0x1]  ;;  %v2264_v22 = vrot.slane %v2262_v62, 5  ;;  %v793_v24 = vsel %vm5207_vm12, %v552_v20, %v792_v12  ;;  %v3279_v53 = vshrl.u32 %v3104_v13, 16 }
  0xc9   : > { %v2064_v3 = vld [vmem:[#allocation2 + $0x64] sm:$0xf]  ;;  %1991 = vrot.lane.b32.xlu1 %v4927_v11, %s5032_s12  ;;  %v2278_v15 = vshll.u32 %v2065_v5, 16  ;;  %v2610_v18 = vld [vmem:[#allocation2 + $0x68] sm:$0x1]  ;;  %v561_v39 = vsel %vm5201_vm11, %v553_v21, %v560_v32  ;;  %v3282_v54 = vshll.u32 %v3104_v13, 16 }
  0xca   : > { %v2268_v9 = vshll.u32 %v2064_v3, 16  ;;  %v2272_v58 = vshrl.u32 %v2064_v3, 16  ;;  %v2609_v17 = vld [vmem:[#allocation2 + $0x64] sm:$0xf]  ;;  %v2265_v27 = vor.u32 %v2264_v22, %v2261_v7  ;;  %v2737_v38 = vrot.slane %v2610_v18, 5  ;;  %v300_v18 = vld [vmem:[%s5179_s9 + $0xa8] sm:$0xff] }
  0xcb   : > { %v2734_v56 = vrot.slane %v2609_v17, 5  ;;  %v2280_v35 = vrot.slane %v2278_v15, 5  ;;  %v3105_v40 = vld [vmem:[#allocation2 + $0x64] sm:$0xf]  ;;  %795 = vst.msk [vmem:[#allocation2 + $0x70] sm:$0xf] %vm223_vm0, %v561_v39  ;;  %v5629_v0 = vpop.permute.xlu0 %2522 }
  0xcc   : > { %v2270_v28 = vrot.slane %v2268_v9, 5  ;;  %v2274_v34 = vrot.slane %v2272_v58, 4  ;;  %v2266_v45 = vrot.slane %v2265_v27, 4  ;;  %2855 = vrot.lane.b32.xlu0 %v4592_v4, %s5034_s14  ;;  %v4929_v50 = vld [vmem:[#allocation2 + $0x60] sm:$0xff]   ;;  %v3106_v52 = vld [vmem:[#allocation2 + $0x68] sm:$0x1]  ;;  %v797_v4 = vsel %vm5215_vm13, %v562_v51, %v796_v41 }
  0xcd   : > { %v2736_v47 = vrot.slane %v2734_v56, 4  ;;  %v3649_v30 = vld [vmem:[#allocation2 + $0x60] sm:$0xe]  ;;  %v2735_v19 = vsel %vm5186_vm9, %v4577_v10, %v2734_v56  ;;  %794 = vst [vmem:[#allocation2 + $0x6c] sm:$0xf] %v793_v24  ;;  %v3288_v31 = vshll.u32 %v3105_v40, 16 }
  0xce   : > { %v2275_v46 = vor.u32 %v2274_v34, %v2270_v28  ;;  %v2271_v57 = vsel %vm5193_vm10, %v2266_v45, %v2270_v28  ;;  %v3650_v61 = vld [vmem:[#allocation2 + $0x64] sm:$0xf]  ;;  %v3651_v62 = vld [vmem:[#allocation2 + $0x68] sm:$0x1]  ;;  %v3281_v16 = vrot.slane %v3279_v53, 4  ;;  %v3284_v33 = vrot.slane %v3282_v54, 5 }
  0xcf   : > { %v1481_v2 = vpop.permute.xlu1 %1480  ;;  %v2738_v1 = vsel %vm5186_vm9, %v2736_v47, %v2737_v38  ;;  %v3292_v11 = vshrl.u32 %v3105_v40, 16  ;;  %v1017_v3 = vld [vmem:[#allocation2 + $0x60] sm:$0xf]  ;;  %v3290_v26 = vrot.slane %v3288_v31, 5  ;;  %v3298_v7 = vshll.u32 %v3106_v52, 16 }
  0xd0   : > { %v2276_v60 = vrot.slane %v2275_v46, 4  ;;  %1527 = vst.msk [vmem:[#allocation3 + $0x10] sm:$0xff] %vm1524_vm15, %v1481_v2  ;;  %3033 = vrot.lane.b32.xlu0 %v4929_v50, %s5033_s13  ;;  %v3285_v22 = vor.u32 %v3284_v33, %v3281_v16  ;;  %798 = vst [vmem:[#allocation2 + $0x74] sm:$0x1] %v797_v4  ;;  %v4640_v58 = vrot.slane %v3649_v30, 9  ;;  %v299_v10 = vld [vmem:[%s5179_s9 + $0xa0] sm:$0xff]  ;;  %v4593_v20 = vcombine.low %v2735_v19, %v2738_v1 }
  0xd1   : > { %v3294_v9 = vrot.slane %v3292_v11, 4  ;;  %v3300_v12 = vrot.slane %v3298_v7, 5  ;;  %v3771_v13 = vrot.slane %v3650_v61, 5  ;;  %v3774_v15 = vrot.slane %v3651_v62, 5  ;;  %v1018_v52 = vld [vmem:[#allocation2 + $0x64] sm:$0xf] }
  0xd2   : > { %v2281_v59 = vsel %vm5193_vm10, %v2276_v60, %v2280_v35  ;;  %v1237_v17 = vshrl.u32 %v1017_v3, 16  ;;  %v3286_v21 = vrot.slane %v3285_v22, 4  ;;  %v3108_v27 = vld [vmem:[#allocation2 + $0x70] sm:$0xf]  ;;  %v1240_v28 = vshll.u32 %v1017_v3, 16 }
  0xd3   : > { %v4561_v5 = vcombine.low %v2271_v57, %v2281_v59  ;;  %v3295_v32 = vor.u32 %v3294_v9, %v3290_v26  ;;  %v3312_v34 = vshll.u32 %v3108_v27, 16  ;;  %v3316_v56 = vshrl.u32 %v3108_v27, 16  ;;  %v1019_v60 = vld [vmem:[#allocation2 + $0x68] sm:$0x1] }
  0xd4   : > { %v3773_v35 = vrot.slane %v3771_v13, 4  ;;  %v5644_v39 = vpack.c.bf16 %v299_v10, %v299_v10  ;;  %v3291_v40 = vsel %vm5193_vm10, %v3286_v21, %v3290_v26  ;;  %v3107_v45 = vld [vmem:[#allocation2 + $0x6c] sm:$0xf]  ;;  %v3772_v46 = vsel %vm5186_vm9, %v4640_v58, %v3771_v13  ;;  %v1021_v21 = vld [vmem:[#allocation2 + $0x70] sm:$0xf] }
  0xd5   : > { %2536 = vrot.lane.b32.xlu1 %v4561_v5, %s5036_s16  ;;  %v5642_v38 = vpop.permute.xlu0 %3566  ;;  %v3296_v41 = vrot.slane %v3295_v32, 4  ;;  %v5650_v47 = vpack.c.bf16 %v300_v18, %v300_v18  ;;  %v3303_v50 = vshrl.u32 %v3107_v45, 16  ;;  %v3306_v51 = vshll.u32 %v3107_v45, 16  ;;  %v4930_v53 = vld [vmem:[#allocation2 + $0x6c] sm:$0xff]  }
  0xd6   : > { %v3314_v30 = vrot.slane %v3312_v34, 5  ;;  %v3318_v24 = vrot.slane %v3316_v56, 4  ;;  %v3775_v57 = vsel %vm5186_vm9, %v3773_v35, %v3774_v15  ;;  %v1239_v19 = vrot.slane %v1237_v17, 4  ;;  %v3652_v33 = vld [vmem:[#allocation2 + $0x6c] sm:$0xe] }
  0xd7   : > { %v3301_v54 = vsel %vm5193_vm10, %v3296_v41, %v3300_v12  ;;  %v1242_v31 = vrot.slane %v1240_v28, 5  ;;  %v3109_v62 = vld [vmem:[#allocation2 + $0x74] sm:$0x1]  ;;  %v3305_v2 = vrot.slane %v3303_v50, 4  ;;  %v3308_v1 = vrot.slane %v3306_v51, 5 }
  0xd8   : > { %v4624_v61 = vcombine.low %v3291_v40, %v3301_v54  ;;  %v3319_v16 = vor.u32 %v3318_v24, %v3314_v30  ;;  %v3322_v59 = vshll.u32 %v3109_v62, 16  ;;  %v4656_v26 = vcombine.low %v3772_v46, %v3775_v57  ;;  %v3653_v5 = vld [vmem:[#allocation2 + $0x70] sm:$0xf]  ;;  %v1020_v22 = vld [vmem:[#allocation2 + $0x6c] sm:$0xf] }
  0xd9   : > { %2857 = vrot.lane.b32.xlu1 %v4593_v20, %s5034_s14  ;;  %v1483_v11 = vpop.permute.xlu1 %1482  ;;  %v1805_v3 = vpop.permute.xlu0 %1804  ;;  %v1243_v7 = vor.u32 %v1242_v31, %v1239_v19  ;;  %v1246_v4 = vshll.u32 %v1018_v52, 16  ;;  %v3309_v9 = vor.u32 %v3308_v1, %v3305_v2  ;;  %v1250_v10 = vshrl.u32 %v1018_v52, 16  ;;  %v3654_v13 = vld [vmem:[#allocation2 + $0x74] sm:$0x1]  ;;  %v1565_v54 = vld [vmem:[#allocation2 + $0x60] sm:$0xe] }
  0xda   : > { %1528 = vst.msk [vmem:[#allocation3 + $0x18] sm:$0xff] %vm1524_vm15, %v1483_v11  ;;  %3578 = vrot.lane.b32.xlu0 %v4624_v61, %s5037_s17  ;;  %v3320_v58 = vrot.slane %v3319_v16, 4  ;;  %v1256_v12 = vshll.u32 %v1019_v60, 16  ;;  %v3324_v15 = vrot.slane %v3322_v59, 5  ;;  %v4641_v20 = vrot.slane %v3652_v33, 9  ;;  %v4949_v60 = vld [vmem:[#allocation2 + $0x48] sm:$0xff]  }
  0xdb   : > { %1851 = vst.msk [vmem:[#allocation3 + $0x10] sm:$0xff] %vm1848_vm1, %v1805_v3  ;;  %v1244_v17 = vrot.slane %v1243_v7, 4  ;;  %v1248_v18 = vrot.slane %v1246_v4, 5  ;;  %v3310_v32 = vrot.slane %v3309_v9, 4  ;;  %v1252_v27 = vrot.slane %v1250_v10, 4  ;;  %v4950_v59 = vld [vmem:[#allocation2 + $0x54] sm:$0xff]  }
  0xdc   : > { %v1258_v28 = vrot.slane %v1256_v12, 5  ;;  %v3778_v34 = vrot.slane %v3653_v5, 5  ;;  %v3325_v40 = vsel %vm5193_vm10, %v3320_v58, %v3324_v15  ;;  %v3781_v45 = vrot.slane %v3654_v13, 5  ;;  %v1022_v46 = vld [vmem:[#allocation2 + $0x74] sm:$0x1]  ;;  %983 = vst.msk [vmem:[#allocation3 + $0x30] sm:$0xff] %vm976_vm14, %v4949_v60 }
  0xdd   : > { %3035 = vrot.lane.b32.xlu1 %v4930_v53, %s5033_s13  ;;  %v1807_v56 = vpop.permute.xlu1 %1806  ;;  %v1982_v35 = vpop.permute.xlu0 %1981  ;;  %v1249_v41 = vsel %vm5193_vm10, %v1244_v17, %v1248_v18  ;;  %v1261_v50 = vshrl.u32 %v1020_v22, 16  ;;  %v3315_v51 = vsel %vm5193_vm10, %v3310_v32, %v3314_v30  ;;  %v1253_v24 = vor.u32 %v1252_v27, %v1248_v18  ;;  %v1566_v57 = vld [vmem:[#allocation2 + $0x64] sm:$0xf]  ;;  %v1567_v2 = vld [vmem:[#allocation2 + $0x68] sm:$0x1]  ;;  %984 = vst.msk [vmem:[#allocation3 + $0x38] sm:$0xff] %vm976_vm14, %v4950_v59 }
  0xde   : > { %1852 = vst.msk [vmem:[#allocation3 + $0x18] sm:$0xff] %vm1848_vm1, %v1807_v56  ;;  %3899 = vrot.lane.b32.xlu0 %v4656_v26, %s5035_s15  ;;  %v3779_v52 = vsel %vm5186_vm9, %v4641_v20, %v3778_v34  ;;  %v3780_v53 = vrot.slane %v3778_v34, 4  ;;  %v4625_v19 = vcombine.low %v3315_v51, %v3325_v40  ;;  %v1264_v61 = vshll.u32 %v1020_v22, 16  ;;  %v1568_v11 = vld [vmem:[#allocation2 + $0x6c] sm:$0xe] }
  0xdf   : > { %2028 = vst.msk [vmem:[#allocation3 + $0x10] sm:$0xff] %vm2025_vm2, %v1982_v35  ;;  %v1263_v31 = vrot.slane %v1261_v50, 4  ;;  %v1270_v62 = vshll.u32 %v1021_v21, 16  ;;  %v1254_v1 = vrot.slane %v1253_v24, 4  ;;  %v1274_v30 = vshrl.u32 %v1021_v21, 16 }
  0xe0   : > { %v3782_v16 = vsel %vm5186_vm9, %v3780_v53, %v3781_v45  ;;  %v1280_v33 = vshll.u32 %v1022_v46, 16  ;;  %v1266_v7 = vrot.slane %v1264_v61, 5  ;;  %v4514_v5 = vrot.slane %v1565_v54, 9  ;;  %v1569_v22 = vld [vmem:[#allocation2 + $0x70] sm:$0xf] }
  0xe1   : > { %v2527_v3 = vpop.permute.xlu0 %2526  ;;  %3580 = vrot.lane.b32.xlu1 %v4625_v19, %s5037_s17  ;;  %v4657_v26 = vcombine.low %v3779_v52, %v3782_v16  ;;  %v1272_v4 = vrot.slane %v1270_v62, 5  ;;  %v1259_v58 = vsel %vm5193_vm10, %v1254_v1, %v1258_v28  ;;  %v1276_v10 = vrot.slane %v1274_v30, 4  ;;  %v1570_v15 = vld [vmem:[#allocation2 + $0x74] sm:$0x1]  ;;  %v2066_v61 = vld [vmem:[#allocation2 + $0x6c] sm:$0xf] }
  0xe2   : > { %v1984_v9 = vpop.permute.xlu1 %1983  ;;  %v1282_v12 = vrot.slane %v1280_v33, 5  ;;  %v1698_v13 = vrot.slane %v1566_v57, 5  ;;  %v4498_v17 = vcombine.low %v1249_v41, %v1259_v58  ;;  %v1267_v18 = vor.u32 %v1266_v7, %v1263_v31  ;;  %v799_v31 = vld [vmem:[#allocation2 + $0x78] sm:$0xf]  ;;  %v4931_v1 = vld [vmem:[#allocation2 + $0x6c] sm:$0xff]  }
  0xe3   : > { %2029 = vst.msk [vmem:[#allocation3 + $0x18] sm:$0xff] %vm2025_vm2, %v1984_v9  ;;  %3901 = vrot.lane.b32.xlu0 %v4657_v26, %s5035_s15  ;;  %v1701_v20 = vrot.slane %v1567_v2, 5  ;;  %v4515_v21 = vrot.slane %v1568_v11, 9  ;;  %v1277_v32 = vor.u32 %v1276_v10, %v1272_v4  ;;  %v1705_v28 = vrot.slane %v1569_v22, 5  ;;  %v2067_v33 = vld [vmem:[#allocation2 + $0x70] sm:$0xf] }
  0xe4   : > { %v1699_v27 = vsel %vm5186_vm9, %v4514_v5, %v1698_v13  ;;  %v1700_v34 = vrot.slane %v1698_v13, 4  ;;  %v1268_v35 = vrot.slane %v1267_v18, 4  ;;  %v1708_v40 = vrot.slane %v1570_v15, 5  ;;  %v2068_v11 = vld [vmem:[#allocation2 + $0x74] sm:$0x1] }
  0xe5   : > { %v2848_v56 = vpop.permute.xlu0 %2847  ;;  %1492 = vrot.lane.b32.xlu1 %v4498_v17, %s5031_s11  ;;  %v564_v45 = vshrl.u32 %v5605_v8, 16  ;;  %v567_v41 = vshll.u32 %v5605_v8, 16  ;;  %v1278_v46 = vrot.slane %v1277_v32, 4  ;;  %v1706_v51 = vsel %vm5186_vm9, %v4515_v21, %v1705_v28  ;;  %v803_v59 = vld [vmem:[#allocation2 + $0x80] sm:$0x1] }
  0xe6   : > { %v1702_v50 = vsel %vm5186_vm9, %v1700_v34, %v1701_v20  ;;  %v1707_v24 = vrot.slane %v1705_v28, 4  ;;  %v1273_v52 = vsel %vm5193_vm10, %v1268_v35, %v1272_v4  ;;  %v572_v57 = vshrl.u32 %v5614_v44, 16  ;;  %v2611_v7 = vld [vmem:[#allocation2 + $0x6c] sm:$0xe] }
  0xe7   : > { %v4530_v53 = vcombine.low %v1699_v27, %v1702_v50  ;;  %v566_v54 = vrot.slane %v564_v45, 7  ;;  %v1283_v60 = vsel %vm5193_vm10, %v1278_v46, %v1282_v12  ;;  %v575_v19 = vshll.u32 %v5614_v44, 16 }
  0xe8   : > { %v1709_v8 = vsel %vm5186_vm9, %v1707_v24, %v1708_v40  ;;  %vm2570_vm3 = vcmask 162944   ;;  %v4499_v62 = vcombine.low %v1273_v52, %v1283_v60  ;;  %v574_v26 = vrot.slane %v572_v57, 7 }
  0xe9   : > { %1816 = vrot.lane.b32.xlu0 %v4530_v53, %s5030_s10  ;;  %v4531_v2 = vcombine.low %v1706_v51, %v1709_v8  ;;  %v569_v16 = vor.u32 %v567_v41, %v566_v54  ;;  %v570_v30 = vrot.slane %v566_v54, 4  ;;  %2572 = vst.msk [vmem:[#allocation3 + $0x8] sm:$0xff] %vm2570_vm3, %v5576_v49  ;;  %2571 = vst.msk [vmem:[#allocation3] sm:$0xff] %vm2570_vm3, %v5629_v0  ;;  %v3026_v44 = vpop.permute.xlu0 %3025  ;;  %vm2891_vm4 = vcmask 195744   ;;  %v2612_v0 = vld [vmem:[#allocation2 + $0x70] sm:$0xf] }
  0xea   : > { %2573 = vst.msk [vmem:[#allocation3 + $0x10] sm:$0xff] %vm2570_vm3, %v2527_v3  ;;  %vm3069_vm5 = vcmask 228544   ;;  %vm3614_vm6 = vcmask 261344   ;;  %1494 = vrot.lane.b32.xlu1 %v4499_v62, %s5031_s11  ;;  %vm3935_vm7 = vcmask 294144   ;;  %v2283_v49 = vshrl.u32 %v2066_v61, 16  ;;  %v301_v51 = vld [vmem:[%s5179_s9 + $0xb0] sm:$0xff] }
  0xeb   : > { %v800_v4 = vsel %vm5207_vm12, %v569_v16, %v799_v31  ;;  %2893 = vst.msk [vmem:[#allocation3 + $0x8] sm:$0xff] %vm2891_vm4, %v5562_v43  ;;  %v2286_v5 = vshll.u32 %v2066_v61, 16  ;;  %2892 = vst.msk [vmem:[#allocation3] sm:$0xff] %vm2891_vm4, %v5526_v63  ;;  %v577_v22 = vor.u32 %v575_v19, %v574_v26  ;;  %v579_v9 = vrot.slane %v574_v26, 4  ;;  %v2613_v43 = vld [vmem:[#allocation2 + $0x74] sm:$0x1] }
  0xec   : > { %2894 = vst.msk [vmem:[#allocation3 + $0x10] sm:$0xff] %vm2891_vm4, %v2848_v56  ;;  %801 = vst [vmem:[#allocation2 + $0x78] sm:$0xf] %v800_v4  ;;  %v2292_v58 = vshll.u32 %v2067_v33, 16  ;;  %v2296_v10 = vshrl.u32 %v2067_v33, 16  ;;  %v2285_v63 = vrot.slane %v2283_v49, 4 }
  0xed   : > { %3071 = vst.msk [vmem:[#allocation3 + $0x8] sm:$0xff] %vm3069_vm5, %v5522_v55  ;;  %3070 = vst.msk [vmem:[#allocation3] sm:$0xff] %vm3069_vm5, %v5518_v37  ;;  %1993 = vrot.lane.b32.xlu0 %v4931_v1, %s5032_s12  ;;  %v2288_v12 = vrot.slane %v2286_v5, 5  ;;  %v2302_v13 = vshll.u32 %v2068_v11, 16  ;;  %v578_v55 = vsel %vm5201_vm11, %v570_v30, %v577_v22  ;;  %v804_v17 = vsel %vm5215_vm13, %v579_v9, %v803_v59  ;;  %v806_v19 = vld [vmem:[#allocation2 + $0x84] sm:$0xf] }
  0xee   : > { %v2529_v3 = vpop.permute.xlu1 %2528  ;;  %3072 = vst.msk [vmem:[#allocation3 + $0x10] sm:$0xff] %vm3069_vm5, %v3026_v44  ;;  %v2294_v37 = vrot.slane %v2292_v58, 5  ;;  %v2298_v15 = vrot.slane %v2296_v10, 4  ;;  %1818 = vrot.lane.b32.xlu1 %v4531_v2, %s5030_s10  ;;  %805 = vst [vmem:[#allocation2 + $0x80] sm:$0x1] %v804_v17  ;;  %v2741_v18 = vrot.slane %v2612_v0, 5 }
  0xef   : > { %2574 = vst.msk [vmem:[#allocation3 + $0x18] sm:$0xff] %vm2570_vm3, %v2529_v3  ;;  %v2744_v20 = vrot.slane %v2613_v43, 5  ;;  %v2304_v27 = vrot.slane %v2302_v13, 5  ;;  %v589_v34 = vshrl.u32 %v5650_v47, 16  ;;  %v584_v35 = vshll.u32 %v5644_v39, 16  ;;  %v302_v16 = vld [vmem:[%s5179_s9 + $0xb8] sm:$0xff] }
  0xf0   : > { %3616 = vst.msk [vmem:[#allocation3 + $0x8] sm:$0xff] %vm3614_vm6, %v5608_v14  ;;  %3615 = vst.msk [vmem:[#allocation3] sm:$0xff] %vm3614_vm6, %v5642_v38  ;;  %v2289_v14 = vor.u32 %v2288_v12, %v2285_v63  ;;  %v4578_v38 = vrot.slane %v2611_v7, 9  ;;  %v2299_v32 = vor.u32 %v2298_v15, %v2294_v37  ;;  %v2743_v56 = vrot.slane %v2741_v18, 4  ;;  %v810_v1 = vld [vmem:[#allocation2 + $0x8c] sm:$0x1] }
  0xf1   : > { %3937 = vst.msk [vmem:[#allocation3 + $0x8] sm:$0xff] %vm3935_vm7, %v5564_v6  ;;  %3936 = vst.msk [vmem:[#allocation3] sm:$0xff] %vm3935_vm7, %v5537_v25  ;;  %v5736_v6 = vld [vmem:[%s6365_s1 + $0x10] ss:$0 sps:$4 sm:$0x33]   ;;  %v581_v25 = vshrl.u32 %v5644_v39, 16  ;;  %v5759_v7 = vpack.c.bf16 %v301_v51, %v301_v51  ;;  %v5769_v13 = vpack.c.bf16 %v302_v16, %v302_v16 }
  0xf2   : > { %802 = vst.msk [vmem:[#allocation2 + $0x7c] sm:$0xf] %vm223_vm0, %v578_v55  ;;  %v2850_v21 = vpop.permute.xlu1 %2849  ;;  %v2290_v28 = vrot.slane %v2289_v14, 4  ;;  %v592_v40 = vshll.u32 %v5650_v47, 16  ;;  %v3571_v45 = vpop.permute.xlu0 %3570  ;;  %v2300_v41 = vrot.slane %v2299_v32, 4  ;;  %v591_v50 = vrot.slane %v589_v34, 7 }
  0xf3   : > { %2895 = vst.msk [vmem:[#allocation3 + $0x18] sm:$0xff] %vm2891_vm4, %v2850_v21  ;;  %v583_v46 = vrot.slane %v581_v25, 7  ;;  %vm4044_vm8 = vcmask 1041408   ;;  %v2069_v52 = vld [vmem:[#allocation2 + $0x78] sm:$0xf]  ;;  %v2742_v53 = vsel %vm5186_vm9, %v4578_v38, %v2741_v18  ;;  %v2745_v39 = vsel %vm5186_vm9, %v2743_v56, %v2744_v20  ;;  %v303_v9 = vld [vmem:[%s5179_s9 + $0xc0] sm:$0xff] }
  0xf4   : > { %3617 = vst.msk [vmem:[#allocation3 + $0x10] sm:$0xff] %vm3614_vm6, %v3571_v45  ;;  %v2295_v24 = vsel %vm5193_vm10, %v2290_v28, %v2294_v37  ;;  %v2614_v47 = vld [vmem:[#allocation2 + $0x78] sm:$0xe]  ;;  %4861 = vmatprep.subr.msk.bf16.mxu0 %vm4044_vm8, %v5736_v6  ;;  %v2305_v57 = vsel %vm5193_vm10, %v2300_v41, %v2304_v27  ;;  %v2307_v60 = vshrl.u32 %v2069_v52, 16  ;;  %v2310_v8 = vshll.u32 %v2069_v52, 16  ;;  %4862 = vmatprep.subr.msk.bf16.mxu1 %vm4044_vm8, %v5736_v6  ;;  %v304_v45 = vld [vmem:[%s5179_s9 + $0xc8] sm:$0xff] }
  0xf5   : > { %v4562_v31 = vcombine.low %v2295_v24, %v2305_v57  ;;  %v4579_v61 = vrot.slane %v2614_v47, 9  ;;  %v586_v62 = vor.u32 %v584_v35, %v583_v46  ;;  %v587_v2 = vrot.slane %v583_v46, 4  ;;  %v2071_v4 = vld [vmem:[#allocation2 + $0x80] sm:$0x1]  ;;  %v3110_v22 = vld [vmem:[#allocation2 + $0x78] sm:$0xf] }
  0xf6   : > { %v3028_v54 = vpop.permute.xlu1 %3027  ;;  %v3892_v30 = vpop.permute.xlu0 %3891  ;;  %v2309_v59 = vrot.slane %v2307_v60, 4  ;;  %v4594_v44 = vcombine.low %v2742_v53, %v2745_v39  ;;  %v594_v26 = vor.u32 %v592_v40, %v591_v50  ;;  %v2312_v49 = vrot.slane %v2310_v8, 5  ;;  %v2616_v43 = vld [vmem:[#allocation2 + $0x80] sm:$0x1]  ;;  %v305_v24 = vld [vmem:[%s5179_s9 + $0xd0] sm:$0xff] }
  0xf7   : > { %3073 = vst.msk [vmem:[#allocation3 + $0x18] sm:$0xff] %vm3069_vm5, %v3028_v54  ;;  %2538 = vrot.lane.b32.xlu0 %v4562_v31, %s5036_s16  ;;  %v807_v3 = vsel %vm5207_vm12, %v586_v62, %v806_v19  ;;  %v2326_v58 = vshll.u32 %v2071_v4, 16  ;;  %v596_v12 = vrot.slane %v591_v50, 4  ;;  %v2751_v38 = vrot.slane %v2616_v43, 5  ;;  %v3112_v20 = vld [vmem:[#allocation2 + $0x80] sm:$0x1] }
  0xf8   : > { %3938 = vst.msk [vmem:[#allocation3 + $0x10] sm:$0xff] %vm3935_vm7, %v3892_v30  ;;  %v595_v63 = vsel %vm5201_vm11, %v587_v2, %v594_v26  ;;  %808 = vst [vmem:[#allocation2 + $0x84] sm:$0xf] %v807_v3  ;;  %v2313_v55 = vor.u32 %v2312_v49, %v2309_v59  ;;  %v5774_v25 = vpack.c.bf16 %v303_v9, %v303_v9  ;;  %v3327_v41 = vshrl.u32 %v3110_v22, 16  ;;  %v3655_v8 = vld [vmem:[#allocation2 + $0x78] sm:$0xe] }
  0xf9   : > { %v4932_v33 = vld [vmem:[#allocation2 + $0x78] sm:$0xff]   ;;  %809 = vst.msk [vmem:[#allocation2 + $0x88] sm:$0xf] %vm223_vm0, %v595_v63  ;;  %v2328_v14 = vrot.slane %v2326_v58, 5  ;;  %v811_v21 = vsel %vm5215_vm13, %v596_v12, %v810_v1  ;;  %v3330_v46 = vshll.u32 %v3110_v22, 16  ;;  %v3346_v47 = vshll.u32 %v3112_v20, 16 }
  0xfa   : > { %v2070_v11 = vld [vmem:[#allocation2 + $0x7c] sm:$0xf]  ;;  %1995 = vrot.lane.b32.xlu1 %v4932_v33, %s5032_s12  ;;  %v3573_v32 = vpop.permute.xlu1 %3572  ;;  %v2314_v34 = vrot.slane %v2313_v55, 4  ;;  %812 = vst [vmem:[#allocation2 + $0x8c] sm:$0x1] %v811_v21  ;;  %v3329_v54 = vrot.slane %v3327_v41, 4  ;;  %v5789_v31 = vpack.c.bf16 %v304_v45, %v304_v45  ;;  %v5796_v30 = vpack.c.bf16 %v305_v24, %v305_v24 }
  0xfb   : > { %v2316_v5 = vshll.u32 %v2070_v11, 16  ;;  %v2320_v0 = vshrl.u32 %v2070_v11, 16  ;;  %v2615_v10 = vld [vmem:[#allocation2 + $0x7c] sm:$0xf]  ;;  %v3894_v27 = vpop.permute.xlu0 %3893  ;;  %2859 = vrot.lane.b32.xlu0 %v4594_v44, %s5034_s14  ;;  %3618 = vst.msk [vmem:[#allocation3 + $0x18] sm:$0xff] %vm3614_vm6, %v3573_v32  ;;  %v3332_v57 = vrot.slane %v3330_v46, 5 }
  0xfc   : > { %v2748_v17 = vrot.slane %v2615_v10, 5  ;;  %v3111_v18 = vld [vmem:[#allocation2 + $0x7c] sm:$0xf]  ;;  %3939 = vst.msk [vmem:[#allocation3 + $0x18] sm:$0xff] %vm3935_vm7, %v3894_v27  ;;  %v3348_v59 = vrot.slane %v3346_v47, 5  ;;  %v4046_v43 = vsel %vm4044_vm8, %v5736_v6, 0 }
  0xfd   : > { %v2318_v37 = vrot.slane %v2316_v5, 5  ;;  %v2322_v15 = vrot.slane %v2320_v0, 4  ;;  %v4937_v40 = vld [vmem:[#allocation2 + $0x78] sm:$0xff]   ;;  %v3336_v50 = vshll.u32 %v3111_v18, 16  ;;  %v3340_v51 = vshrl.u32 %v3111_v18, 16  ;;  %4763 = vmatpush3.bf16.msra.mxu0 %v4046_v43  ;;  %4860 = vmatpush3.bf16.msra.mxu1 %v4046_v43  ;;  %v3953_v24 = vld [vmem:[#allocation3 + $0x8] sm:$0xff] }
  0xfe   : > { %v5779_v56 = vsel %vm5186_vm9, %v4579_v61, %v2748_v17  ;;  %v2750_v35 = vrot.slane %v2748_v17, 4  ;;  %v1485_v19 = vpop.permute.xlu1 %1484  ;;  %v3656_v16 = vld [vmem:[#allocation2 + $0x7c] sm:$0xf]  ;;  %v3333_v11 = vor.u32 %v3332_v57, %v3329_v54  ;;  %v3657_v3 = vld [vmem:[#allocation2 + $0x80] sm:$0x1]  ;;  %v4642_v63 = vrot.slane %v3655_v8, 9 }
  0xff   : > { %v2323_v28 = vor.u32 %v2322_v15, %v2318_v37  ;;  %v2319_v52 = vsel %vm5193_vm10, %v2314_v34, %v2318_v37  ;;  %v3338_v60 = vrot.slane %v3336_v50, 5  ;;  %3037 = vrot.lane.b32.xlu0 %v4937_v40, %s5033_s13  ;;  %v3342_v2 = vrot.slane %v3340_v51, 4  ;;  %v3113_v1 = vld [vmem:[#allocation2 + $0x84] sm:$0xf]  ;;  %1529 = vst.msk [vmem:[#allocation3 + $0x20] sm:$0xff] %vm1524_vm15, %v1485_v19 }
 0x100   : > { %v2752_v39 = vsel %vm5186_vm9, %v2750_v35, %v2751_v38  ;;  %v3114_v44 = vld [vmem:[#allocation2 + $0x88] sm:$0xf]  ;;  %v3351_v26 = vshrl.u32 %v3113_v1, 16  ;;  %v3354_v49 = vshll.u32 %v3113_v1, 16  ;;  %v3334_v9 = vrot.slane %v3333_v11, 4 }
 0x101   : > { %v2324_v53 = vrot.slane %v2323_v28, 4  ;;  %v4595_v62 = vcombine.low %v5779_v56, %v2752_v39  ;;  %v3343_v4 = vor.u32 %v3342_v2, %v3338_v60  ;;  %v3360_v5 = vshll.u32 %v3114_v44, 16  ;;  %v3115_v58 = vld [vmem:[#allocation2 + $0x8c] sm:$0x1]  ;;  %v1023_v6 = vld [vmem:[#allocation2 + $0x78] sm:$0xf] }
 0x102   : > { %v3364_v0 = vshrl.u32 %v3114_v44, 16  ;;  %v1809_v22 = vpop.permute.xlu0 %1808  ;;  %v3353_v10 = vrot.slane %v3351_v26, 4  ;;  %v3356_v37 = vrot.slane %v3354_v49, 5  ;;  %v3339_v38 = vsel %vm5193_vm10, %v3334_v9, %v3338_v60  ;;  %v1024_v28 = vld [vmem:[#allocation2 + $0x7c] sm:$0xf]  ;;  %v3954_v35 = vld [vmem:[#allocation3 + $0x10] sm:$0xff] }
 0x103   : > { %v2329_v61 = vsel %vm5193_vm10, %v2324_v53, %v2328_v14  ;;  %v1487_v12 = vpop.permute.xlu1 %1486  ;;  %1853 = vst.msk [vmem:[#allocation3 + $0x20] sm:$0xff] %vm1848_vm1, %v1809_v22  ;;  %v3344_v55 = vrot.slane %v3343_v4, 4  ;;  %v3362_v15 = vrot.slane %v3360_v5, 5  ;;  %v3952_v14 = vld [vmem:[#allocation3] sm:$0xff]  ;;  %v3370_v18 = vshll.u32 %v3115_v58, 16  ;;  %v4939_v45 = vld [vmem:[#allocation2 + $0x84] sm:$0xff]  }
 0x104   : > { %v4563_v33 = vcombine.low %v2319_v52, %v2329_v61  ;;  %v3366_v17 = vrot.slane %v3364_v0, 4  ;;  %1530 = vst.msk [vmem:[#allocation3 + $0x28] sm:$0xff] %vm1524_vm15, %v1487_v12  ;;  %v3785_v20 = vrot.slane %v3656_v16, 5  ;;  %v3788_v21 = vrot.slane %v3657_v3, 5  ;;  %v1025_v56 = vld [vmem:[#allocation2 + $0x80] sm:$0x1] }
 0x105   : > { %v3349_v32 = vsel %vm5193_vm10, %v3344_v55, %v3348_v59  ;;  %v3357_v27 = vor.u32 %v3356_v37, %v3353_v10  ;;  %vm3995_vm8 = vcmask 293888   ;;  %v3372_v46 = vrot.slane %v3370_v18, 5  ;;  %v3658_v52 = vld [vmem:[#allocation2 + $0x84] sm:$0xe]  ;;  %v3659_v60 = vld [vmem:[#allocation2 + $0x88] sm:$0xf] }
 0x106   : > { %2540 = vrot.lane.b32.xlu1 %v4563_v33, %s5036_s16  ;;  %v3367_v34 = vor.u32 %v3366_v17, %v3362_v15  ;;  %v1986_v40 = vpop.permute.xlu0 %1985  ;;  %v4626_v41 = vcombine.low %v3339_v38, %v3349_v32  ;;  %v3786_v50 = vsel %vm5186_vm9, %v4642_v63, %v3785_v20  ;;  %v3787_v51 = vrot.slane %v3785_v20, 4  ;;  %4764 = vmatprep.mubr.msk.bf16.mxu0 %vm3995_vm8, %v3952_v14  ;;  %v3660_v2 = vld [vmem:[#allocation2 + $0x8c] sm:$0x1]  ;;  %v1026_v59 = vld [vmem:[#allocation2 + $0x84] sm:$0xf] }
 0x107   : > { %v1811_v53 = vpop.permute.xlu1 %1810  ;;  %2030 = vst.msk [vmem:[#allocation3 + $0x20] sm:$0xff] %vm2025_vm2, %v1986_v40  ;;  %v3358_v39 = vrot.slane %v3357_v27, 4  ;;  %v1285_v54 = vshrl.u32 %v1023_v6, 16  ;;  %v1288_v57 = vshll.u32 %v1023_v6, 16  ;;  %4765 = vmatmul.mubr.msk.bf16.vlgmr.msra.gmra.mrb[0].mxu0 %vm3995_vm8, %v3953_v24  ;;  %v1294_v19 = vshll.u32 %v1024_v28, 16  ;;  %v4955_v26 = vld [vmem:[#allocation2 + $0x60] sm:$0xff]  }
 0x108   : > { %v3368_v47 = vrot.slane %v3367_v34, 4  ;;  %1854 = vst.msk [vmem:[#allocation3 + $0x28] sm:$0xff] %vm1848_vm1, %v1811_v53  ;;  %3582 = vrot.lane.b32.xlu0 %v4626_v41, %s5037_s17  ;;  %v3789_v8 = vsel %vm5186_vm9, %v3787_v51, %v3788_v21  ;;  %v1298_v61 = vshrl.u32 %v1024_v28, 16  ;;  %4768 = vmatprep.mubr.msk.bf16.mxu0 %vm3995_vm8, %v3954_v35  ;;  %v1027_v44 = vld [vmem:[#allocation2 + $0x88] sm:$0xf]  ;;  %v4643_v22 = vrot.slane %v3658_v52, 9 }
 0x109   : > { %v3363_v1 = vsel %vm5193_vm10, %v3358_v39, %v3362_v15  ;;  %v4658_v33 = vcombine.low %v3786_v50, %v3789_v8  ;;  %v1287_v11 = vrot.slane %v1285_v54, 4  ;;  %v1290_v49 = vrot.slane %v1288_v57, 5  ;;  %985 = vst.msk [vmem:[#allocation3 + $0x40] sm:$0xff] %vm976_vm14, %v4955_v26  ;;  %v1028_v63 = vld [vmem:[#allocation2 + $0x8c] sm:$0x1]  ;;  %v3955_v15 = vld [vmem:[#allocation3 + $0x18] sm:$0xff] }
 0x10a   : > { %2861 = vrot.lane.b32.xlu1 %v4595_v62, %s5034_s14  ;;  %v1304_v62 = vshll.u32 %v1025_v56, 16  ;;  %v3373_v16 = vsel %vm5193_vm10, %v3368_v47, %v3372_v46  ;;  %v1296_v5 = vrot.slane %v1294_v19, 5  ;;  %v1300_v0 = vrot.slane %v1298_v61, 4  ;;  %v1571_v37 = vld [vmem:[#allocation2 + $0x78] sm:$0xe]  ;;  %v4956_v6 = vld [vmem:[#allocation2 + $0x6c] sm:$0xff]  }
 0x10b   : > { %v4627_v4 = vcombine.low %v3363_v1, %v3373_v16  ;;  %v3792_v9 = vrot.slane %v3659_v60, 5  ;;  %v3795_v58 = vrot.slane %v3660_v2, 5  ;;  %v1291_v10 = vor.u32 %v1290_v49, %v1287_v11  ;;  %v1572_v20 = vld [vmem:[#allocation2 + $0x7c] sm:$0xf]  ;;  %v1573_v56 = vld [vmem:[#allocation2 + $0x80] sm:$0x1] }
 0x10c   : > { %v1306_v3 = vrot.slane %v1304_v62, 5  ;;  %3903 = vrot.lane.b32.xlu0 %v4658_v33, %s5035_s15  ;;  %v1301_v43 = vor.u32 %v1300_v0, %v1296_v5  ;;  %v1309_v12 = vshrl.u32 %v1026_v59, 16  ;;  %v1312_v55 = vshll.u32 %v1026_v59, 16  ;;  %v1574_v46 = vld [vmem:[#allocation2 + $0x84] sm:$0xe]  ;;  %986 = vst.msk [vmem:[#allocation3 + $0x48] sm:$0xff] %vm976_vm14, %v4956_v6 }
 0x10d   : > { %v3793_v17 = vsel %vm5186_vm9, %v4643_v22, %v3792_v9  ;;  %v3794_v14 = vrot.slane %v3792_v9, 4  ;;  %v1318_v38 = vshll.u32 %v1027_v44, 16  ;;  %v1322_v18 = vshrl.u32 %v1027_v44, 16  ;;  %v1575_v39 = vld [vmem:[#allocation2 + $0x88] sm:$0xf] }
 0x10e   : > { %3039 = vrot.lane.b32.xlu1 %v4939_v45, %s5033_s13  ;;  %v2531_v21 = vpop.permute.xlu0 %2530  ;;  %v1292_v32 = vrot.slane %v1291_v10, 4  ;;  %v1302_v27 = vrot.slane %v1301_v43, 4  ;;  %v1311_v34 = vrot.slane %v1309_v12, 4  ;;  %v1314_v28 = vrot.slane %v1312_v55, 5  ;;  %v1576_v47 = vld [vmem:[#allocation2 + $0x8c] sm:$0x1] }
 0x10f   : > { %2575 = vst.msk [vmem:[#allocation3 + $0x20] sm:$0xff] %vm2570_vm3, %v2531_v21  ;;  %v3796_v35 = vsel %vm5186_vm9, %v3794_v14, %v3795_v58  ;;  %v1320_v40 = vrot.slane %v1318_v38, 5  ;;  %v1324_v45 = vrot.slane %v1322_v18, 4  ;;  %v1328_v41 = vshll.u32 %v1028_v63, 16  ;;  %v1988_v50 = vpop.permute.xlu1 %1987  ;;  %4769 = vmatmul.mubr.msk.bf16.gmra.mrb[4].mxu0 %vm3995_vm8, %v3955_v15  ;;  %v2072_v44 = vld [vmem:[#allocation2 + $0x84] sm:$0xf] }
 0x110   : > { %v1297_v51 = vsel %vm5193_vm10, %v1292_v32, %v1296_v5  ;;  %v1307_v24 = vsel %vm5193_vm10, %v1302_v27, %v1306_v3  ;;  %v4659_v52 = vcombine.low %v3793_v17, %v3796_v35  ;;  %v1315_v53 = vor.u32 %v1314_v28, %v1311_v34  ;;  %2031 = vst.msk [vmem:[#allocation3 + $0x28] sm:$0xff] %vm2025_vm2, %v1988_v50  ;;  %v813_v0 = vld [vmem:[#allocation2 + $0x90] sm:$0xf]  ;;  %v2073_v3 = vld [vmem:[#allocation2 + $0x88] sm:$0xf] }
 0x111   : > { %v4500_v54 = vcombine.low %v1297_v51, %v1307_v24  ;;  %v1325_v57 = vor.u32 %v1324_v45, %v1320_v40  ;;  %v1330_v60 = vrot.slane %v1328_v41, 5  ;;  %v4516_v8 = vrot.slane %v1571_v37, 9  ;;  %v2074_v22 = vld [vmem:[#allocation2 + $0x8c] sm:$0x1]  ;;  %v817_v18 = vld [vmem:[#allocation2 + $0x98] sm:$0x1] }
 0x112   : > { %3584 = vrot.lane.b32.xlu1 %v4627_v4, %s5037_s17  ;;  %v2852_v19 = vpop.permute.xlu0 %2851  ;;  %3905 = vrot.lane.b32.xlu0 %v4659_v52, %s5035_s15  ;;  %v1316_v61 = vrot.slane %v1315_v53, 4  ;;  %v1712_v62 = vrot.slane %v1572_v20, 5  ;;  %v1715_v2 = vrot.slane %v1573_v56, 5  ;;  %v4517_v1 = vrot.slane %v1574_v46, 9  ;;  %v2617_v20 = vld [vmem:[#allocation2 + $0x84] sm:$0xe] }
 0x113   : > { %2896 = vst.msk [vmem:[#allocation3 + $0x20] sm:$0xff] %vm2891_vm4, %v2852_v19  ;;  %v1326_v16 = vrot.slane %v1325_v57, 4  ;;  %v1719_v33 = vrot.slane %v1575_v39, 5  ;;  %v1722_v11 = vrot.slane %v1576_v47, 5  ;;  %v598_v59 = vshrl.u32 %v5759_v7, 16  ;;  %v4959_v41 = vld [vmem:[#allocation2 + $0x78] sm:$0xff]  }
 0x114   : > { %v1321_v26 = vsel %vm5193_vm10, %v1316_v61, %v1320_v40  ;;  %v1713_v4 = vsel %vm5186_vm9, %v4516_v8, %v1712_v62  ;;  %v1714_v49 = vrot.slane %v1712_v62, 4  ;;  %v601_v5 = vshll.u32 %v5759_v7, 16  ;;  %v2618_v34 = vld [vmem:[#allocation2 + $0x88] sm:$0xf]  ;;  %v2619_v53 = vld [vmem:[#allocation2 + $0x8c] sm:$0x1] }
 0x115   : > { %v1331_v9 = vsel %vm5193_vm10, %v1326_v16, %v1330_v60  ;;  %v1720_v58 = vsel %vm5186_vm9, %v4517_v1, %v1719_v33  ;;  %v1721_v10 = vrot.slane %v1719_v33, 4  ;;  %v600_v43 = vrot.slane %v598_v59, 7  ;;  %v4960_v46 = vld [vmem:[#allocation2 + $0x84] sm:$0xff]   ;;  %987 = vst.msk [vmem:[#allocation3 + $0x50] sm:$0xff] %vm976_vm14, %v4959_v41 }
 0x116   : > { %1496 = vrot.lane.b32.xlu1 %v4500_v54, %s5031_s11  ;;  %v3030_v63 = vpop.permute.xlu0 %3029  ;;  %v4501_v12 = vcombine.low %v1321_v26, %v1331_v9  ;;  %v1716_v55 = vsel %vm5186_vm9, %v1714_v49, %v1715_v2  ;;  %v606_v37 = vshrl.u32 %v5769_v13, 16  ;;  %v609_v7 = vshll.u32 %v5769_v13, 16  ;;  %v4941_v13 = vld [vmem:[#allocation2 + $0x84] sm:$0xff]   ;;  %988 = vst.msk [vmem:[#allocation3 + $0x58] sm:$0xff] %vm976_vm14, %v4960_v46 }
 0x117   : > { %3074 = vst.msk [vmem:[#allocation3 + $0x20] sm:$0xff] %vm3069_vm5, %v3030_v63  ;;  %v4532_v15 = vcombine.low %v1713_v4, %v1716_v55  ;;  %v1723_v17 = vsel %vm5186_vm9, %v1721_v10, %v1722_v11  ;;  %v603_v14 = vor.u32 %v601_v5, %v600_v43  ;;  %v604_v38 = vrot.slane %v600_v43, 4 }
 0x118   : > { %v4533_v21 = vcombine.low %v1720_v58, %v1723_v17  ;;  %v608_v6 = vrot.slane %v606_v37, 7  ;;  %v2331_v32 = vshrl.u32 %v2072_v44, 16  ;;  %v2334_v27 = vshll.u32 %v2072_v44, 16 }
 0x119   : > { %1820 = vrot.lane.b32.xlu0 %v4532_v15, %s5030_s10  ;;  %v814_v28 = vsel %vm5207_vm12, %v603_v14, %v813_v0  ;;  %v2340_v56 = vshll.u32 %v2073_v3, 16  ;;  %v2344_v35 = vshrl.u32 %v2073_v3, 16  ;;  %v2350_v40 = vshll.u32 %v2074_v22, 16  ;;  %v820_v22 = vld [vmem:[#allocation2 + $0x9c] sm:$0xf] }
 0x11a   : > { %1498 = vrot.lane.b32.xlu1 %v4501_v12, %s5031_s11  ;;  %v2533_v45 = vpop.permute.xlu1 %2532  ;;  %v611_v50 = vor.u32 %v609_v7, %v608_v6  ;;  %v613_v51 = vrot.slane %v608_v6, 4  ;;  %815 = vst [vmem:[#allocation2 + $0x90] sm:$0xf] %v814_v28  ;;  %v2333_v24 = vrot.slane %v2331_v32, 4  ;;  %v2336_v52 = vrot.slane %v2334_v27, 5  ;;  %v306_v32 = vld [vmem:[%s5179_s9 + $0xd8] sm:$0xff] }
 0x11b   : > { %2576 = vst.msk [vmem:[#allocation3 + $0x28] sm:$0xff] %vm2570_vm3, %v2533_v45  ;;  %v2342_v39 = vrot.slane %v2340_v56, 5  ;;  %v2346_v47 = vrot.slane %v2344_v35, 4  ;;  %v2352_v54 = vrot.slane %v2350_v40, 5  ;;  %v4580_v57 = vrot.slane %v2617_v20, 9 }
 0x11c   : > { %v612_v60 = vsel %vm5201_vm11, %v604_v38, %v611_v50  ;;  %v2337_v8 = vor.u32 %v2336_v52, %v2333_v24  ;;  %v818_v19 = vsel %vm5215_vm13, %v613_v51, %v817_v18  ;;  %v2755_v61 = vrot.slane %v2618_v34, 5  ;;  %v824_v12 = vld [vmem:[#allocation2 + $0xa4] sm:$0x1] }
 0x11d   : > { %1997 = vrot.lane.b32.xlu0 %v4941_v13, %s5032_s12  ;;  %816 = vst.msk [vmem:[#allocation2 + $0x94] sm:$0xf] %vm223_vm0, %v612_v60  ;;  %v2347_v62 = vor.u32 %v2346_v47, %v2342_v39  ;;  %819 = vst [vmem:[#allocation2 + $0x98] sm:$0x1] %v818_v19  ;;  %v2758_v2 = vrot.slane %v2619_v53, 5  ;;  %v615_v1 = vshrl.u32 %v5774_v25, 16 }
 0x11e   : > { %1822 = vrot.lane.b32.xlu1 %v4533_v21, %s5030_s10  ;;  %v618_v16 = vshll.u32 %v5774_v25, 16  ;;  %v2854_v33 = vpop.permute.xlu1 %2853  ;;  %v2338_v11 = vrot.slane %v2337_v8, 4  ;;  %v2757_v59 = vrot.slane %v2755_v61, 4  ;;  %v623_v44 = vshrl.u32 %v5789_v31, 16  ;;  %v307_v50 = vld [vmem:[%s5179_s9 + $0xe0] sm:$0xff] }
 0x11f   : > { %2897 = vst.msk [vmem:[#allocation3 + $0x28] sm:$0xff] %vm2891_vm4, %v2854_v33  ;;  %v3575_v26 = vpop.permute.xlu0 %3574  ;;  %v2348_v4 = vrot.slane %v2347_v62, 4  ;;  %v617_v49 = vrot.slane %v615_v1, 7  ;;  %v626_v5 = vshll.u32 %v5789_v31, 16  ;;  %v632_v25 = vshrl.u32 %v5796_v30, 16 }
 0x120   : > { %3619 = vst.msk [vmem:[#allocation3 + $0x20] sm:$0xff] %vm3614_vm6, %v3575_v26  ;;  %v2343_v0 = vsel %vm5193_vm10, %v2338_v11, %v2342_v39  ;;  %v625_v3 = vrot.slane %v623_v44, 7  ;;  %v2756_v10 = vsel %vm5186_vm9, %v4580_v57, %v2755_v61  ;;  %v2759_v43 = vsel %vm5186_vm9, %v2757_v59, %v2758_v2 }
 0x121   : > { %v2353_v9 = vsel %vm5193_vm10, %v2348_v4, %v2352_v54  ;;  %v2075_v58 = vld [vmem:[#allocation2 + $0x90] sm:$0xf]  ;;  %v620_v63 = vor.u32 %v618_v16, %v617_v49  ;;  %v621_v38 = vrot.slane %v617_v49, 4  ;;  %v4596_v28 = vcombine.low %v2756_v10, %v2759_v43  ;;  %v308_v49 = vld [vmem:[%s5179_s9 + $0xe8] sm:$0xff] }
 0x122   : > { %v2620_v31 = vld [vmem:[#allocation2 + $0x90] sm:$0xe]  ;;  %v3032_v55 = vpop.permute.xlu1 %3031  ;;  %v4564_v37 = vcombine.low %v2343_v0, %v2353_v9  ;;  %v2355_v7 = vshrl.u32 %v2075_v58, 16  ;;  %v2358_v15 = vshll.u32 %v2075_v58, 16  ;;  %v628_v18 = vor.u32 %v626_v5, %v625_v3 }
 0x123   : > { %v4581_v17 = vrot.slane %v2620_v31, 9  ;;  %3075 = vst.msk [vmem:[#allocation3 + $0x28] sm:$0xff] %vm3069_vm5, %v3032_v55  ;;  %v3896_v14 = vpop.permute.xlu0 %3895  ;;  %v630_v20 = vrot.slane %v625_v3, 4  ;;  %v821_v21 = vsel %vm5207_vm12, %v620_v63, %v820_v22  ;;  %v3116_v6 = vld [vmem:[#allocation2 + $0x90] sm:$0xf]  ;;  %v5902_v1 = vpack.c.bf16 %v306_v32, %v306_v32 }
 0x124   : > { %3940 = vst.msk [vmem:[#allocation3 + $0x20] sm:$0xff] %vm3935_vm7, %v3896_v14  ;;  %v4942_v27 = vld [vmem:[#allocation2 + $0x90] sm:$0xff]   ;;  %2542 = vrot.lane.b32.xlu0 %v4564_v37, %s5036_s16  ;;  %v2357_v13 = vrot.slane %v2355_v7, 4  ;;  %822 = vst [vmem:[#allocation2 + $0x9c] sm:$0xf] %v821_v21  ;;  %v2360_v35 = vrot.slane %v2358_v15, 5  ;;  %v629_v41 = vsel %vm5201_vm11, %v621_v38, %v628_v18  ;;  %v5904_v16 = vpack.c.bf16 %v307_v50, %v307_v50 }
 0x125   : > { %v2076_v34 = vld [vmem:[#allocation2 + $0x94] sm:$0xf]  ;;  %v2077_v56 = vld [vmem:[#allocation2 + $0x98] sm:$0x1]  ;;  %1999 = vrot.lane.b32.xlu1 %v4942_v27, %s5032_s12  ;;  %823 = vst.msk [vmem:[#allocation2 + $0xa0] sm:$0xf] %vm223_vm0, %v629_v41  ;;  %v825_v39 = vsel %vm5215_vm13, %v630_v20, %v824_v12  ;;  %v5918_v7 = vpack.c.bf16 %v308_v49, %v308_v49 }
 0x126   : > { %v2364_v40 = vshll.u32 %v2076_v34, 16  ;;  %v2368_v45 = vshrl.u32 %v2076_v34, 16  ;;  %v3577_v46 = vpop.permute.xlu1 %3576  ;;  %v2374_v51 = vshll.u32 %v2077_v56, 16  ;;  %v2621_v24 = vld [vmem:[#allocation2 + $0x94] sm:$0xf]  ;;  %v3375_v53 = vshrl.u32 %v3116_v6, 16 }
 0x127   : > { %v2622_v52 = vld [vmem:[#allocation2 + $0x98] sm:$0x1]  ;;  %3620 = vst.msk [vmem:[#allocation3 + $0x28] sm:$0xff] %vm3614_vm6, %v3577_v46  ;;  %v2361_v47 = vor.u32 %v2360_v35, %v2357_v13  ;;  %v2762_v60 = vrot.slane %v2621_v24, 5  ;;  %v4945_v8 = vld [vmem:[#allocation2 + $0x90] sm:$0xff]   ;;  %v3378_v0 = vshll.u32 %v3116_v6, 16 }
 0x128   : > { %v2366_v54 = vrot.slane %v2364_v40, 5  ;;  %v2370_v57 = vrot.slane %v2368_v45, 4  ;;  %826 = vst [vmem:[#allocation2 + $0xa4] sm:$0x1] %v825_v39  ;;  %v2376_v19 = vrot.slane %v2374_v51, 5  ;;  %2863 = vrot.lane.b32.xlu0 %v4596_v28, %s5034_s14  ;;  %v2765_v61 = vrot.slane %v2622_v52, 5 }
 0x129   : > { %v3117_v62 = vld [vmem:[#allocation2 + $0x94] sm:$0xf]  ;;  %v3118_v2 = vld [vmem:[#allocation2 + $0x98] sm:$0x1]  ;;  %v2362_v33 = vrot.slane %v2361_v47, 4  ;;  %v5908_v59 = vsel %vm5186_vm9, %v4581_v17, %v2762_v60  ;;  %v2764_v44 = vrot.slane %v2762_v60, 4  ;;  %v3898_v4 = vpop.permute.xlu0 %3897 }
 0x12a   : > { %v2371_v11 = vor.u32 %v2370_v57, %v2366_v54  ;;  %v1489_v26 = vpop.permute.xlu1 %1488  ;;  %v3377_v5 = vrot.slane %v3375_v53, 4  ;;  %v3384_v3 = vshll.u32 %v3117_v62, 16  ;;  %v3388_v22 = vshrl.u32 %v3117_v62, 16  ;;  %3941 = vst.msk [vmem:[#allocation3 + $0x28] sm:$0xff] %vm3935_vm7, %v3898_v4  ;;  %v3661_v37 = vld [vmem:[#allocation2 + $0x90] sm:$0xe] }
 0x12b   : > { %1531 = vst.msk [vmem:[#allocation3 + $0x30] sm:$0xff] %vm1524_vm15, %v1489_v26  ;;  %v2367_v9 = vsel %vm5193_vm10, %v2362_v33, %v2366_v54  ;;  %v2766_v10 = vsel %vm5186_vm9, %v2764_v44, %v2765_v61  ;;  %v3394_v43 = vshll.u32 %v3118_v2, 16  ;;  %v3119_v31 = vld [vmem:[#allocation2 + $0x9c] sm:$0xf]  ;;  %v3380_v63 = vrot.slane %v3378_v0, 5 }
 0x12c   : > { %v2372_v58 = vrot.slane %v2371_v11, 4  ;;  %3041 = vrot.lane.b32.xlu0 %v4945_v8, %s5033_s13  ;;  %v3386_v12 = vrot.slane %v3384_v3, 5  ;;  %v3390_v55 = vrot.slane %v3388_v22, 4  ;;  %v3956_v15 = vld [vmem:[#allocation3 + $0x20] sm:$0xff]  ;;  %v4597_v14 = vcombine.low %v5908_v59, %v2766_v10  ;;  %v3120_v18 = vld [vmem:[#allocation2 + $0xa0] sm:$0xf] }
 0x12d   : > { %v3396_v38 = vrot.slane %v3394_v43, 5  ;;  %v635_v20 = vshll.u32 %v5796_v30, 16  ;;  %4772 = vmatprep.mubr.msk.bf16.mxu0 %vm3995_vm8, %v3956_v15  ;;  %v3381_v6 = vor.u32 %v3380_v63, %v3377_v5  ;;  %v3399_v34 = vshrl.u32 %v3119_v31, 16  ;;  %v3662_v13 = vld [vmem:[#allocation2 + $0x94] sm:$0xf]  ;;  %v4946_v8 = vld [vmem:[#allocation2 + $0x9c] sm:$0xff]  }
 0x12e   : > { %v2377_v17 = vsel %vm5193_vm10, %v2372_v58, %v2376_v19  ;;  %v3391_v32 = vor.u32 %v3390_v55, %v3386_v12  ;;  %v3402_v56 = vshll.u32 %v3119_v31, 16  ;;  %v3408_v35 = vshll.u32 %v3120_v18, 16  ;;  %v3663_v41 = vld [vmem:[#allocation2 + $0x98] sm:$0x1]  ;;  %v1029_v53 = vld [vmem:[#allocation2 + $0x90] sm:$0xf] }
 0x12f   : > { %v4565_v21 = vcombine.low %v2367_v9, %v2377_v17  ;;  %v3121_v27 = vld [vmem:[#allocation2 + $0xa4] sm:$0x1]  ;;  %v1491_v28 = vpop.permute.xlu1 %1490  ;;  %v3412_v40 = vshrl.u32 %v3120_v18, 16  ;;  %v1813_v46 = vpop.permute.xlu0 %1812  ;;  %v3382_v50 = vrot.slane %v3381_v6, 4  ;;  %v3401_v24 = vrot.slane %v3399_v34, 4  ;;  %v4961_v43 = vld [vmem:[#allocation2 + $0x90] sm:$0xff]  }
 0x130   : > { %v3418_v45 = vshll.u32 %v3121_v27, 16  ;;  %1532 = vst.msk [vmem:[#allocation3 + $0x38] sm:$0xff] %vm1524_vm15, %v1491_v28  ;;  %v3392_v51 = vrot.slane %v3391_v32, 4  ;;  %v4644_v52 = vrot.slane %v3661_v37, 9  ;;  %v3404_v39 = vrot.slane %v3402_v56, 5 }
 0x131   : > { %2544 = vrot.lane.b32.xlu1 %v4565_v21, %s5036_s16  ;;  %1855 = vst.msk [vmem:[#allocation3 + $0x30] sm:$0xff] %vm1848_vm1, %v1813_v46  ;;  %v3410_v47 = vrot.slane %v3408_v35, 5  ;;  %v3414_v54 = vrot.slane %v3412_v40, 4  ;;  %v1030_v60 = vld [vmem:[#allocation2 + $0x94] sm:$0xf]  ;;  %v3387_v19 = vsel %vm5193_vm10, %v3382_v50, %v3386_v12  ;;  %v3799_v62 = vrot.slane %v3662_v13, 5 }
 0x132   : > { %v3420_v57 = vrot.slane %v3418_v45, 5  ;;  %v3397_v61 = vsel %vm5193_vm10, %v3392_v51, %v3396_v38  ;;  %v3802_v2 = vrot.slane %v3663_v41, 5  ;;  %v3405_v59 = vor.u32 %v3404_v39, %v3401_v24  ;;  %v1031_v26 = vld [vmem:[#allocation2 + $0x98] sm:$0x1]  ;;  %v3664_v49 = vld [vmem:[#allocation2 + $0x9c] sm:$0xe] }
 0x133   : > { %v1815_v33 = vpop.permute.xlu1 %1814  ;;  %v4628_v11 = vcombine.low %v3387_v19, %v3397_v61  ;;  %v3415_v44 = vor.u32 %v3414_v54, %v3410_v47  ;;  %v1333_v4 = vshrl.u32 %v1029_v53, 16  ;;  %v1990_v5 = vpop.permute.xlu0 %1989  ;;  %v3957_v0 = vld [vmem:[#allocation3 + $0x28] sm:$0xff]  ;;  %v3800_v3 = vsel %vm5186_vm9, %v4644_v52, %v3799_v62  ;;  %v1032_v18 = vld [vmem:[#allocation2 + $0x9c] sm:$0xf]  ;;  %989 = vst.msk [vmem:[#allocation3 + $0x60] sm:$0xff] %vm976_vm14, %v4961_v43 }
 0x134   : > { %1856 = vst.msk [vmem:[#allocation3 + $0x38] sm:$0xff] %vm1848_vm1, %v1815_v33  ;;  %v3801_v22 = vrot.slane %v3799_v62, 4  ;;  %v1336_v9 = vshll.u32 %v1029_v53, 16  ;;  %v1342_v58 = vshll.u32 %v1030_v60, 16  ;;  %v3665_v10 = vld [vmem:[#allocation2 + $0xa0] sm:$0xf]  ;;  %4773 = vmatmul.mubr.msk.bf16.gmra.mrb[8].mxu0 %vm3995_vm8, %v3957_v0 }
 0x135   : > { %2865 = vrot.lane.b32.xlu1 %v4597_v14, %s5034_s14  ;;  %2032 = vst.msk [vmem:[#allocation3 + $0x30] sm:$0xff] %vm2025_vm2, %v1990_v5  ;;  %3586 = vrot.lane.b32.xlu0 %v4628_v11, %s5037_s17  ;;  %v3406_v31 = vrot.slane %v3405_v59, 4  ;;  %v3416_v63 = vrot.slane %v3415_v44, 4  ;;  %v1335_v12 = vrot.slane %v1333_v4, 4  ;;  %v1346_v55 = vshrl.u32 %v1030_v60, 16  ;;  %v4962_v21 = vld [vmem:[#allocation2 + $0x9c] sm:$0xff]  }
 0x136   : > { %v3666_v37 = vld [vmem:[#allocation2 + $0xa4] sm:$0x1]  ;;  %v3803_v15 = vsel %vm5186_vm9, %v3801_v22, %v3802_v2  ;;  %v1338_v17 = vrot.slane %v1336_v9, 5  ;;  %v1344_v14 = vrot.slane %v1342_v58, 5  ;;  %v1352_v38 = vshll.u32 %v1031_v26, 16  ;;  %990 = vst.msk [vmem:[#allocation3 + $0x68] sm:$0xff] %vm976_vm14, %v4962_v21 }
 0x137   : > { %v3411_v6 = vsel %vm5193_vm10, %v3406_v31, %v3410_v47  ;;  %v3421_v32 = vsel %vm5193_vm10, %v3416_v63, %v3420_v57  ;;  %v4660_v27 = vcombine.low %v3800_v3, %v3803_v15  ;;  %v1348_v34 = vrot.slane %v1346_v55, 4  ;;  %v1033_v13 = vld [vmem:[#allocation2 + $0xa0] sm:$0xf]  ;;  %v1034_v45 = vld [vmem:[#allocation2 + $0xa4] sm:$0x1] }
 0x138   : > { %v4629_v28 = vcombine.low %v3411_v6, %v3421_v32  ;;  %v1339_v56 = vor.u32 %v1338_v17, %v1335_v12  ;;  %v1354_v35 = vrot.slane %v1352_v38, 5  ;;  %v4645_v40 = vrot.slane %v3664_v49, 9  ;;  %v1577_v24 = vld [vmem:[#allocation2 + $0x90] sm:$0xe]  ;;  %v1578_v54 = vld [vmem:[#allocation2 + $0x94] sm:$0xf] }
 0x139   : > { %3043 = vrot.lane.b32.xlu1 %v4946_v8, %s5033_s13  ;;  %3907 = vrot.lane.b32.xlu0 %v4660_v27, %s5035_s15  ;;  %v1349_v41 = vor.u32 %v1348_v34, %v1344_v14  ;;  %v3806_v46 = vrot.slane %v3665_v10, 5  ;;  %v3809_v50 = vrot.slane %v3666_v37, 5  ;;  %v1357_v51 = vshrl.u32 %v1032_v18, 16  ;;  %v1579_v62 = vld [vmem:[#allocation2 + $0x98] sm:$0x1] }
 0x13a   : > { %v1340_v52 = vrot.slane %v1339_v56, 4  ;;  %v1360_v53 = vshll.u32 %v1032_v18, 16  ;;  %v1366_v39 = vshll.u32 %v1033_v13, 16  ;;  %v1370_v47 = vshrl.u32 %v1033_v13, 16  ;;  %v2535_v57 = vpop.permute.xlu0 %2534  ;;  %v1580_v26 = vld [vmem:[#allocation2 + $0x9c] sm:$0xe] }
 0x13b   : > { %v1350_v60 = vrot.slane %v1349_v41, 4  ;;  %v3807_v8 = vsel %vm5186_vm9, %v4645_v40, %v3806_v46  ;;  %v3808_v19 = vrot.slane %v3806_v46, 4  ;;  %v1359_v61 = vrot.slane %v1357_v51, 4  ;;  %v1992_v2 = vpop.permute.xlu1 %1991  ;;  %2577 = vst.msk [vmem:[#allocation3 + $0x30] sm:$0xff] %vm2570_vm3, %v2535_v57  ;;  %v1581_v3 = vld [vmem:[#allocation2 + $0xa0] sm:$0xf] }
 0x13c   : > { %v1345_v33 = vsel %vm5193_vm10, %v1340_v52, %v1344_v14  ;;  %v1362_v11 = vrot.slane %v1360_v53, 5  ;;  %v1368_v59 = vrot.slane %v1366_v39, 5  ;;  %v1372_v44 = vrot.slane %v1370_v47, 4  ;;  %2033 = vst.msk [vmem:[#allocation3 + $0x38] sm:$0xff] %vm2025_vm2, %v1992_v2  ;;  %v1582_v22 = vld [vmem:[#allocation2 + $0xa4] sm:$0x1] }
 0x13d   : > { %3588 = vrot.lane.b32.xlu1 %v4629_v28, %s5037_s17  ;;  %v1355_v4 = vsel %vm5193_vm10, %v1350_v60, %v1354_v35  ;;  %v3810_v49 = vsel %vm5186_vm9, %v3808_v19, %v3809_v50  ;;  %v1376_v5 = vshll.u32 %v1034_v45, 16  ;;  %v4518_v0 = vrot.slane %v1577_v24, 9  ;;  %v827_v56 = vld [vmem:[#allocation2 + $0xa8] sm:$0xf]  ;;  %v2078_v35 = vld [vmem:[#allocation2 + $0x9c] sm:$0xf] }
 0x13e   : > { %v4502_v9 = vcombine.low %v1345_v33, %v1355_v4  ;;  %v4661_v58 = vcombine.low %v3807_v8, %v3810_v49  ;;  %v1363_v10 = vor.u32 %v1362_v11, %v1359_v61  ;;  %v1373_v43 = vor.u32 %v1372_v44, %v1368_v59  ;;  %v2856_v31 = vpop.permute.xlu0 %2855  ;;  %v2079_v50 = vld [vmem:[#allocation2 + $0xa0] sm:$0xf]  ;;  %v2080_v39 = vld [vmem:[#allocation2 + $0xa4] sm:$0x1]  ;;  %v831_v47 = vld [vmem:[#allocation2 + $0xb0] sm:$0x1] }
 0x13f   : > { %v1378_v63 = vrot.slane %v1376_v5, 5  ;;  %v1726_v12 = vrot.slane %v1578_v54, 5  ;;  %v1729_v55 = vrot.slane %v1579_v62, 5  ;;  %v4519_v37 = vrot.slane %v1580_v26, 9  ;;  %2898 = vst.msk [vmem:[#allocation3 + $0x30] sm:$0xff] %vm2891_vm4, %v2856_v31  ;;  %v4947_v61 = vld [vmem:[#allocation2 + $0x9c] sm:$0xff]  }
 0x140   : > { %3909 = vrot.lane.b32.xlu0 %v4661_v58, %s5035_s15  ;;  %v1364_v15 = vrot.slane %v1363_v10, 4  ;;  %v1374_v17 = vrot.slane %v1373_v43, 4  ;;  %v1733_v14 = vrot.slane %v1581_v3, 5  ;;  %v1736_v38 = vrot.slane %v1582_v22, 5  ;;  %v2623_v60 = vld [vmem:[#allocation2 + $0x9c] sm:$0xe] }
 0x141   : > { %1500 = vrot.lane.b32.xlu1 %v4502_v9, %s5031_s11  ;;  %v1727_v18 = vsel %vm5186_vm9, %v4518_v0, %v1726_v12  ;;  %v1728_v21 = vrot.slane %v1726_v12, 4  ;;  %v634_v6 = vrot.slane %v632_v25, 7  ;;  %v640_v32 = vshrl.u32 %v5902_v1, 16  ;;  %v2624_v8 = vld [vmem:[#allocation2 + $0xa0] sm:$0xf] }
 0x142   : > { %v1369_v27 = vsel %vm5193_vm10, %v1364_v15, %v1368_v59  ;;  %v1379_v34 = vsel %vm5193_vm10, %v1374_v17, %v1378_v63  ;;  %v1734_v13 = vsel %vm5186_vm9, %v4519_v37, %v1733_v14  ;;  %v1735_v28 = vrot.slane %v1733_v14, 4  ;;  %v3034_v40 = vpop.permute.xlu0 %3033  ;;  %v2625_v11 = vld [vmem:[#allocation2 + $0xa4] sm:$0x1] }
 0x143   : > { %v4503_v45 = vcombine.low %v1369_v27, %v1379_v34  ;;  %v1730_v41 = vsel %vm5186_vm9, %v1728_v21, %v1729_v55  ;;  %v637_v25 = vor.u32 %v635_v20, %v634_v6  ;;  %v638_v46 = vrot.slane %v634_v6, 4  ;;  %3076 = vst.msk [vmem:[#allocation3 + $0x30] sm:$0xff] %vm3069_vm5, %v3034_v40 }
 0x144   : > { %v4534_v51 = vcombine.low %v1727_v18, %v1730_v41  ;;  %v1737_v24 = vsel %vm5186_vm9, %v1735_v28, %v1736_v38  ;;  %v642_v52 = vrot.slane %v640_v32, 7  ;;  %v643_v53 = vshll.u32 %v5902_v1, 16 }
 0x145   : > { %1502 = vrot.lane.b32.xlu1 %v4503_v45, %s5031_s11  ;;  %v4535_v54 = vcombine.low %v1734_v13, %v1737_v24  ;;  %v828_v30 = vsel %vm5207_vm12, %v637_v25, %v827_v56  ;;  %v2379_v20 = vshrl.u32 %v2078_v35, 16  ;;  %v2382_v57 = vshll.u32 %v2078_v35, 16  ;;  %v834_v35 = vld [vmem:[#allocation2 + $0xb4] sm:$0xf] }
 0x146   : > { %1824 = vrot.lane.b32.xlu0 %v4534_v51, %s5030_s10  ;;  %v645_v62 = vor.u32 %v643_v53, %v642_v52  ;;  %v647_v2 = vrot.slane %v642_v52, 4  ;;  %829 = vst [vmem:[#allocation2 + $0xa8] sm:$0xf] %v828_v30  ;;  %v2388_v1 = vshll.u32 %v2079_v50, 16  ;;  %v2392_v33 = vshrl.u32 %v2079_v50, 16 }
 0x147   : > { %v2537_v19 = vpop.permute.xlu1 %2536  ;;  %v2381_v59 = vrot.slane %v2379_v20, 4  ;;  %v2384_v44 = vrot.slane %v2382_v57, 5  ;;  %v2398_v26 = vshll.u32 %v2080_v39, 16  ;;  %v4582_v22 = vrot.slane %v2623_v60, 9 }
 0x148   : > { %2578 = vst.msk [vmem:[#allocation3 + $0x38] sm:$0xff] %vm2570_vm3, %v2537_v19  ;;  %v646_v4 = vsel %vm5201_vm11, %v638_v46, %v645_v62  ;;  %v2390_v49 = vrot.slane %v2388_v1, 5  ;;  %v2394_v5 = vrot.slane %v2392_v33, 4  ;;  %v832_v0 = vsel %vm5215_vm13, %v647_v2, %v831_v47  ;;  %v838_v46 = vld [vmem:[#allocation2 + $0xbc] sm:$0x1] }
 0x149   : > { %1826 = vrot.lane.b32.xlu1 %v4535_v54, %s5030_s10  ;;  %830 = vst.msk [vmem:[#allocation2 + $0xac] sm:$0xf] %vm223_vm0, %v646_v4  ;;  %v2385_v3 = vor.u32 %v2384_v44, %v2381_v59  ;;  %833 = vst [vmem:[#allocation2 + $0xb0] sm:$0x1] %v832_v0  ;;  %v2769_v9 = vrot.slane %v2624_v8, 5  ;;  %v2772_v58 = vrot.slane %v2625_v11, 5 }
 0x14a   : > { %2001 = vrot.lane.b32.xlu0 %v4947_v61, %s5032_s12  ;;  %v2395_v43 = vor.u32 %v2394_v5, %v2390_v49  ;;  %v2400_v31 = vrot.slane %v2398_v26, 5  ;;  %v649_v63 = vshrl.u32 %v5904_v16, 16  ;;  %v657_v12 = vshrl.u32 %v5918_v7, 16  ;;  %v309_v8 = vld [vmem:[%s5179_s9 + $0xf0] sm:$0xff] }
 0x14b   : > { %v2858_v10 = vpop.permute.xlu1 %2857  ;;  %v2386_v55 = vrot.slane %v2385_v3, 4  ;;  %v2771_v37 = vrot.slane %v2769_v9, 4  ;;  %v652_v15 = vshll.u32 %v5904_v16, 16  ;;  %v660_v18 = vshll.u32 %v5918_v7, 16 }
 0x14c   : > { %2899 = vst.msk [vmem:[#allocation3 + $0x38] sm:$0xff] %vm2891_vm4, %v2858_v10  ;;  %v2396_v17 = vrot.slane %v2395_v43, 4  ;;  %v651_v14 = vrot.slane %v649_v63, 7  ;;  %v659_v38 = vrot.slane %v657_v12, 7  ;;  %v3579_v21 = vpop.permute.xlu0 %3578  ;;  %v2770_v27 = vsel %vm5186_vm9, %v4582_v22, %v2769_v9  ;;  %v310_v63 = vld [vmem:[%s5179_s9 + $0xf8] sm:$0xff] }
 0x14d   : > { %v2391_v6 = vsel %vm5193_vm10, %v2386_v55, %v2390_v49  ;;  %v2081_v32 = vld [vmem:[#allocation2 + $0xa8] sm:$0xf]  ;;  %v2773_v34 = vsel %vm5186_vm9, %v2771_v37, %v2772_v58  ;;  %3621 = vst.msk [vmem:[#allocation3 + $0x30] sm:$0xff] %vm3614_vm6, %v3579_v21  ;;  %v6020_v22 = vpack.c.bf16 %v309_v8, %v309_v8 }
 0x14e   : > { %v2626_v13 = vld [vmem:[#allocation2 + $0xa8] sm:$0xe]  ;;  %v2401_v16 = vsel %vm5193_vm10, %v2396_v17, %v2400_v31  ;;  %v2403_v56 = vshrl.u32 %v2081_v32, 16  ;;  %v2406_v7 = vshll.u32 %v2081_v32, 16  ;;  %v654_v41 = vor.u32 %v652_v15, %v651_v14 }
 0x14f   : > { %v3036_v28 = vpop.permute.xlu1 %3035  ;;  %v4566_v40 = vcombine.low %v2391_v6, %v2401_v16  ;;  %v4583_v45 = vrot.slane %v2626_v13, 9  ;;  %v655_v25 = vrot.slane %v651_v14, 4  ;;  %v4598_v52 = vcombine.low %v2770_v27, %v2773_v34  ;;  %v3122_v60 = vld [vmem:[#allocation2 + $0xa8] sm:$0xf] }
 0x150   : > { %3077 = vst.msk [vmem:[#allocation3 + $0x38] sm:$0xff] %vm3069_vm5, %v3036_v28  ;;  %v4948_v50 = vld [vmem:[#allocation2 + $0xa8] sm:$0xff]   ;;  %v2405_v24 = vrot.slane %v2403_v56, 4  ;;  %v662_v53 = vor.u32 %v660_v18, %v659_v38  ;;  %v3900_v39 = vpop.permute.xlu0 %3899  ;;  %v2083_v47 = vld [vmem:[#allocation2 + $0xb0] sm:$0x1]  ;;  %v2408_v54 = vrot.slane %v2406_v7, 5  ;;  %v835_v57 = vsel %vm5207_vm12, %v654_v41, %v834_v35 }
 0x151   : > { %v2082_v51 = vld [vmem:[#allocation2 + $0xac] sm:$0xf]  ;;  %2546 = vrot.lane.b32.xlu0 %v4566_v40, %s5036_s16  ;;  %3942 = vst.msk [vmem:[#allocation3 + $0x30] sm:$0xff] %vm3935_vm7, %v3900_v39  ;;  %2003 = vrot.lane.b32.xlu1 %v4948_v50, %s5032_s12  ;;  %v2422_v19 = vshll.u32 %v2083_v47, 16  ;;  %v2628_v62 = vld [vmem:[#allocation2 + $0xb0] sm:$0x1]  ;;  %v6034_v16 = vpack.c.bf16 %v310_v63, %v310_v63 }
 0x152   : > { %v2412_v30 = vshll.u32 %v2082_v51, 16  ;;  %v2416_v20 = vshrl.u32 %v2082_v51, 16  ;;  %v2627_v61 = vld [vmem:[#allocation2 + $0xac] sm:$0xf]  ;;  %v663_v2 = vsel %vm5201_vm11, %v655_v25, %v662_v53  ;;  %v664_v1 = vrot.slane %v659_v38, 4 }
 0x153   : > { %836 = vst [vmem:[#allocation2 + $0xb4] sm:$0xf] %v835_v57  ;;  %v2409_v33 = vor.u32 %v2408_v54, %v2405_v24  ;;  %v2776_v44 = vrot.slane %v2627_v61, 5  ;;  %837 = vst.msk [vmem:[#allocation2 + $0xb8] sm:$0xf] %vm223_vm0, %v663_v2  ;;  %v3581_v26 = vpop.permute.xlu1 %3580  ;;  %v2424_v4 = vrot.slane %v2422_v19, 5 }
 0x154   : > { %v2414_v11 = vrot.slane %v2412_v30, 5  ;;  %v2418_v59 = vrot.slane %v2416_v20, 4  ;;  %v2779_v49 = vrot.slane %v2628_v62, 5  ;;  %v3123_v5 = vld [vmem:[#allocation2 + $0xac] sm:$0xf]  ;;  %v839_v3 = vsel %vm5215_vm13, %v664_v1, %v838_v46  ;;  %3622 = vst.msk [vmem:[#allocation3 + $0x38] sm:$0xff] %vm3614_vm6, %v3581_v26 }
 0x155   : > { %v3124_v0 = vld [vmem:[#allocation2 + $0xb0] sm:$0x1]  ;;  %v2410_v9 = vrot.slane %v2409_v33, 4  ;;  %2867 = vrot.lane.b32.xlu0 %v4598_v52, %s5034_s14  ;;  %v6026_v10 = vsel %vm5186_vm9, %v4583_v45, %v2776_v44  ;;  %v2778_v43 = vrot.slane %v2776_v44, 4  ;;  %v4951_v31 = vld [vmem:[#allocation2 + $0xa8] sm:$0xff]   ;;  %v3902_v12 = vpop.permute.xlu0 %3901  ;;  %v3423_v55 = vshrl.u32 %v3122_v60, 16 }
 0x156   : > { %v2419_v58 = vor.u32 %v2418_v59, %v2414_v11  ;;  %840 = vst [vmem:[#allocation2 + $0xbc] sm:$0x1] %v839_v3  ;;  %v3426_v37 = vshll.u32 %v3122_v60, 16  ;;  %v3432_v15 = vshll.u32 %v3123_v5, 16  ;;  %v3436_v17 = vshrl.u32 %v3123_v5, 16  ;;  %3943 = vst.msk [vmem:[#allocation3 + $0x38] sm:$0xff] %vm3935_vm7, %v3902_v12 }
 0x157   : > { %v2415_v14 = vsel %vm5193_vm10, %v2410_v9, %v2414_v11  ;;  %v2780_v18 = vsel %vm5186_vm9, %v2778_v43, %v2779_v49  ;;  %v3442_v21 = vshll.u32 %v3124_v0, 16  ;;  %v3667_v6 = vld [vmem:[#allocation2 + $0xa8] sm:$0xe]  ;;  %v1493_v32 = vpop.permute.xlu1 %1492  ;;  %v3425_v27 = vrot.slane %v3423_v55, 4  ;;  %v3668_v28 = vld [vmem:[#allocation2 + $0xac] sm:$0xf] }
 0x158   : > { %v2420_v38 = vrot.slane %v2419_v58, 4  ;;  %v3428_v34 = vrot.slane %v3426_v37, 5  ;;  %v3434_v13 = vrot.slane %v3432_v15, 5  ;;  %1533 = vst.msk [vmem:[#allocation3 + $0x40] sm:$0xff] %vm1524_vm15, %v1493_v32  ;;  %v3958_v56 = vld [vmem:[#allocation3 + $0x30] sm:$0xff]  ;;  %v4599_v35 = vcombine.low %v6026_v10, %v2780_v18 }
 0x159   : > { %3045 = vrot.lane.b32.xlu0 %v4951_v31, %s5033_s13  ;;  %v3438_v40 = vrot.slane %v3436_v17, 4  ;;  %v666_v41 = vshrl.u32 %v6020_v22, 16  ;;  %4776 = vmatprep.mubr.msk.bf16.mxu0 %vm3995_vm8, %v3958_v56  ;;  %v3444_v50 = vrot.slane %v3442_v21, 5  ;;  %v3669_v54 = vld [vmem:[#allocation2 + $0xb0] sm:$0x1]  ;;  %v4646_v8 = vrot.slane %v3667_v6, 9 }
 0x15a   : > { %v2425_v7 = vsel %vm5193_vm10, %v2420_v38, %v2424_v4  ;;  %v3125_v45 = vld [vmem:[#allocation2 + $0xb4] sm:$0xf]  ;;  %v3429_v46 = vor.u32 %v3428_v34, %v3425_v27  ;;  %v3126_v51 = vld [vmem:[#allocation2 + $0xb8] sm:$0xf]  ;;  %v3813_v19 = vrot.slane %v3668_v28, 5  ;;  %v3816_v10 = vrot.slane %v3669_v54, 5 }
 0x15b   : > { %v4567_v25 = vcombine.low %v2415_v14, %v2425_v7  ;;  %v3447_v24 = vshrl.u32 %v3125_v45, 16  ;;  %v3439_v52 = vor.u32 %v3438_v40, %v3434_v13  ;;  %v3450_v53 = vshll.u32 %v3125_v45, 16  ;;  %v1817_v30 = vpop.permute.xlu0 %1816  ;;  %v1035_v33 = vld [vmem:[#allocation2 + $0xa8] sm:$0xf]  ;;  %v1036_v49 = vld [vmem:[#allocation2 + $0xac] sm:$0xf] }
 0x15c   : > { %v3456_v39 = vshll.u32 %v3126_v51, 16  ;;  %v3460_v47 = vshrl.u32 %v3126_v51, 16  ;;  %v3430_v20 = vrot.slane %v3429_v46, 4  ;;  %1857 = vst.msk [vmem:[#allocation3 + $0x40] sm:$0xff] %vm1848_vm1, %v1817_v30  ;;  %v1495_v11 = vpop.permute.xlu1 %1494  ;;  %v3814_v26 = vsel %vm5186_vm9, %v4646_v8, %v3813_v19  ;;  %v1037_v5 = vld [vmem:[#allocation2 + $0xb0] sm:$0x1] }
 0x15d   : > { %2548 = vrot.lane.b32.xlu1 %v4567_v25, %s5036_s16  ;;  %v3127_v57 = vld [vmem:[#allocation2 + $0xbc] sm:$0x1]  ;;  %v3449_v60 = vrot.slane %v3447_v24, 4  ;;  %v3440_v61 = vrot.slane %v3439_v52, 4  ;;  %v3452_v62 = vrot.slane %v3450_v53, 5  ;;  %v3815_v4 = vrot.slane %v3813_v19, 4 }
 0x15e   : > { %v3458_v2 = vrot.slane %v3456_v39, 5  ;;  %v3462_v1 = vrot.slane %v3460_v47, 4  ;;  %v3435_v59 = vsel %vm5193_vm10, %v3430_v20, %v3434_v13  ;;  %v3466_v44 = vshll.u32 %v3127_v57, 16  ;;  %1534 = vst.msk [vmem:[#allocation3 + $0x48] sm:$0xff] %vm1524_vm15, %v1495_v11  ;;  %v4952_v0 = vld [vmem:[#allocation2 + $0xb4] sm:$0xff]   ;;  %v4963_v14 = vld [vmem:[#allocation2 + $0xa8] sm:$0xff]  }
 0x15f   : > { %v3445_v3 = vsel %vm5193_vm10, %v3440_v61, %v3444_v50  ;;  %v3453_v9 = vor.u32 %v3452_v62, %v3449_v60  ;;  %v3670_v43 = vld [vmem:[#allocation2 + $0xb4] sm:$0xe]  ;;  %v1994_v31 = vpop.permute.xlu0 %1993  ;;  %v1381_v37 = vshrl.u32 %v1035_v33, 16  ;;  %v1384_v15 = vshll.u32 %v1035_v33, 16  ;;  %v3671_v17 = vld [vmem:[#allocation2 + $0xb8] sm:$0xf] }
 0x160   : > { %v3463_v58 = vor.u32 %v3462_v1, %v3458_v2  ;;  %v3959_v63 = vld [vmem:[#allocation3 + $0x38] sm:$0xff]  ;;  %v4630_v12 = vcombine.low %v3435_v59, %v3445_v3  ;;  %v3468_v55 = vrot.slane %v3466_v44, 5  ;;  %2034 = vst.msk [vmem:[#allocation3 + $0x40] sm:$0xff] %vm2025_vm2, %v1994_v31  ;;  %v3817_v21 = vsel %vm5186_vm9, %v3815_v4, %v3816_v10  ;;  %v3672_v32 = vld [vmem:[#allocation2 + $0xbc] sm:$0x1]  ;;  %v1819_v27 = vpop.permute.xlu1 %1818 }
 0x161   : > { %2869 = vrot.lane.b32.xlu1 %v4599_v35, %s5034_s14  ;;  %4777 = vmatmul.mubr.msk.bf16.gmra.mrb[12].mxu0 %vm3995_vm8, %v3959_v63  ;;  %v3454_v38 = vrot.slane %v3453_v9, 4  ;;  %v1390_v6 = vshll.u32 %v1036_v49, 16  ;;  %v4964_v34 = vld [vmem:[#allocation2 + $0xb4] sm:$0xff]   ;;  %v4662_v13 = vcombine.low %v3814_v26, %v3817_v21  ;;  %v1383_v28 = vrot.slane %v1381_v37, 4  ;;  %1858 = vst.msk [vmem:[#allocation3 + $0x48] sm:$0xff] %vm1848_vm1, %v1819_v27 }
 0x162   : > { %v3464_v18 = vrot.slane %v3463_v58, 4  ;;  %3590 = vrot.lane.b32.xlu0 %v4630_v12, %s5037_s17  ;;  %v1386_v56 = vrot.slane %v1384_v15, 5  ;;  %v1394_v7 = vshrl.u32 %v1036_v49, 16  ;;  %v1038_v35 = vld [vmem:[#allocation2 + $0xb4] sm:$0xf]  ;;  %991 = vst.msk [vmem:[#allocation3 + $0x70] sm:$0xff] %vm976_vm14, %v4963_v14 }
 0x163   : > { %v3459_v40 = vsel %vm5193_vm10, %v3454_v38, %v3458_v2  ;;  %v1392_v25 = vrot.slane %v1390_v6, 5  ;;  %v1400_v46 = vshll.u32 %v1037_v5, 16  ;;  %v1039_v50 = vld [vmem:[#allocation2 + $0xb8] sm:$0xf]  ;;  %992 = vst.msk [vmem:[#allocation3 + $0x78] sm:$0xff] %vm976_vm14, %v4964_v34  ;;  %v4647_v53 = vrot.slane %v3670_v43, 9 }
 0x164   : > { %v3469_v45 = vsel %vm5193_vm10, %v3464_v18, %v3468_v55  ;;  %v1387_v24 = vor.u32 %v1386_v56, %v1383_v28  ;;  %v1396_v52 = vrot.slane %v1394_v7, 4  ;;  %v1583_v39 = vld [vmem:[#allocation2 + $0xa8] sm:$0xe]  ;;  %v3820_v54 = vrot.slane %v3671_v17, 5  ;;  %v1040_v20 = vld [vmem:[#allocation2 + $0xbc] sm:$0x1] }
 0x165   : > { %3047 = vrot.lane.b32.xlu1 %v4952_v0, %s5033_s13  ;;  %v4631_v51 = vcombine.low %v3459_v40, %v3469_v45  ;;  %v1402_v47 = vrot.slane %v1400_v46, 5  ;;  %v3823_v30 = vrot.slane %v3672_v32, 5  ;;  %v1405_v57 = vshrl.u32 %v1038_v35, 16  ;;  %v1584_v60 = vld [vmem:[#allocation2 + $0xac] sm:$0xf] }
 0x166   : > { %3911 = vrot.lane.b32.xlu0 %v4662_v13, %s5035_s15  ;;  %v1388_v8 = vrot.slane %v1387_v24, 4  ;;  %v1397_v19 = vor.u32 %v1396_v52, %v1392_v25  ;;  %v1408_v61 = vshll.u32 %v1038_v35, 16  ;;  %v1414_v62 = vshll.u32 %v1039_v50, 16  ;;  %v1585_v2 = vld [vmem:[#allocation2 + $0xb0] sm:$0x1] }
 0x167   : > { %v3821_v1 = vsel %vm5186_vm9, %v4647_v53, %v3820_v54  ;;  %v3822_v33 = vrot.slane %v3820_v54, 4  ;;  %v1407_v11 = vrot.slane %v1405_v57, 4  ;;  %v1418_v59 = vshrl.u32 %v1039_v50, 16  ;;  %v1586_v44 = vld [vmem:[#allocation2 + $0xb4] sm:$0xe] }
 0x168   : > { %v1393_v26 = vsel %vm5193_vm10, %v1388_v8, %v1392_v25  ;;  %v1398_v4 = vrot.slane %v1397_v19, 4  ;;  %v1410_v49 = vrot.slane %v1408_v61, 5  ;;  %v1416_v5 = vrot.slane %v1414_v62, 5  ;;  %v1587_v0 = vld [vmem:[#allocation2 + $0xb8] sm:$0xf] }
 0x169   : > { %3592 = vrot.lane.b32.xlu1 %v4631_v51, %s5037_s17  ;;  %v3824_v3 = vsel %vm5186_vm9, %v3822_v33, %v3823_v30  ;;  %v1420_v9 = vrot.slane %v1418_v59, 4  ;;  %v1424_v58 = vshll.u32 %v1040_v20, 16  ;;  %v4520_v10 = vrot.slane %v1583_v39, 9  ;;  %v1588_v43 = vld [vmem:[#allocation2 + $0xbc] sm:$0x1]  ;;  %v2539_v31 = vpop.permute.xlu0 %2538  ;;  %v4953_v57 = vld [vmem:[#allocation2 + $0xb4] sm:$0xff]  }
 0x16a   : > { %v1403_v63 = vsel %vm5193_vm10, %v1398_v4, %v1402_v47  ;;  %v4663_v12 = vcombine.low %v3821_v1, %v3824_v3  ;;  %v1411_v55 = vor.u32 %v1410_v49, %v1407_v11  ;;  %v1740_v37 = vrot.slane %v1584_v60, 5  ;;  %2579 = vst.msk [vmem:[#allocation3 + $0x40] sm:$0xff] %vm2570_vm3, %v2539_v31  ;;  %v2084_v46 = vld [vmem:[#allocation2 + $0xb4] sm:$0xf]  ;;  %v841_v52 = vld [vmem:[#allocation2 + $0xc0] sm:$0xf] }
 0x16b   : > { %v4504_v17 = vcombine.low %v1393_v26, %v1403_v63  ;;  %v1421_v14 = vor.u32 %v1420_v9, %v1416_v5  ;;  %v1426_v38 = vrot.slane %v1424_v58, 5  ;;  %v1743_v18 = vrot.slane %v1585_v2, 5  ;;  %v2085_v53 = vld [vmem:[#allocation2 + $0xb8] sm:$0xf]  ;;  %v2086_v8 = vld [vmem:[#allocation2 + $0xbc] sm:$0x1] }
 0x16c   : > { %v1996_v15 = vpop.permute.xlu1 %1995  ;;  %3913 = vrot.lane.b32.xlu0 %v4663_v12, %s5035_s15  ;;  %v1412_v21 = vrot.slane %v1411_v55, 4  ;;  %v1741_v6 = vsel %vm5186_vm9, %v4520_v10, %v1740_v37  ;;  %v1742_v32 = vrot.slane %v1740_v37, 4  ;;  %v4521_v27 = vrot.slane %v1586_v44, 9  ;;  %v3131_v62 = vld [vmem:[#allocation2 + $0xcc] sm:$0xf] }
 0x16d   : > { %2035 = vst.msk [vmem:[#allocation3 + $0x48] sm:$0xff] %vm2025_vm2, %v1996_v15  ;;  %1504 = vrot.lane.b32.xlu1 %v4504_v17, %s5031_s11  ;;  %v1422_v34 = vrot.slane %v1421_v14, 4  ;;  %v1747_v13 = vrot.slane %v1587_v0, 5  ;;  %v1750_v28 = vrot.slane %v1588_v43, 5  ;;  %v668_v56 = vrot.slane %v666_v41, 7  ;;  %v2860_v7 = vpop.permute.xlu0 %2859 }
 0x16e   : > { %v1417_v35 = vsel %vm5193_vm10, %v1412_v21, %v1416_v5  ;;  %v1744_v40 = vsel %vm5186_vm9, %v1742_v32, %v1743_v18  ;;  %v669_v45 = vshll.u32 %v6020_v22, 16  ;;  %v674_v25 = vshrl.u32 %v6034_v16, 16  ;;  %2900 = vst.msk [vmem:[#allocation3 + $0x40] sm:$0xff] %vm2891_vm4, %v2860_v7  ;;  %v845_v22 = vld [vmem:[#allocation2 + $0xc8] sm:$0x1] }
 0x16f   : > { %v1427_v50 = vsel %vm5193_vm10, %v1422_v34, %v1426_v38  ;;  %v4536_v51 = vcombine.low %v1741_v6, %v1744_v40  ;;  %v1748_v41 = vsel %vm5186_vm9, %v4521_v27, %v1747_v13  ;;  %v1749_v24 = vrot.slane %v1747_v13, 4  ;;  %v2629_v44 = vld [vmem:[#allocation2 + $0xb4] sm:$0xe]  ;;  %v2630_v26 = vld [vmem:[#allocation2 + $0xb8] sm:$0xf] }
 0x170   : > { %v4505_v39 = vcombine.low %v1417_v35, %v1427_v50  ;;  %v671_v47 = vor.u32 %v669_v45, %v668_v56  ;;  %v672_v54 = vrot.slane %v668_v56, 4  ;;  %v676_v30 = vrot.slane %v674_v25, 7  ;;  %v2631_v0 = vld [vmem:[#allocation2 + $0xbc] sm:$0x1] }
 0x171   : > { %1828 = vrot.lane.b32.xlu0 %v4536_v51, %s5030_s10  ;;  %v1751_v20 = vsel %vm5186_vm9, %v1749_v24, %v1750_v28  ;;  %v677_v60 = vshll.u32 %v6034_v16, 16  ;;  %v2427_v19 = vshrl.u32 %v2084_v46, 16  ;;  %v2430_v61 = vshll.u32 %v2084_v46, 16  ;;  %v3038_v2 = vpop.permute.xlu0 %3037 }
 0x172   : > { %1506 = vrot.lane.b32.xlu1 %v4505_v39, %s5031_s11  ;;  %v4537_v1 = vcombine.low %v1748_v41, %v1751_v20  ;;  %v681_v33 = vrot.slane %v676_v30, 4  ;;  %v842_v11 = vsel %vm5207_vm12, %v671_v47, %v841_v52  ;;  %v2436_v59 = vshll.u32 %v2085_v53, 16  ;;  %3078 = vst.msk [vmem:[#allocation3 + $0x40] sm:$0xff] %vm3069_vm5, %v3038_v2 }
 0x173   : > { %v679_v4 = vor.u32 %v677_v60, %v676_v30  ;;  %843 = vst [vmem:[#allocation2 + $0xc0] sm:$0xf] %v842_v11  ;;  %v2429_v16 = vrot.slane %v2427_v19, 4  ;;  %v2432_v49 = vrot.slane %v2430_v61, 5  ;;  %v2440_v5 = vshrl.u32 %v2085_v53, 16 }
 0x174   : > { %v2438_v3 = vrot.slane %v2436_v59, 5  ;;  %v2446_v9 = vshll.u32 %v2086_v8, 16  ;;  %v846_v58 = vsel %vm5215_vm13, %v681_v33, %v845_v22  ;;  %v2783_v63 = vrot.slane %v2630_v26, 5  ;;  %v6130_v60 = vld [vmem:[#allocation2 + $0xd4] sm:$0x1] }
 0x175   : > { %2005 = vrot.lane.b32.xlu0 %v4953_v57, %s5032_s12  ;;  %v680_v42 = vsel %vm5201_vm11, %v672_v54, %v679_v4  ;;  %v2433_v43 = vor.u32 %v2432_v49, %v2429_v16  ;;  %v2442_v31 = vrot.slane %v2440_v5, 4  ;;  %847 = vst [vmem:[#allocation2 + $0xc8] sm:$0x1] %v846_v58  ;;  %v4584_v12 = vrot.slane %v2629_v44, 9 }
 0x176   : > { %1830 = vrot.lane.b32.xlu1 %v4537_v1, %s5030_s10  ;;  %844 = vst.msk [vmem:[#allocation2 + $0xc4] sm:$0xf] %vm223_vm0, %v680_v42  ;;  %v2786_v55 = vrot.slane %v2631_v0, 5  ;;  %v3495_v48 = vshrl.u32 %v3131_v62, 16  ;;  %v3498_v37 = vshll.u32 %v3131_v62, 16  ;;  %v2448_v14 = vrot.slane %v2446_v9, 5 }
 0x177   : > { %v2434_v15 = vrot.slane %v2433_v43, 4  ;;  %v2443_v17 = vor.u32 %v2442_v31, %v2438_v3  ;;  %v2785_v38 = vrot.slane %v2783_v63, 4  ;;  %v2784_v34 = vsel %vm5186_vm9, %v4584_v12, %v2783_v63  ;;  %s215_s10 = sand.u32 1, %s5019_s19  }
 0x178   : > { %v2541_v10 = vpop.permute.xlu1 %2540  ;;  %v6115_v32 = vrot.slane %v3495_v48, 4  ;;  %v6122_v28 = vrot.slane %v3498_v37, 5  ;;  %v3504_v56 = vshll.u32 %v6111_v36, 16  ;;  %v3508_v2 = vshrl.u32 %v6111_v36, 16  ;;  %s4369_s25 = scalar_lea.sflag [#allocation5], %s215_s10 }
 0x179   : > { %2580 = vst.msk [vmem:[#allocation3 + $0x48] sm:$0xff] %vm2570_vm3, %v2541_v10  ;;  %v2439_v21 = vsel %vm5193_vm10, %v2434_v15, %v2438_v3  ;;  %v2444_v6 = vrot.slane %v2443_v17, 4  ;;  %v2787_v13 = vsel %vm5186_vm9, %v2785_v38, %v2786_v55  ;;  %v3514_v63 = vshll.u32 %v6130_v60, 16 }
 0x17a   : > { %v2087_v27 = vld [vmem:[#allocation2 + $0xc0] sm:$0xf]  ;;  %v3583_v7 = vpop.permute.xlu0 %3582  ;;  %v4600_v47 = vcombine.low %v2784_v34, %v2787_v13  ;;  %v3501_v37 = vor.u32 %v6122_v28, %v6115_v32  ;;  %v3510_v28 = vrot.slane %v3508_v2, 4  ;;  %vm5039_vm0 = vmmov 0  }
 0x17b   : > { %v2449_v35 = vsel %vm5193_vm10, %v2444_v6, %v2448_v14  ;;  %v2451_v40 = vshrl.u32 %v2087_v27, 16  ;;  %v2454_v45 = vshll.u32 %v2087_v27, 16  ;;  %v2632_v25 = vld [vmem:[#allocation2 + $0xc0] sm:$0xe]  ;;  %3623 = vst.msk [vmem:[#allocation3 + $0x40] sm:$0xff] %vm3614_vm6, %v3583_v7 }
 0x17c   : > { %v2862_v18 = vpop.permute.xlu1 %2861  ;;  %v4568_v46 = vcombine.low %v2439_v21, %v2449_v35  ;;  %v2089_v50 = vld [vmem:[#allocation2 + $0xc8] sm:$0x1]  ;;  %v3128_v41 = vld [vmem:[#allocation2 + $0xc0] sm:$0xf]  ;;  %v4585_v19 = vrot.slane %v2632_v25, 9 }
 0x17d   : > { %2901 = vst.msk [vmem:[#allocation3 + $0x48] sm:$0xff] %vm2891_vm4, %v2862_v18  ;;  %v2634_v51 = vld [vmem:[#allocation2 + $0xc8] sm:$0x1]  ;;  %v4954_v52 = vld [vmem:[#allocation2 + $0xc0] sm:$0xff]   ;;  %v2453_v39 = vrot.slane %v2451_v40, 4  ;;  %v2456_v54 = vrot.slane %v2454_v45, 5 }
 0x17e   : > { %v2088_v53 = vld [vmem:[#allocation2 + $0xc4] sm:$0xf]  ;;  %2550 = vrot.lane.b32.xlu0 %v4568_v46, %s5036_s16  ;;  %v2470_v20 = vshll.u32 %v2089_v50, 16  ;;  %v3904_v8 = vpop.permute.xlu0 %3903  ;;  %2007 = vrot.lane.b32.xlu1 %v4954_v52, %s5032_s12  ;;  %v3471_v62 = vshrl.u32 %v3128_v41, 16  ;;  %v2793_v59 = vrot.slane %v2634_v51, 5  ;;  %v3474_v0 = vshll.u32 %v3128_v41, 16 }
 0x17f   : > { %v2460_v30 = vshll.u32 %v2088_v53, 16  ;;  %v2464_v22 = vshrl.u32 %v2088_v53, 16  ;;  %v2633_v57 = vld [vmem:[#allocation2 + $0xc4] sm:$0xf]  ;;  %3944 = vst.msk [vmem:[#allocation3 + $0x40] sm:$0xff] %vm3935_vm7, %v3904_v8  ;;  %v2457_v1 = vor.u32 %v2456_v54, %v2453_v39  ;;  %v3506_v18 = vrot.slane %v3504_v56, 5 }
 0x180   : > { %v3040_v24 = vpop.permute.xlu1 %3039  ;;  %v2790_v61 = vrot.slane %v2633_v57, 5  ;;  %v3129_v44 = vld [vmem:[#allocation2 + $0xc4] sm:$0xf]  ;;  %v2472_v4 = vrot.slane %v2470_v20, 5  ;;  %v3130_v49 = vld [vmem:[#allocation2 + $0xc8] sm:$0x1] }
 0x181   : > { %3079 = vst.msk [vmem:[#allocation3 + $0x48] sm:$0xff] %vm3069_vm5, %v3040_v24  ;;  %v2462_v33 = vrot.slane %v2460_v30, 5  ;;  %v2466_v11 = vrot.slane %v2464_v22, 4  ;;  %v3473_v5 = vrot.slane %v3471_v62, 4  ;;  %v2458_v3 = vrot.slane %v2457_v1, 4  ;;  %v4957_v58 = vld [vmem:[#allocation2 + $0xc0] sm:$0xff]  }
 0x182   : > { %v2792_v16 = vrot.slane %v2790_v61, 4  ;;  %2871 = vrot.lane.b32.xlu0 %v4600_v47, %s5034_s14  ;;  %v3480_v10 = vshll.u32 %v3129_v44, 16  ;;  %v3484_v42 = vshrl.u32 %v3129_v44, 16  ;;  %v3476_v43 = vrot.slane %v3474_v0, 5  ;;  %v3673_v15 = vld [vmem:[#allocation2 + $0xc0] sm:$0xe] }
 0x183   : > { %v2467_v9 = vor.u32 %v2466_v11, %v2462_v33  ;;  %v3490_v31 = vshll.u32 %v3130_v49, 16  ;;  %v2463_v12 = vsel %vm5193_vm10, %v2458_v3, %v2462_v33  ;;  %v2791_v14 = vsel %vm5186_vm9, %v4585_v19, %v2790_v61  ;;  %v3674_v21 = vld [vmem:[#allocation2 + $0xc4] sm:$0xf]  ;;  %v3675_v6 = vld [vmem:[#allocation2 + $0xc8] sm:$0x1]  ;;  %v4958_v1 = vld [vmem:[#allocation2 + $0xcc] sm:$0xff]  }
 0x184   : > { %v3585_v26 = vpop.permute.xlu1 %3584  ;;  %v3482_v48 = vrot.slane %v3480_v10, 5  ;;  %v3906_v17 = vpop.permute.xlu0 %3905  ;;  %v3477_v38 = vor.u32 %v3476_v43, %v3473_v5  ;;  %v3486_v36 = vrot.slane %v3484_v42, 4  ;;  %v2794_v13 = vsel %vm5186_vm9, %v2792_v16, %v2793_v59  ;;  %v3677_v25 = vld [vmem:[#allocation2 + $0xd0] sm:$0xf]  ;;  %v3676_v30 = vld [vmem:[#allocation2 + $0xcc] sm:$0xe] }
 0x185   : > { %3624 = vst.msk [vmem:[#allocation3 + $0x48] sm:$0xff] %vm3614_vm6, %v3585_v26  ;;  %v2468_v55 = vrot.slane %v2467_v9, 4  ;;  %v3492_v32 = vrot.slane %v3490_v31, 5  ;;  %v4648_v45 = vrot.slane %v3673_v15, 9  ;;  %v3511_v46 = vor.u32 %v3510_v28, %v3506_v18  ;;  %v3678_v8 = vld [vmem:[#allocation2 + $0xd4] sm:$0x1] }
 0x186   : > { %3945 = vst.msk [vmem:[#allocation3 + $0x48] sm:$0xff] %vm3935_vm7, %v3906_v17  ;;  %3049 = vrot.lane.b32.xlu0 %v4957_v58, %s5033_s13  ;;  %v3960_v7 = vld [vmem:[#allocation3 + $0x40] sm:$0xff]  ;;  %v3478_v56 = vrot.slane %v3477_v38, 4  ;;  %v3487_v40 = vor.u32 %v3486_v36, %v3482_v48  ;;  %v3827_v50 = vrot.slane %v3674_v21, 5  ;;  %v3830_v51 = vrot.slane %v3675_v6, 5 }
 0x187   : > { %v2473_v34 = vsel %vm5193_vm10, %v2468_v55, %v2472_v4  ;;  %4780 = vmatprep.mubr.msk.bf16.mxu1 %vm3995_vm8, %v3960_v7  ;;  %v4601_v41 = vcombine.low %v2791_v14, %v2794_v13  ;;  %v3502_v53 = vrot.slane %v3501_v37, 4  ;;  %v3512_v39 = vrot.slane %v3511_v46, 4 }
 0x188   : > { %v1497_v27 = vpop.permute.xlu1 %1496  ;;  %v4569_v35 = vcombine.low %v2463_v12, %v2473_v34  ;;  %v3483_v24 = vsel %vm5193_vm10, %v3478_v56, %v3482_v48  ;;  %v3488_v52 = vrot.slane %v3487_v40, 4  ;;  %v3516_v47 = vrot.slane %v3514_v63, 5  ;;  %v6210_v56 = vld [vmem:[%s6366_s2] ss:$0 sm:$0xff] }
 0x189   : > { %1535 = vst.msk [vmem:[#allocation3 + $0x50] sm:$0xff] %vm1524_vm15, %v1497_v27  ;;  %v3829_v54 = vrot.slane %v3827_v50, 4  ;;  %v3834_v22 = vrot.slane %v3677_v25, 5  ;;  %v3828_v60 = vsel %vm5186_vm9, %v4648_v45, %v3827_v50  ;;  %v3507_v33 = vsel %vm5193_vm10, %v3502_v53, %v3506_v18 }
 0x18a   : > { %2552 = vrot.lane.b32.xlu1 %v4569_v35, %s5036_s16  ;;  %v3493_v57 = vsel %vm5193_vm10, %v3488_v52, %v3492_v32  ;;  %v4649_v11 = vrot.slane %v3676_v30, 9  ;;  %v3517_v59 = vsel %vm5193_vm10, %v3512_v39, %v3516_v47  ;;  %v3837_v4 = vrot.slane %v3678_v8, 5 }
 0x18b   : > { %v1821_v19 = vpop.permute.xlu0 %1820  ;;  %v4632_v61 = vcombine.low %v3483_v24, %v3493_v57  ;;  %v3831_v62 = vsel %vm5186_vm9, %v3829_v54, %v3830_v51  ;;  %v3836_v26 = vrot.slane %v3834_v22, 4  ;;  %v4633_v5 = vcombine.low %v3507_v33, %v3517_v59 }
 0x18c   : > { %v1499_v20 = vpop.permute.xlu1 %1498  ;;  %1859 = vst.msk [vmem:[#allocation3 + $0x50] sm:$0xff] %vm1848_vm1, %v1821_v19  ;;  %v4664_v44 = vcombine.low %v3828_v60, %v3831_v62  ;;  %v3835_v0 = vsel %vm5186_vm9, %v4649_v11, %v3834_v22 }
 0x18d   : > { %1536 = vst.msk [vmem:[#allocation3 + $0x58] sm:$0xff] %vm1524_vm15, %v1499_v20  ;;  %v3961_v2 = vld [vmem:[#allocation3 + $0x48] sm:$0xff]  ;;  %3594 = vrot.lane.b32.xlu0 %v4632_v61, %s5037_s17  ;;  %v3838_v29 = vsel %vm5186_vm9, %v3836_v26, %v3837_v4 }
 0x18e   : > { %2873 = vrot.lane.b32.xlu1 %v4601_v41, %s5034_s14  ;;  %4781 = vmatmul.mubr.msk.bf16.vlgmr.msra.gmra.mrb[0].mxu1 %vm3995_vm8, %v3961_v2  ;;  %v4665_v3 = vcombine.low %v3835_v0, %v3838_v29  ;;  %s216_s14 = scalar_lea.vmem [#allocation4], %s215_s10 }
 0x18f   : > { %v1998_v49 = vpop.permute.xlu0 %1997 }
 0x190   : > { %v1823_v16 = vpop.permute.xlu1 %1822  ;;  %2036 = vst.msk [vmem:[#allocation3 + $0x50] sm:$0xff] %vm2025_vm2, %v1998_v49 }
 0x191   : > { %1860 = vst.msk [vmem:[#allocation3 + $0x58] sm:$0xff] %vm1848_vm1, %v1823_v16  ;;  %3915 = vrot.lane.b32.xlu0 %v4664_v44, %s5035_s15 }
 0x192   : > { %3051 = vrot.lane.b32.xlu1 %v4958_v1, %s5033_s13  ;;  %s4686_s13 = sshll.u32 %s5093_s22, 4  ;;  %s5041_s22 = smov [#allocation4]  }
 0x193   : > { %s6322_s23 = scalar_lea.hbm %s6369_s5, %s4686_s13  ;;  %s4969_s30 = sshll.u32 %s5041_s22, 4  ;;  %s4970_s30 = int_to_ptr.vmem [resolvable:$false] %s4969_s30 }
 0x194   : > { %s4971_s6 = scalar_lea.vmem %s4970_s30, 32 }
 0x196   : > { %3596 = vrot.lane.b32.xlu1 %v4633_v5, %s5037_s17  ;;  %v2543_v9 = vpop.permute.xlu0 %2542 }
 0x197   : > { %2581 = vst.msk [vmem:[#allocation3 + $0x50] sm:$0xff] %vm2570_vm3, %v2543_v9  ;;  %v2000_v58 = vpop.permute.xlu1 %1999 }
 0x198   : > { %2037 = vst.msk [vmem:[#allocation3 + $0x58] sm:$0xff] %vm2025_vm2, %v2000_v58 }
 0x19a   : > { %3917 = vrot.lane.b32.xlu1 %v4665_v3, %s5035_s15  ;;  %v2864_v10 = vpop.permute.xlu0 %2863  ;;  %s4381_s15 = sshll.u32 %s216_s14, 4  ;;  %s6324_s15 = int_to_ptr.vmem [resolvable:$true] %s4381_s15 }
 0x19b   : > { %2902 = vst.msk [vmem:[#allocation3 + $0x50] sm:$0xff] %vm2891_vm4, %v2864_v10  ;;  %s4965_s26 = scalar_lea.vmem %s6324_s15, 16  ;;  %p4972_p0 = scmp.lt.s32.totalorder %s6324_s15, %s4970_s30 }
 0x19c   : > { %p4966_p11 = scmp.ne.s32.totalorder %s6324_s15, %s4965_s26  ;;  %p4973_p1 = scmp.lt.s32.totalorder %s4971_s6, %s4965_s26 }
 0x19e   : > { %v3042_v42 = vpop.permute.xlu0 %3041  ;;  %p4967_p12 = pnand %p4966_p11, %p5110_p5  ;;  %p4974_p2 = por %p4973_p1, %p4972_p0 }
 0x19f   : > { %3080 = vst.msk [vmem:[#allocation3 + $0x50] sm:$0xff] %vm3069_vm5, %v3042_v42 }
 0x1a0   : > { %p4968_p13 = pneg %p4967_p12 }
 0x1a2   : > { %p4975_p3 = pnand %p4974_p2, %p4968_p13 }
 0x1a3   : > { %v2545_v43 = vpop.permute.xlu1 %2544 }
 0x1a4   : > { %2582 = vst.msk [vmem:[#allocation3 + $0x58] sm:$0xff] %vm2570_vm3, %v2545_v43 }
 0x1a7   : > { %v2866_v23 = vpop.permute.xlu1 %2865  ;;  %v3587_v31 = vpop.permute.xlu0 %3586 }
 0x1a8   : > { %2903 = vst.msk [vmem:[#allocation3 + $0x58] sm:$0xff] %vm2891_vm4, %v2866_v23 }
 0x1a9   : > { %3625 = vst.msk [vmem:[#allocation3 + $0x50] sm:$0xff] %vm3614_vm6, %v3587_v31 }
 0x1ab   : > { %v3044_v63 = vpop.permute.xlu1 %3043  ;;  %v3908_v12 = vpop.permute.xlu0 %3907 }
 0x1ac   : > { %3081 = vst.msk [vmem:[#allocation3 + $0x58] sm:$0xff] %vm3069_vm5, %v3044_v63 }
 0x1ad   : > { %3946 = vst.msk [vmem:[#allocation3 + $0x50] sm:$0xff] %vm3935_vm7, %v3908_v12 }
 0x1af   : > { %v3589_v55 = vpop.permute.xlu1 %3588 }
 0x1b0   : > { %3626 = vst.msk [vmem:[#allocation3 + $0x58] sm:$0xff] %vm3614_vm6, %v3589_v55 }
 0x1b2   : > { %v3910_v37 = vpop.permute.xlu0 %3909 }
 0x1b3   : > { %v1501_v48 = vpop.permute.xlu1 %1500  ;;  %3947 = vst.msk [vmem:[#allocation3 + $0x58] sm:$0xff] %vm3935_vm7, %v3910_v37 }
 0x1b4   : > { %1537 = vst.msk [vmem:[#allocation3 + $0x60] sm:$0xff] %vm1524_vm15, %v1501_v48  ;;  %v3962_v15 = vld [vmem:[#allocation3 + $0x50] sm:$0xff] }
 0x1b5   : > { %4784 = vmatprep.mubr.msk.bf16.mxu1 %vm3995_vm8, %v3962_v15 }
 0x1b7   : > { %v1503_v17 = vpop.permute.xlu1 %1502 }
 0x1b8   : > { %1538 = vst.msk [vmem:[#allocation3 + $0x68] sm:$0xff] %vm1524_vm15, %v1503_v17  ;;  %v1825_v14 = vpop.permute.xlu0 %1824 }
 0x1b9   : > { %1861 = vst.msk [vmem:[#allocation3 + $0x60] sm:$0xff] %vm1848_vm1, %v1825_v14 }
 0x1ba   : > { %v3963_v38 = vld [vmem:[#allocation3 + $0x58] sm:$0xff] }
 0x1bb   : > { %v1827_v36 = vpop.permute.xlu1 %1826  ;;  %4785 = vmatmul.mubr.msk.bf16.gmra.mrb[4].mxu1 %vm3995_vm8, %v3963_v38 }
 0x1bc   : > { %1862 = vst.msk [vmem:[#allocation3 + $0x68] sm:$0xff] %vm1848_vm1, %v1827_v36  ;;  %v2002_v18 = vpop.permute.xlu0 %2001 }
 0x1bd   : > { %2038 = vst.msk [vmem:[#allocation3 + $0x60] sm:$0xff] %vm2025_vm2, %v2002_v18 }
 0x1c3   : > { %v2547_v21 = vpop.permute.xlu0 %2546  ;;  %v2004_v6 = vpop.permute.xlu1 %2003 }
 0x1c4   : > { %2583 = vst.msk [vmem:[#allocation3 + $0x60] sm:$0xff] %vm2570_vm3, %v2547_v21 }
 0x1c5   : > { %2039 = vst.msk [vmem:[#allocation3 + $0x68] sm:$0xff] %vm2025_vm2, %v2004_v6 }
 0x1c7   : > { %v2868_v27 = vpop.permute.xlu0 %2867 }
 0x1c8   : > { %2904 = vst.msk [vmem:[#allocation3 + $0x60] sm:$0xff] %vm2891_vm4, %v2868_v27 }
 0x1cb   : > { %v3046_v34 = vpop.permute.xlu0 %3045 }
 0x1cc   : > { %3082 = vst.msk [vmem:[#allocation3 + $0x60] sm:$0xff] %vm3069_vm5, %v3046_v34 }
 0x1cf   : > { %v2549_v13 = vpop.permute.xlu1 %2548 }
 0x1d0   : > { %2584 = vst.msk [vmem:[#allocation3 + $0x68] sm:$0xff] %vm2570_vm3, %v2549_v13 }
 0x1d3   : > { %v2870_v32 = vpop.permute.xlu1 %2869 }
 0x1d4   : > { %2905 = vst.msk [vmem:[#allocation3 + $0x68] sm:$0xff] %vm2891_vm4, %v2870_v32  ;;  %v3591_v28 = vpop.permute.xlu0 %3590 }
 0x1d5   : > { %3627 = vst.msk [vmem:[#allocation3 + $0x60] sm:$0xff] %vm3614_vm6, %v3591_v28 }
 0x1d7   : > { %v3048_v7 = vpop.permute.xlu1 %3047 }
 0x1d8   : > { %3083 = vst.msk [vmem:[#allocation3 + $0x68] sm:$0xff] %vm3069_vm5, %v3048_v7  ;;  %v3912_v35 = vpop.permute.xlu0 %3911 }
 0x1d9   : > { %3948 = vst.msk [vmem:[#allocation3 + $0x60] sm:$0xff] %vm3935_vm7, %v3912_v35 }
 0x1da   : > { %v4766_v45 = vpop.f32.mrb[0].mxu0 }
 0x1db   : > { %v3593_v40 = vpop.permute.xlu1 %3592  ;;  %v4082_v25 = vpop.f32.mrb[1].mxu0  ;;  %v4091_v24 = vadd.f32 %v4766_v45, %v6210_v56 }
 0x1dc   : > { %3628 = vst.msk [vmem:[#allocation3 + $0x68] sm:$0xff] %vm3614_vm6, %v3593_v40  ;;  %v4083_v46 = vadd.f32 %v6210_v56, %v4082_v25  ;;  %v4767_v50 = vpop.f32.mrb[2].mxu0 }
 0x1dd   : > { %v4085_v51 = vpop.f32.mrb[3].mxu0  ;;  %v4094_v54 = vadd.f32 %v4767_v50, %v6210_v56  ;;  %v4211_v22 = vmax.f32 %v4091_v24, 0.0 }
 0x1de   : > { %v3914_v41 = vpop.permute.xlu0 %3913  ;;  %v4086_v52 = vadd.f32 %v6210_v56, %v4085_v51  ;;  %v4209_v47 = vmax.f32 %v4083_v46, 0.0 }
 0x1df   : > { %v1505_v53 = vpop.permute.xlu1 %1504  ;;  %3949 = vst.msk [vmem:[#allocation3 + $0x68] sm:$0xff] %vm3935_vm7, %v3914_v41  ;;  %v4212_v61 = vmax.f32 %v4094_v54, 0.0 }
 0x1e0   : > { %1539 = vst.msk [vmem:[#allocation3 + $0x70] sm:$0xff] %vm1524_vm15, %v1505_v53  ;;  %v3964_v39 = vld [vmem:[#allocation3 + $0x60] sm:$0xff]  ;;  %v4210_v30 = vmax.f32 %v4086_v52, 0.0 }
 0x1e1   : > { %4788 = vmatprep.mubr.msk.bf16.mxu1 %vm3995_vm8, %v3964_v39 }
 0x1e2   : > { %v4241_v20 = vadd.f32 %v4210_v30, %v4209_v47  ;;  %v4770_v57 = vpop.f32.mrb[4].mxu0 }
 0x1e3   : > { %v1829_v60 = vpop.permute.xlu0 %1828  ;;  %v4098_v8 = vpop.f32.mrb[5].mxu0  ;;  %v4107_v59 = vadd.f32 %v4770_v57, %v6210_v56 }
 0x1e4   : > { %v1507_v19 = vpop.permute.xlu1 %1506  ;;  %1863 = vst.msk [vmem:[#allocation3 + $0x70] sm:$0xff] %vm1848_vm1, %v1829_v60  ;;  %v4242_v62 = vadd.f32 %v4241_v20, %v4211_v22  ;;  %v4099_v2 = vadd.f32 %v6210_v56, %v4098_v8  ;;  %v4771_v1 = vpop.f32.mrb[6].mxu0 }
 0x1e5   : > { %1540 = vst.msk [vmem:[#allocation3 + $0x78] sm:$0xff] %vm1524_vm15, %v1507_v19  ;;  %v4101_v33 = vpop.f32.mrb[7].mxu0  ;;  %v4110_v0 = vadd.f32 %v4771_v1, %v6210_v56  ;;  %v4215_v3 = vmax.f32 %v4107_v59, 0.0  ;;  %v4281_v1 = vld [vmem:[%s6367_s3 + $0x8] sm:$0xff] }
 0x1e6   : > { %v3965_v11 = vld [vmem:[#allocation3 + $0x68] sm:$0xff]  ;;  %v4213_v44 = vmax.f32 %v4099_v2, 0.0  ;;  %v4243_v26 = vadd.f32 %v4242_v62, %v4212_v61  ;;  %v4102_v4 = vadd.f32 %v6210_v56, %v4101_v33  ;;  %v5038_v33 = vmov 0.0|0.0  }
 0x1e7   : > { %v2006_v16 = vpop.permute.xlu0 %2005  ;;  %4789 = vmatmul.mubr.msk.bf16.gmra.mrb[8].mxu1 %vm3995_vm8, %v3965_v11  ;;  %v4216_v58 = vmax.f32 %v4110_v0, 0.0  ;;  %v4280_v2 = vld [vmem:[%s6367_s3] sm:$0xff]  ;;  %4831 = vmatprep.subr.bf16.mxu1 %v5038_v33 }
 0x1e8   : > { %v1831_v49 = vpop.permute.xlu1 %1830  ;;  %2040 = vst.msk [vmem:[#allocation3 + $0x70] sm:$0xff] %vm2025_vm2, %v2006_v16  ;;  %v4244_v5 = vadd.f32 %v4243_v26, %v4213_v44  ;;  %v4214_v29 = vmax.f32 %v4102_v4, 0.0  ;;  %v4832_v11 = vpack.c.bf16 %v4281_v1, %v4280_v2 }
 0x1e9   : > { %1864 = vst.msk [vmem:[#allocation3 + $0x78] sm:$0xff] %vm1848_vm1, %v1831_v49 }
 0x1ea   : > { %v4245_v9 = vadd.f32 %v4244_v5, %v4214_v29  ;;  %4833 = vmatpush3.bf16.msra.mxu1 %v4832_v11  ;;  %v4282_v29 = vld [vmem:[%s6367_s3 + $0x10] sm:$0xff] }
 0x1eb   : > { %4834 = vmatprep.subr.bf16.mxu1 %v5038_v33 }
 0x1ec   : > { %v4246_v10 = vadd.f32 %v4245_v9, %v4215_v3  ;;  %v4283_v3 = vld [vmem:[%s6367_s3 + $0x18] sm:$0xff] }
 0x1ee   : > { %v4247_v42 = vadd.f32 %v4246_v10, %v4216_v58 }
 0x1f0   : > { %v2551_v43 = vpop.permute.xlu0 %2550  ;;  %v2008_v23 = vpop.permute.xlu1 %2007 }
 0x1f1   : > { %2585 = vst.msk [vmem:[#allocation3 + $0x70] sm:$0xff] %vm2570_vm3, %v2551_v43 }
 0x1f2   : > { %2041 = vst.msk [vmem:[#allocation3 + $0x78] sm:$0xff] %vm2025_vm2, %v2008_v23 }
 0x1f4   : > { %v2872_v31 = vpop.permute.xlu0 %2871 }
 0x1f5   : > { %2906 = vst.msk [vmem:[#allocation3 + $0x70] sm:$0xff] %vm2891_vm4, %v2872_v31  ;;  %v4284_v31 = vld [vmem:[%s6367_s3 + $0x20] sm:$0xff] }
 0x1f8   : > { %v3050_v63 = vpop.permute.xlu0 %3049 }
 0x1f9   : > { %3084 = vst.msk [vmem:[#allocation3 + $0x70] sm:$0xff] %vm3069_vm5, %v3050_v63  ;;  %v4285_v63 = vld [vmem:[%s6367_s3 + $0x28] sm:$0xff] }
 0x1fc   : > { %v2553_v12 = vpop.permute.xlu1 %2552 }
 0x1fd   : > { %2586 = vst.msk [vmem:[#allocation3 + $0x78] sm:$0xff] %vm2570_vm3, %v2553_v12 }
 0x1ff   : > { %v3595_v48 = vpop.permute.xlu0 %3594 }
 0x200   : > { %v2874_v55 = vpop.permute.xlu1 %2873  ;;  %3629 = vst.msk [vmem:[#allocation3 + $0x70] sm:$0xff] %vm3614_vm6, %v3595_v48  ;;  %v4838_v48 = vpack.c.bf16 %v4285_v63, %v4284_v31 }
 0x201   : > { %2907 = vst.msk [vmem:[#allocation3 + $0x78] sm:$0xff] %vm2891_vm4, %v2874_v55 }
 0x203   : > { %v3916_v15 = vpop.permute.xlu0 %3915 }
 0x204   : > { %v3052_v37 = vpop.permute.xlu1 %3051  ;;  %3950 = vst.msk [vmem:[#allocation3 + $0x70] sm:$0xff] %vm3935_vm7, %v3916_v15  ;;  %v4286_v15 = vld [vmem:[%s6367_s3 + $0x30] sm:$0xff] }
 0x205   : > { %3085 = vst.msk [vmem:[#allocation3 + $0x78] sm:$0xff] %vm3069_vm5, %v3052_v37 }
 0x207   : > { %v4774_v14 = vpop.f32.mrb[8].mxu0 }
 0x208   : > { %v3597_v17 = vpop.permute.xlu1 %3596  ;;  %v4114_v38 = vpop.f32.mrb[9].mxu0  ;;  %v4123_v27 = vadd.f32 %v4774_v14, %v6210_v56 }
 0x209   : > { %3630 = vst.msk [vmem:[#allocation3 + $0x78] sm:$0xff] %vm3614_vm6, %v3597_v17  ;;  %v4115_v36 = vadd.f32 %v6210_v56, %v4114_v38  ;;  %v4775_v18 = vpop.f32.mrb[10].mxu0  ;;  %v4287_v17 = vld [vmem:[%s6367_s3 + $0x38] sm:$0xff]  ;;  %v4288_v38 = vld [vmem:[%s6367_s3 + $0x40] sm:$0xff] }
 0x20a   : > { %v4117_v21 = vpop.f32.mrb[11].mxu0  ;;  %v4126_v7 = vadd.f32 %v4775_v18, %v6210_v56  ;;  %v4219_v40 = vmax.f32 %v4123_v27, 0.0  ;;  %v4841_v14 = vpack.c.bf16 %v4287_v17, %v4286_v15 }
 0x20b   : > { %v4217_v34 = vmax.f32 %v4115_v36, 0.0  ;;  %v4118_v13 = vadd.f32 %v6210_v56, %v4117_v21  ;;  %v3966_v32 = vld [vmem:[#allocation3 + $0x70] sm:$0xff]  ;;  %v4290_v21 = vld [vmem:[%s6367_s3 + $0x50] sm:$0xff] }
 0x20c   : > { %v3918_v6 = vpop.permute.xlu1 %3917  ;;  %4792 = vmatprep.mubr.msk.bf16.mxu1 %vm3995_vm8, %v3966_v32  ;;  %v4220_v25 = vmax.f32 %v4126_v7, 0.0  ;;  %v4289_v36 = vld [vmem:[%s6367_s3 + $0x48] sm:$0xff]  ;;  %v4295_v7 = vld [vmem:[%s6367_s3 + $0x78] sm:$0xff] }
 0x20d   : > { %3951 = vst.msk [vmem:[#allocation3 + $0x78] sm:$0xff] %vm3935_vm7, %v3918_v6  ;;  %v4248_v28 = vadd.f32 %v4247_v42, %v4217_v34  ;;  %v4218_v35 = vmax.f32 %v4118_v13, 0.0  ;;  %v4835_v42 = vpack.c.bf16 %v4283_v3, %v4282_v29  ;;  %v4844_v18 = vpack.c.bf16 %v4289_v36, %v4288_v38  ;;  %v4291_v6 = vld [vmem:[%s6367_s3 + $0x58] sm:$0xff]  ;;  %v4292_v34 = vld [vmem:[%s6367_s3 + $0x60] sm:$0xff]  ;;  %v4293_v13 = vld [vmem:[%s6367_s3 + $0x68] sm:$0xff] }
 0x20e   : > { %v4847_v27 = vpack.c.bf16 %v4291_v6, %v4290_v21  ;;  %v4850_v32 = vpack.c.bf16 %v4293_v13, %v4292_v34 }
 0x20f   : > { %v4249_v45 = vadd.f32 %v4248_v28, %v4218_v35  ;;  %4836 = vmatpush3.bf16.msra.mxu1 %v4835_v42  ;;  %v4294_v28 = vld [vmem:[%s6367_s3 + $0x70] sm:$0xff] }
 0x210   : > { %4837 = vmatprep.subr.bf16.mxu1 %v5038_v33  ;;  %v4853_v35 = vpack.c.bf16 %v4295_v7, %v4294_v28 }
 0x211   : > { %v4250_v46 = vadd.f32 %v4249_v45, %v4219_v40  ;;  %v5040_v40 = vmov 0.0  }
 0x213   : > { %v4251_v51 = vadd.f32 %v4250_v46, %v4220_v25  ;;  %4839 = vmatpush3.bf16.msra.mxu1 %v4838_v48 }
 0x214   : > { %v3967_v50 = vld [vmem:[#allocation3 + $0x78] sm:$0xff]  ;;  %4840 = vmatprep.subr.bf16.mxu1 %v5038_v33 }
 0x215   : > { %4793 = vmatmul.mubr.msk.bf16.gmra.mrb[12].mxu1 %vm3995_vm8, %v3967_v50 }
 0x216   : > { %4828 = vmatprep.mubr.msk.f32.mxu1 %vm5039_vm0, %v5040_v40 }
 0x217   : > { %4842 = vmatpush3.bf16.msra.mxu1 %v4841_v14 }
 0x218   : > { %4843 = vmatprep.subr.bf16.mxu1 %v5038_v33 }
 0x21b   : > { %4845 = vmatpush3.bf16.msra.mxu1 %v4844_v18 }
 0x21c   : > { %4846 = vmatprep.subr.bf16.mxu1 %v5038_v33 }
 0x21f   : > { %4848 = vmatpush3.bf16.msra.mxu1 %v4847_v27 }
 0x220   : > { %4849 = vmatprep.subr.bf16.mxu1 %v5038_v33 }
 0x223   : > { %4851 = vmatpush3.bf16.msra.mxu1 %v4850_v32 }
 0x224   : > { %4852 = vmatprep.subr.bf16.mxu1 %v5038_v33 }
 0x227   : > { %4854 = vmatpush3.bf16.msra.mxu1 %v4853_v35 }
 0x234   : > { %v4778_v41 = vpop.f32.mrb[12].mxu0 }
 0x235   : > { %v4130_v24 = vpop.f32.mrb[13].mxu0  ;;  %v4139_v47 = vadd.f32 %v4778_v41, %v6210_v56 }
 0x236   : > { %v4131_v52 = vadd.f32 %v6210_v56, %v4130_v24  ;;  %v4779_v53 = vpop.f32.mrb[14].mxu0 }
 0x237   : > { %v4133_v39 = vpop.f32.mrb[15].mxu0  ;;  %v4142_v20 = vadd.f32 %v4779_v53, %v6210_v56  ;;  %v4223_v60 = vmax.f32 %v4139_v47, 0.0 }
 0x238   : > { %v4221_v54 = vmax.f32 %v4131_v52, 0.0  ;;  %v4134_v30 = vadd.f32 %v6210_v56, %v4133_v39 }
 0x239   : > { %v4224_v19 = vmax.f32 %v4142_v20, 0.0 }
 0x23a   : > { %v4252_v22 = vadd.f32 %v4251_v51, %v4221_v54  ;;  %v4222_v57 = vmax.f32 %v4134_v30, 0.0 }
 0x23c   : > { %v4253_v8 = vadd.f32 %v4252_v22, %v4222_v57 }
 0x23e   : > { %v4254_v61 = vadd.f32 %v4253_v8, %v4223_v60 }
 0x240   : > { %v4255_v62 = vadd.f32 %v4254_v61, %v4224_v19 }
 0x261   : > { %v4782_v59 = vpop.f32.mrb[0].mxu1 }
 0x262   : > { %v4146_v44 = vpop.f32.mrb[1].mxu1  ;;  %v4155_v49 = vadd.f32 %v4782_v59, %v6210_v56 }
 0x263   : > { %v4147_v26 = vadd.f32 %v6210_v56, %v4146_v44  ;;  %v4783_v4 = vpop.f32.mrb[2].mxu1 }
 0x264   : > { %v4149_v16 = vpop.f32.mrb[3].mxu1  ;;  %v4158_v58 = vadd.f32 %v4783_v4, %v6210_v56  ;;  %v4227_v43 = vmax.f32 %v4155_v49, 0.0 }
 0x265   : > { %v4225_v5 = vmax.f32 %v4147_v26, 0.0  ;;  %v4150_v0 = vadd.f32 %v6210_v56, %v4149_v16 }
 0x266   : > { %v4228_v12 = vmax.f32 %v4158_v58, 0.0 }
 0x267   : > { %v4256_v9 = vadd.f32 %v4255_v62, %v4225_v5  ;;  %v4226_v10 = vmax.f32 %v4150_v0, 0.0 }
 0x269   : > { %v4257_v23 = vadd.f32 %v4256_v9, %v4226_v10 }
 0x26b   : > { %v4258_v55 = vadd.f32 %v4257_v23, %v4227_v43 }
 0x26d   : > { %v4259_v37 = vadd.f32 %v4258_v55, %v4228_v12 }
 0x28e   : > { %v4786_v45 = vpop.f32.mrb[4].mxu1 }
 0x28f   : > { %v4162_v25 = vpop.f32.mrb[5].mxu1  ;;  %v4171_v41 = vadd.f32 %v4786_v45, %v6210_v56 }
 0x290   : > { %v4163_v46 = vadd.f32 %v6210_v56, %v4162_v25  ;;  %v4787_v50 = vpop.f32.mrb[6].mxu1 }
 0x291   : > { %v4165_v51 = vpop.f32.mrb[7].mxu1  ;;  %v4174_v39 = vadd.f32 %v4787_v50, %v6210_v56  ;;  %v4231_v54 = vmax.f32 %v4171_v41, 0.0 }
 0x292   : > { %v4229_v24 = vmax.f32 %v4163_v46, 0.0  ;;  %v4166_v52 = vadd.f32 %v6210_v56, %v4165_v51 }
 0x293   : > { %v4232_v22 = vmax.f32 %v4174_v39, 0.0 }
 0x294   : > { %v4260_v53 = vadd.f32 %v4259_v37, %v4229_v24  ;;  %v4230_v47 = vmax.f32 %v4166_v52, 0.0 }
 0x296   : > { %v4261_v30 = vadd.f32 %v4260_v53, %v4230_v47 }
 0x298   : > { %v4262_v20 = vadd.f32 %v4261_v30, %v4231_v54 }
 0x29a   : > { %v4263_v57 = vadd.f32 %v4262_v20, %v4232_v22 }
 0x2ba   : > { %v4790_v60 = vpop.f32.mrb[8].mxu1 }
 0x2bb   : > { %v4178_v8 = vpop.f32.mrb[9].mxu1  ;;  %v4187_v2 = vadd.f32 %v4790_v60, %v6210_v56 }
 0x2bc   : > { %v4179_v19 = vadd.f32 %v6210_v56, %v4178_v8  ;;  %v4791_v61 = vpop.f32.mrb[10].mxu1 }
 0x2bd   : > { %v4181_v62 = vpop.f32.mrb[11].mxu1  ;;  %v4190_v59 = vadd.f32 %v4791_v61, %v6210_v56  ;;  %v4235_v26 = vmax.f32 %v4187_v2, 0.0 }
 0x2be   : > { %v4233_v1 = vmax.f32 %v4179_v19, 0.0  ;;  %v4182_v33 = vadd.f32 %v6210_v56, %v4181_v62 }
 0x2bf   : > { %v4236_v16 = vmax.f32 %v4190_v59, 0.0 }
 0x2c0   : > { %v4264_v11 = vadd.f32 %v4263_v57, %v4233_v1  ;;  %v4234_v44 = vmax.f32 %v4182_v33, 0.0 }
 0x2c2   : > { %v4265_v4 = vadd.f32 %v4264_v11, %v4234_v44 }
 0x2c4   : > { %v4266_v49 = vadd.f32 %v4265_v4, %v4235_v26 }
 0x2c6   : > { %v4267_v5 = vadd.f32 %v4266_v49, %v4236_v16 }
 0x2e8   : > { %v4794_v0 = vpop.f32.mrb[12].mxu1 }
 0x2e9   : > { %v4194_v29 = vpop.f32.mrb[13].mxu1  ;;  %v4203_v10 = vadd.f32 %v4794_v0, %v6210_v56 }
 0x2ea   : > { %v4195_v3 = vadd.f32 %v6210_v56, %v4194_v29  ;;  %v4795_v9 = vpop.f32.mrb[14].mxu1 }
 0x2eb   : > { %v4197_v58 = vpop.f32.mrb[15].mxu1  ;;  %v4206_v31 = vadd.f32 %v4795_v9, %v6210_v56  ;;  %v4239_v12 = vmax.f32 %v4203_v10, 0.0 }
 0x2ec   : > { %v4237_v42 = vmax.f32 %v4195_v3, 0.0  ;;  %v4198_v43 = vadd.f32 %v6210_v56, %v4197_v58  ;;  %v4296_v56 = vld [vmem:[%s6368_s4] sm:$0x1] }
 0x2ed   : > { %v4240_v48 = vmax.f32 %v4206_v31, 0.0 }
 0x2ee   : > { %v4268_v23 = vadd.f32 %v4267_v5, %v4237_v42  ;;  %v4238_v63 = vmax.f32 %v4198_v43, 0.0 }
 0x2f0   : > { %v4269_v55 = vadd.f32 %v4268_v23, %v4238_v63 }
 0x2f2   : > { %v4270_v37 = vadd.f32 %v4269_v55, %v4239_v12 }
 0x2f4   : > { %v4271_v15 = vadd.f32 %v4270_v37, %v4240_v48 }
 0x2f6   : > { %v4272_v17 = vrot.slane %v4271_v15, 4 }
 0x2f8   : > { %v4273_v14 = vadd.f32 %v4272_v17, %v4271_v15 }
 0x2fa   : > { %v4274_v38 = vrot.slane %v4273_v14, 2 }
 0x2fc   : > { %v4275_v36 = vadd.f32 %v4274_v38, %v4273_v14 }
 0x2fe   : > { %v4276_v18 = vrot.slane %v4275_v36, 1 }
 0x300   : > { %v4277_v21 = vadd.f32 %v4276_v18, %v4275_v36 }
 0x302   : > { %v4279_v6 = vmul.f32 0.00390625, %v4277_v21 }
 0x304   : > { %4829 = vmatmul.mubr.f32.vlgmr.msra.gmra.mrb[16].mxu1 %v4279_v6 }
 0x3d7   : > { %v4363_v27 = vpop.f32.mrb[16].mxu1 }
 0x3d8   : > { %v4364_v34 = vadd.f32 %v4363_v27, %v4296_v56  ;;  %v4830_v13 = vpop.f32.mrb[17].mxu1 }
 0x3da   : > { %4367 = vst [vmem:[%s216_s14] sm:$0x1] %v4364_v34 }
 0x3db   : > { %4978 = shalt.err (!%p4975_p3)
}
 0x3dc   : > { %s4979_s7 = scalar_lea.hbm %s6322_s23, 16  ;;  %s4983_s10 = scalar_lea.hbm %s6369_s5, 32 }
 0x3dd   : > { %p4980_p4 = scmp.ne.s32.totalorder %s6322_s23, %s4979_s7  ;;  %p4984_p9 = scmp.lt.u32.totalorder %s6322_s23, %s6369_s5 }
 0x3de   : > { %p4985_p10 = scmp.lt.u32.totalorder %s4983_s10, %s4979_s7  ;;  %p4987_p12 = scmp.lt.u32.totalorder %s4979_s7, %s6322_s23 }
 0x3df   : > { %p4981_p7 = pnand %p4980_p4, %p5110_p5 }
 0x3e0   : > { %p4986_p11 = por %p4985_p10, %p4984_p9 }
 0x3e1   : > { %p4982_p8 = pneg %p4981_p7 }
 0x3e2   : > { %p4988_p13 = por %p4987_p12, %p4986_p11 }
 0x3e4   : > { %p4989_p0 = pnand %p4988_p13, %p4982_p8 }
 0x3e6   : > { %4992 = shalt.err (!%p4989_p0)
}
 0x3e7   : > { %4863 = dma.vmem_to_hbm [thread:$0]  (%p5110_p5), %s6324_s15, 16, %s6322_s23, %s4369_s25  }
 0x3e8 PF: > { %p4869_p1 = scmp.ge.s32.totalorder %s5027_s21, 2  ;;  %s4393_s13 = sand.u32 1, %s5015_s18  }
 0x3e9   : > { %s4394_s14 = scalar_lea.sflag [#allocation5], %s4393_s13 }
 0x3ea   : > { %p4866_p2 = pnand %p4869_p1, %p5114_p6 }
 0x3ec   : > { %5010 = dma.done.wait (!%p4866_p2), %s4394_s14, 16  }
 0x3ed   : > { %5012 = vsyncadd (!%p4866_p2), %s4394_s14, 4294967280  ;;  %p15_p3 = scmp.ge.s32.totalorder %s5097_s24, 4   ;;  %s6382_s18 = smov %s5019_s19 }
 0x3ee   : > { %s6383_s19 = smov %s5023_s20  ;;  %s6384_s20 = smov %s5108_s27 }
 0x3ef   : > { %s6385_s21 = smov %s5097_s24  ;;  %17 = sbr.rel (!%p15_p3) target bundleno = 3 (0x3), region = 77 }
 0x3f6   :  { %4398 = vsyncpa [#allocation5], 1 }
 0x3f7   :  { %4400 = vsyncpa [#allocation5 + $0x1], 1 }

</bundles_post_ra>
